<compile_context>
chip_gen: v6e
topology: v6e:2x2x1
jax: 0.10.0
libtpu: 0.0.40
codegen_flags: <defaults>
</compile_context>

<pallas_src>
import jax
import jax.numpy as jnp
from jax.experimental import pallas as pl
from jax.experimental.pallas import tpu as pltpu

IC = 2048   # input channels  (fixed by the module: ic = 2048)
OC = 1024   # output channels (fixed by the module: oc = 1024)


def _decouple_kernel(x_ref, w_ref, b_ref, o_ref):
    """grid = (2*OC // tn,): one lane-dense output panel per step.
    Full-K bf16 matmul on the MXU (f32 accumulation), '+ shift' epilogue."""
    acc = jnp.dot(x_ref[...], w_ref[...], preferred_element_type=jnp.float32)
    o_ref[...] = (acc + b_ref[...]).astype(o_ref.dtype)


def prepare_params(w1, w2, scale1, shift1, scale2, shift2):
    """One-time parameter prep (run at init, NOT per call).

    w*:              [IC, OC] f32  (transpose of PyTorch's [OC, IC] weight)
    scale*/shift*:   [1, OC]  f32  (eval-mode BN folded: gamma*rsqrt(var+eps),
                                    beta - mean*scale)
    Returns:
      w_fused: [IC, 2*OC] bf16, BN scale pre-folded into the columns
      shift:   [1, 2*OC]  f32
    """
    assert w1.shape == (IC, OC) and w2.shape == (IC, OC)
    # Fold BN scale into the weights in f32, THEN cast to bf16.
    w_fused = jnp.concatenate([w1 * scale1, w2 * scale2], axis=1)
    w_fused = w_fused.astype(jnp.bfloat16)                      # [IC, 2*OC]
    shift = jnp.concatenate([shift1, shift2], axis=1)           # [1, 2*OC]
    return w_fused, shift.astype(jnp.float32)


def feature_decoupling(x, w_fused, shift, *, tn=1024):
    """x: [B, IC] f32; w_fused: [IC, 2*OC] bf16 (BN-scaled, from prepare_params);
    shift: [1, 2*OC] f32.  Returns (shared, special), each [B, OC] f32."""
    B = x.shape[0]
    assert x.shape == (B, IC)
    assert w_fused.shape == (IC, 2 * OC) and w_fused.dtype == jnp.bfloat16
    assert shift.shape == (1, 2 * OC)
    assert (2 * OC) % tn == 0 and tn % 128 == 0

    n_panels = (2 * OC) // tn
    x_bf = x.astype(jnp.bfloat16)                                # [B, IC]

    cost = pl.CostEstimate(
        flops=2 * B * IC * (2 * OC),
        transcendentals=0,
        bytes_accessed=(w_fused.size * 2       # bf16 weights (dominant)
                        + x_bf.size * 2        # bf16 activations
                        + B * 2 * OC * 4       # f32 output
                        + 2 * OC * 4),         # f32 shift
    )

    out = pl.pallas_call(
        _decouple_kernel,
        out_shape=jax.ShapeDtypeStruct((B, 2 * OC), jnp.float32),
        grid=(n_panels,),
        in_specs=[
            # x stays resident across the whole grid (block index never changes).
            pl.BlockSpec((B, IC), lambda j: (0, 0)),
            # one [IC, tn] weight panel per step (the only real HBM stream).
            pl.BlockSpec((IC, tn), lambda j: (0, j)),
            # per-step shift slice (tiny; decoupled from tn in the wrapper).
            pl.BlockSpec((1, tn), lambda j: (0, j)),
        ],
        out_specs=pl.BlockSpec((B, tn), lambda j: (0, j)),
        compiler_params=pltpu.CompilerParams(
            dimension_semantics=("parallel",)),
        cost_estimate=cost,
    )(x_bf, w_fused, shift)

    # Split the fused [shared | special] output back into the two branches.
    return out[:, :OC], out[:, OC:]


def _make_params(key):
    """Deterministic synthetic parameters mirroring the module's __init__ shapes."""
    k1, k2, k3, k4, k5, k6, k7, k8 = jax.random.split(key, 8)
    # Linear weights (kaiming-normal-ish, fan_out mode: std = sqrt(2 / OC)),
    # stored already transposed to [IC, OC].
    std = (2.0 / OC) ** 0.5
    w1 = jax.random.normal(k1, (IC, OC), jnp.float32) * std
    w2 = jax.random.normal(k2, (IC, OC), jnp.float32) * std
    # BatchNorm1d params: gamma ~ N(1, 0.01), beta = 0; running stats synthetic.
    eps = 1e-5
    g1 = 1.0 + 0.01 * jax.random.normal(k3, (OC,), jnp.float32)
    g2 = 1.0 + 0.01 * jax.random.normal(k4, (OC,), jnp.float32)
    beta1 = jnp.zeros((OC,), jnp.float32)
    beta2 = jnp.zeros((OC,), jnp.float32)
    mean1 = 0.1 * jax.random.normal(k5, (OC,), jnp.float32)
    mean2 = 0.1 * jax.random.normal(k6, (OC,), jnp.float32)
    var1 = jnp.abs(1.0 + 0.1 * jax.random.normal(k7, (OC,), jnp.float32))
    var2 = jnp.abs(1.0 + 0.1 * jax.random.normal(k8, (OC,), jnp.float32))
    # Fold BN (eval mode) into scale/shift.
    s1 = g1 * jax.lax.rsqrt(var1 + eps)
    s2 = g2 * jax.lax.rsqrt(var2 + eps)
    b1 = beta1 - mean1 * s1
    b2 = beta2 - mean2 * s2
    return (w1, w2,
            s1.reshape(1, OC), b1.reshape(1, OC),
            s2.reshape(1, OC), b2.reshape(1, OC))


if __name__ == "__main__":
    key = jax.random.PRNGKey(0)
    kx, kp = jax.random.split(key)

    B = 8  # small batch; IC/OC are fixed to 2048/1024 by the module definition
    x = jax.random.normal(kx, (B, IC), jnp.float32)
    w1, w2, s1, b1, s2, b2 = _make_params(kp)

    # One-time parameter prep (hoisted out of the per-call path).
    w_fused, shift = prepare_params(w1, w2, s1, b1, s2, b2)
    w_fused = jax.block_until_ready(w_fused)
    shift = jax.block_until_ready(shift)

    shared, special = feature_decoupling(x, w_fused, shift)
    shared = jax.block_until_ready(shared)
    special = jax.block_until_ready(special)

    hp = jax.lax.Precision.HIGHEST

    # Reference 1: same quantization as the kernel (BN-scaled f32 weight cast
    # through bf16, bf16 activations), true-f32 matmul.
    xb = x.astype(jnp.bfloat16).astype(jnp.float32)
    w1s = (w1 * s1).astype(jnp.bfloat16).astype(jnp.float32)
    w2s = (w2 * s2).astype(jnp.bfloat16).astype(jnp.float32)
    ref_shared_bf = jnp.dot(xb, w1s, precision=hp) + b1
    ref_special_bf = jnp.dot(xb, w2s, precision=hp) + b2
    assert jnp.allclose(shared, ref_shared_bf, atol=2e-3, rtol=2e-3)
    assert jnp.allclose(special, ref_special_bf, atol=2e-3, rtol=2e-3)

    # Reference 2: full-f32 module semantics (loose tolerance: bf16 cast of the
    # BN-scaled weights and of the activations).
    ref_shared = jnp.dot(x, w1, precision=hp) * s1 + b1
    ref_special = jnp.dot(x, w2, precision=hp) * s2 + b2
    assert jnp.allclose(shared, ref_shared, atol=5e-2, rtol=5e-2)
    assert jnp.allclose(special, ref_special, atol=5e-2, rtol=5e-2)

    print("KERNEL_OK")
</pallas_src>

<mosaic_0001>
module attributes {stable_mosaic.version = 11 : i64} {
  func.func @_decouple_kernel(%arg0: i32, %arg1: memref<8x2048xbf16, #tpu.memory_space<vmem>>, %arg2: memref<2048x1024xbf16, #tpu.memory_space<vmem>>, %arg3: memref<1x1024xf32, #tpu.memory_space<vmem>>, %arg4: memref<8x1024xf32, #tpu.memory_space<vmem>>) attributes {dimension_semantics = [#tpu.dimension_semantics<parallel>], iteration_bounds = array<i64: 2>, scalar_prefetch = 0 : i64, scratch_operands = 0 : i64, tpu.core_type = #tpu.core_type<tc>, window_params = [{pipeline_mode = #tpu.pipeline_mode<synchronous>, transform_indices = @transform_0, window_bounds = array<i64: 8, 2048>}, {transform_indices = @transform_1, window_bounds = array<i64: 2048, 1024>}, {transform_indices = @transform_2, window_bounds = array<i64: 1, 1024>}, {transform_indices = @transform_3, window_bounds = array<i64: 8, 1024>}]} {
    %c0 = arith.constant 0 : index
    %c0_0 = arith.constant 0 : index
    %0 = vector.load %arg1[%c0, %c0_0] : memref<8x2048xbf16, #tpu.memory_space<vmem>>, vector<8x2048xbf16>
    %c0_1 = arith.constant 0 : index
    %c0_2 = arith.constant 0 : index
    %1 = vector.load %arg2[%c0_1, %c0_2] : memref<2048x1024xbf16, #tpu.memory_space<vmem>>, vector<2048x1024xbf16>
    %cst = arith.constant dense<0.000000e+00> : vector<8x1024xf32>
    %2 = tpu.matmul %0, %1, %cst {dimension_numbers = #tpu.dot_dimension_numbers<[1], [0], [0], [1], [0, 0, 1, 1], [], []>} : vector<8x2048xbf16>, vector<2048x1024xbf16>, vector<8x1024xf32> -> vector<8x1024xf32>
    %c0_3 = arith.constant 0 : index
    %c0_4 = arith.constant 0 : index
    %3 = vector.load %arg3[%c0_3, %c0_4] : memref<1x1024xf32, #tpu.memory_space<vmem>>, vector<1x1024xf32>
    %4 = vector.broadcast %3 : vector<1x1024xf32> to vector<8x1024xf32>
    %5 = arith.addf %2, %4 : vector<8x1024xf32>
    %c0_5 = arith.constant 0 : index
    %c0_6 = arith.constant 0 : index
    %6 = vector.load %arg4[%c0_5, %c0_6] : memref<8x1024xf32, #tpu.memory_space<vmem>>, vector<8x1024xf32>
    tpu.vector_store %arg4[%c0_5, %c0_6], %5 {strides = array<i32>} : memref<8x1024xf32, #tpu.memory_space<vmem>>, vector<8x1024xf32>,
    return
  }
  func.func @transform_0(%arg0: i32) -> (i32, i32) {
    %c0_i32 = arith.constant 0 : i32
    %c0_i32_0 = arith.constant 0 : i32
    %c0_i32_1 = arith.constant 0 : i32
    return %c0_i32, %c0_i32_0 : i32, i32
  }
  func.func @transform_1(%arg0: i32) -> (i32, i32) {
    %c0_i32 = arith.constant 0 : i32
    %c0_i32_0 = arith.constant 0 : i32
    return %c0_i32, %arg0 : i32, i32
  }
  func.func @transform_2(%arg0: i32) -> (i32, i32) {
    %c0_i32 = arith.constant 0 : i32
    %c0_i32_0 = arith.constant 0 : i32
    return %c0_i32, %arg0 : i32, i32
  }
  func.func @transform_3(%arg0: i32) -> (i32, i32) {
    %c0_i32 = arith.constant 0 : i32
    %c0_i32_0 = arith.constant 0 : i32
    return %c0_i32, %arg0 : i32, i32
  }
}

</mosaic_0001>

<bundles_post_ra>
// kernel: tpu_custom_call.1
= control target key start
LH: loop header
LB: loop body
LE: loop exit
PB: predicated region body
PF: predicated region fallthrough
CT: control target
= control target key end

     0   :  { %8 = vsyncpa [#allocation3], 0  ;;  %s10739_s0 = inlined_call_operand.hbm [shape: bf16[8,2048], index: 0, kind: input, shape index: {}]   ;;  %s10740_s1 = inlined_call_operand.hbm [shape: bf16[2048,2048], index: 1, kind: input, shape index: {}]   ;;  %s10741_s2 = inlined_call_operand.hbm [shape: f32[1,2048], index: 2, kind: input, shape index: {}]   ;;  %s10742_s3 = inlined_call_operand.hbm [shape: f32[8,2048], index: 3, kind: output, shape index: {}]  }
   0x1   :  { %9 = vsyncpa [#allocation6], 0 }
   0x2   :  { %11 = vsyncpa [#allocation6 + $0x1], 0 }
   0x3   :  { %12 = vsyncpa [#allocation4], 0 }
   0x4   :  { %14 = vsyncpa [#allocation4 + $0x1], 0  ;;  %s9253_s12 = smov 0   ;;  %s9255_s13 = smov 0  }
   0x5   :  { %s9257_s14 = smov 0   ;;  %s9259_s15 = smov 0  }
   0x6 LB: > { %s9274_s16 = sadd.s32 1, %s9224_s15   ;;  %s48_s17 = sadd.s32 1, %s9220_s14  ;;  %s9224_s15 = sphi %s9259_s15, %s10762_s15   ;;  %s9220_s14 = sphi %s9257_s14, %s10761_s14   ;;  %s9216_s13 = sphi %s9255_s13, %s10760_s13   ;;  %s9212_s12 = sphi %s9253_s12, %s10759_s12  }
   0x7   : > { %s45_s18 = ssub.s32 %s9224_s15, %s9274_s16  ;;  %p55_p0 = scmp.ne.s32.totalorder %s9220_s14, %s9216_s13 }
   0x8   : > { %p46_p1 = scmp.eq.s32.totalorder %s45_s18, 0  ;;  %p56_p2 = scmp.eq.s32.totalorder %s9224_s15, 0 }
   0x9   : > { %p9016_p4 = scmp.lt.s32.totalorder %s9224_s15, 2  ;;  %s148_s20 = sand.u32 1, %s9224_s15  }
   0xa   : > { %s9285_s19 = scalar_select %p46_p1, %s9220_s14, %s48_s17  }
   0xb   : > { %p57_p5 = por %p56_p2, %p55_p0  ;;  %s150_s21 = sand.u32 1, %s9220_s14  }
   0xc   : > { %s7931_s22 = sshll.u32 %s150_s21, 13  ;;  %s8987_s23 = sshll.u32 %s9224_s15, 9 }
   0xd   : > { %s9298_s26 = scalar_lea.hbm %s10740_s1, %s8987_s23  ;;  %s152_s27 = scalar_lea.vmem [#allocation5], %s7931_s22 }
   0xe   : > { %s159_s28 = sshll.u32 %s152_s27, 4  ;;  %p9300_p6 = pnand %p9016_p4, %p57_p5  ;;  %s9304_s28 = int_to_ptr.vmem [resolvable:$true] %s159_s28 }
   0xf   : > { %s9306_s30 = scalar_lea.sflag [#allocation6], %s148_s20  ;;  %s9074_s4 = scalar_lea.hbm %s9298_s26, 131072 }
  0x10   : > { %p9075_p7 = scmp.ne.s32.totalorder %s9298_s26, %s9074_s4  ;;  %p10743_p8 = pneg %p9300_p6 }
  0x11   : > { %s9079_s7 = scalar_lea.hbm %s10740_s1, 262144  ;;  %p9080_p11 = scmp.lt.s32.totalorder %s9298_s26, %s10740_s1 }
  0x12   : > { %p9077_p9 = pnand %p10743_p8, %p9075_p7  ;;  %p9081_p12 = scmp.lt.s32.totalorder %s9079_s7, %s9074_s4 }
  0x14   : > { %p9078_p10 = pneg %p9077_p9  ;;  %p9082_p13 = por %p9081_p12, %p9080_p11 }
  0x16   : > { %p9083_p1 = pnand %p9082_p13, %p9078_p10 }
  0x18   : > { %9086 = shalt.err (!%p9083_p1)
}
  0x19   : > { %s9087_s10 = scalar_lea.vmem %s9304_s28, 131072  ;;  %s9226_s11 = smov [#allocation5]  }
  0x1a   : > { %p9088_p2 = scmp.ne.s32.totalorder %s9304_s28, %s9087_s10  ;;  %s9092_s17 = sshll.u32 %s9226_s11, 4  ;;  %s9093_s17 = int_to_ptr.vmem [resolvable:$false] %s9092_s17 }
  0x1b   : > { %s9094_s18 = scalar_lea.vmem %s9093_s17, 262144  ;;  %p9095_p7 = scmp.lt.s32.totalorder %s9304_s28, %s9093_s17 }
  0x1c   : > { %p9090_p4 = pnand %p9088_p2, %p10743_p8  ;;  %p9096_p9 = scmp.lt.s32.totalorder %s9094_s18, %s9087_s10 }
  0x1e   : > { %p9091_p5 = pneg %p9090_p4  ;;  %p9097_p3 = por %p9096_p9, %p9095_p7 }
  0x20   : > { %p9098_p11 = pnand %p9097_p3, %p9091_p5 }
  0x22   : > { %9101 = shalt.err (!%p9098_p11)
}
  0x23   : > { %s9227_s20 = smov 1024   ;;  %s9228_s22 = smov 512  }
  0x24   : > { %s9229_s23 = smov 32   ;;  %s9334_s24 = sadd.s32 4294967295, %s9224_s15  }
  0x25   : > { %9007 = dma.hbm_to_vmem [thread:$0]  (!%p9300_p6), %s9298_s26, 131072, %s9304_s28, %s9306_s30, %s9227_s20, %s9228_s22, %s9229_s23  }
  0x26   : > { %s7927_s25 = sadd.s32 4294967294, %s9224_s15   ;;  %p61_p3 = scmp.ne.s32.totalorder %s9216_s13, %s9212_s12 }
  0x27   : > { %p10745_p10 = scmp.eq.s32.totalorder %s9334_s24, 0  ;;  %p111_p12 = scmp.eq.s32.totalorder %s9334_s24, 1 }
  0x28   : > { %p117_p13 = scmp.eq.s32.totalorder %s7927_s25, 1  ;;  %p7928_p1 = scmp.ge.s32.totalorder %s9224_s15, 1 }
  0x29   : > { %p9344_p2 = por %p10745_p10, %p61_p3  ;;  %p9351_p4 = por %p111_p12, %p55_p0 }
  0x2a   : > { %p9355_p5 = por %p117_p13, %p61_p3  ;;  %p124_p7 = scmp.lt.s32.totalorder %s9224_s15, 3 }
  0x2b   : > { %s10748_s27 = scalar_select %p9344_p2, 1, 0 }
  0x2c   : > { %s10749_s26 = scalar_select %p9351_p4, 1, 0 }
  0x2d   : > { %s10750_s28 = scalar_select %p9355_p5, 1, 0 }
  0x2e   : > { %p9360_p9 = pnand %p7928_p1, %p124_p7  ;;  %s9230_s5 = smov [#allocation2]  }
  0x2f   : > { %s137_s6 = sshll.u32 %s9230_s5, 4  ;;  %s7934_s7 = sshll.u32 %s150_s21, 3  ;;  %s138_s6 = int_to_ptr.vmem [resolvable:$true] %s137_s6 }
  0x30   : > { %p9000_p11 = pneg %p9360_p9  ;;  %s8988_s8 = sshll.u32 %s9224_s15, 7 }
  0x31   : > { %s173_s9 = scalar_lea.vmem [#allocation7], %s7934_s7  ;;  %s9374_s18 = scalar_lea.hbm %s10741_s2, %s8988_s8 }
  0x32   : > { %s181_s10 = sshll.u32 %s173_s9, 4  ;;  %p9001_p0 = pnand %p9000_p11, %p10745_p10  ;;  %s9376_s10 = int_to_ptr.vmem [resolvable:$true] %s181_s10 }
  0x33   : > { %s9113_s20 = scalar_lea.vmem %s138_s6, 1024  ;;  %p9121_p7 = scmp.lt.s32.totalorder %s138_s6, %s138_s6 }
  0x34   : > { %p9104_p3 = pneg %p9001_p0  ;;  %p9114_p12 = scmp.ne.s32.totalorder %s138_s6, %s9113_s20 }
  0x35   : > { %p9122_p8 = scmp.lt.s32.totalorder %s9113_s20, %s9113_s20 }
  0x36   : > { %p9116_p13 = pnand %p9114_p12, %p9104_p3 }
  0x37   : > { %p9123_p5 = por %p9122_p8, %p9121_p7 }
  0x38   : > { %p9117_p1 = pneg %p9116_p13 }
  0x3a   : > { %p9124_p4 = pnand %p9123_p5, %p9117_p1 }
  0x3c   : > { %9127 = shalt.err (!%p9124_p4)
}
  0x3d   : > { %9003 = dma.hbm_to_vmem [thread:$0]  (!%p9001_p0), %s10739_s0, 1024, %s138_s6, [#allocation3]  }
  0x3e   : > { %s9128_s23 = scalar_lea.hbm %s9374_s18, 128  ;;  %p10752_p10 = pneg %p9300_p6 }
  0x3f   : > { %p9129_p11 = scmp.ne.s32.totalorder %s9374_s18, %s9128_s23  ;;  %s9133_s7 = scalar_lea.hbm %s10741_s2, 256 }
  0x40   : > { %p9134_p8 = scmp.lt.s32.totalorder %s9374_s18, %s10741_s2  ;;  %p9135_p4 = scmp.lt.s32.totalorder %s9133_s7, %s9128_s23 }
  0x41   : > { %p9131_p2 = pnand %p9129_p11, %p10752_p10 }
  0x42   : > { %p9136_p5 = por %p9135_p4, %p9134_p8 }
  0x43   : > { %p9132_p3 = pneg %p9131_p2 }
  0x45   : > { %p9137_p12 = pnand %p9136_p5, %p9132_p3 }
  0x47   : > { %9140 = shalt.err (!%p9137_p12)
}
  0x48   : > { %s9141_s6 = scalar_lea.vmem %s9376_s10, 128  ;;  %s9231_s11 = smov [#allocation7]  }
  0x49   : > { %p9142_p0 = scmp.ne.s32.totalorder %s9376_s10, %s9141_s6  ;;  %s9146_s17 = sshll.u32 %s9231_s11, 4  ;;  %s9147_s17 = int_to_ptr.vmem [resolvable:$false] %s9146_s17 }
  0x4a   : > { %s9148_s20 = scalar_lea.vmem %s9147_s17, 256  ;;  %p9149_p1 = scmp.lt.s32.totalorder %s9376_s10, %s9147_s17 }
  0x4b   : > { %p9144_p2 = pnand %p9142_p0, %p10752_p10  ;;  %p9150_p7 = scmp.lt.s32.totalorder %s9148_s20, %s9141_s6 }
  0x4d   : > { %p9145_p13 = pneg %p9144_p2  ;;  %p9151_p11 = por %p9150_p7, %p9149_p1 }
  0x4f   : > { %p9152_p8 = pnand %p9151_p11, %p9145_p13 }
  0x51   : > { %9155 = shalt.err (!%p9152_p8)
}
  0x52   : > { %9010 = dma.hbm_to_vmem [thread:$0]  (!%p9300_p6), %s9374_s18, 128, %s9376_s10, %s9306_s30  }
  0x53   : > { %190 = sbr.rel (%p9360_p9) target bundleno = 1337 (0x539), region = 32  ;;  %p10753_p3 = scmp.eq.s32.totalorder (!%p9360_p9), %s9334_s24, 0 }
  0x58   : > { %9199 = dma.done.wait (%p10753_p3), [#allocation3], 1024   ;;  %p10754_p4 = pmov %p10753_p3 }
  0x59   : > { %s196_s21 = sand.u32 1, %s9334_s24   ;;  %s9412_s22 = sand.u32 1, %s9216_s13  }
  0x5a   : > { %9201 = vsyncadd (%p10754_p4), [#allocation3], 4294966272  ;;  %s7939_s29 = sshll.u32 %s9412_s22, 13  ;;  %s197_s23 = scalar_lea.sflag [#allocation6], %s196_s21 }
  0x5b   : > { %s9415_s25 = scalar_lea.vmem [#allocation5], %s7939_s29  ;;  %p10755_p6 = scmp.ne.s32.totalorder %s10748_s27, 0 }
  0x5d   : > { %9203 = dma.done.wait (%p10755_p6), %s197_s23, 131200  }
  0x5e   : > { %9205 = vsyncadd (%p10755_p6), %s197_s23, 4294836096  ;;  %v304_v0 = vld [vmem:[%s9415_s25 + $0x1c0] sm:$0xff]  ;;  %v9451_v54 = vld [vmem:[#allocation2 + $0x8] sm:$0xff]  ;;  %s7940_s30 = sshll.u32 %s9412_s22, 3  ;;  %s7941_s4 = sshll.u32 %s9412_s22, 6 }
  0x5f   : > { %v308_v1 = vld [vmem:[%s9415_s25 + $0x1e0] sm:$0xff]  ;;  %v9461_v59 = vcombine.high %v9451_v54, %v9451_v54  ;;  %s9771_s27 = scalar_lea.vmem [#allocation7], %s7940_s30  ;;  %s10030_s10 = scalar_lea.vmem [#allocation8], %s7941_s4 }
  0x60   : > { %v432_v2 = vld [vmem:[%s9415_s25 + $0x5c0] sm:$0xff]  ;;  %v8015_v3 = vcombine.high %v304_v0, %v308_v1  ;;  %v8014_v5 = vcombine.low %v304_v0, %v308_v1  ;;  %s8989_s18 = sshll.u32 %s9334_s24, 10  ;;  %s7825_s5 = sshll.u32 %s10030_s10, 4  ;;  %s10697_s5 = int_to_ptr.vmem [resolvable:$true] %s7825_s5 }
  0x61   : > { %v436_v4 = vld [vmem:[%s9415_s25 + $0x5e0] sm:$0xff]  ;;  %6563 = vmatprep.mubr.bf16.mxu1 %v9461_v59  ;;  %s10695_s9 = scalar_lea.hbm %s10742_s3, %s8989_s18  ;;  %s7811_s24 = scalar_lea.sflag [#allocation4], %s9412_s22 }
  0x62   : > { %v296_v6 = vld [vmem:[%s9415_s25 + $0x180] sm:$0xff]  ;;  %v8143_v8 = vcombine.high %v432_v2, %v436_v4  ;;  %v8142_v9 = vcombine.low %v432_v2, %v436_v4  ;;  %6490 = vmatprep.subr.bf16.mxu0 %v8015_v3  ;;  %s9156_s6 = scalar_lea.vmem %s10697_s5, 1024  ;;  %p10756_p5 = scmp.ne.s32.totalorder %s10749_s26, 0 }
  0x63   : > { %v300_v7 = vld [vmem:[%s9415_s25 + $0x1a0] sm:$0xff]  ;;  %6491 = vmatpush1.bf16.msra.mxu0 %v8014_v5  ;;  %p9157_p9 = scmp.ne.s32.totalorder %s10697_s5, %s9156_s6  ;;  %s9232_s11 = smov [#allocation8]  }
  0x64   : > { %v8007_v10 = vcombine.high %v296_v6, %v300_v7  ;;  %v424_v11 = vld [vmem:[%s9415_s25 + $0x580] sm:$0xff]  ;;  %6531 = vmatprep.subr.bf16.mxu1 %v8143_v8  ;;  %v8006_v18 = vcombine.low %v296_v6, %v300_v7  ;;  %s9160_s17 = sshll.u32 %s9232_s11, 4  ;;  %s9161_s17 = int_to_ptr.vmem [resolvable:$false] %s9160_s17 }
  0x65   : > { %v428_v12 = vld [vmem:[%s9415_s25 + $0x5a0] sm:$0xff]  ;;  %6532 = vmatpush1.bf16.msra.mxu1 %v8142_v9  ;;  %p9158_p12 = pnand %p9157_p9, %p10756_p5  ;;  %s9162_s20 = scalar_lea.vmem %s9161_s17, 2048 }
  0x66   : > { %v288_v13 = vld [vmem:[%s9415_s25 + $0x140] sm:$0xff]  ;;  %v8135_v14 = vcombine.high %v424_v11, %v428_v12  ;;  %6492 = vmatprep.subr.bf16.mxu0 %v8007_v10  ;;  %v8134_v19 = vcombine.low %v424_v11, %v428_v12  ;;  %p9163_p10 = scmp.lt.s32.totalorder %s10697_s5, %s9161_s17  ;;  %p9164_p2 = scmp.lt.s32.totalorder %s9162_s20, %s9156_s6 }
  0x67   : > { %v292_v15 = vld [vmem:[%s9415_s25 + $0x160] sm:$0xff]  ;;  %6493 = vmatpush1.bf16.msra.mxu0 %v8006_v18  ;;  %p9159_p0 = pneg %p9158_p12 }
  0x68   : > { %v416_v16 = vld [vmem:[%s9415_s25 + $0x540] sm:$0xff]  ;;  %v7999_v20 = vcombine.high %v288_v13, %v292_v15  ;;  %6533 = vmatprep.subr.bf16.mxu1 %v8135_v14  ;;  %v7998_v26 = vcombine.low %v288_v13, %v292_v15  ;;  %p9165_p13 = por %p9164_p2, %p9163_p10 }
  0x69   : > { %v420_v17 = vld [vmem:[%s9415_s25 + $0x560] sm:$0xff]  ;;  %6534 = vmatpush1.bf16.msra.mxu1 %v8134_v19 }
  0x6a   : > { %v8127_v21 = vcombine.high %v416_v16, %v420_v17  ;;  %v280_v22 = vld [vmem:[%s9415_s25 + $0x100] sm:$0xff]  ;;  %6494 = vmatprep.subr.bf16.mxu0 %v7999_v20  ;;  %v8126_v27 = vcombine.low %v416_v16, %v420_v17  ;;  %p9166_p1 = pnand %p9165_p13, %p9159_p0 }
  0x6b   : > { %v284_v23 = vld [vmem:[%s9415_s25 + $0x120] sm:$0xff]  ;;  %6495 = vmatpush1.bf16.msra.mxu0 %v7998_v26 }
  0x6c   : > { %v408_v24 = vld [vmem:[%s9415_s25 + $0x500] sm:$0xff]  ;;  %v7991_v28 = vcombine.high %v280_v22, %v284_v23  ;;  %6535 = vmatprep.subr.bf16.mxu1 %v8127_v21  ;;  %v7990_v34 = vcombine.low %v280_v22, %v284_v23 }
  0x6d   : > { %v412_v25 = vld [vmem:[%s9415_s25 + $0x520] sm:$0xff]  ;;  %6536 = vmatpush1.bf16.msra.mxu1 %v8126_v27 }
  0x6e   : > { %v8119_v29 = vcombine.high %v408_v24, %v412_v25  ;;  %v272_v30 = vld [vmem:[%s9415_s25 + $0xc0] sm:$0xff]  ;;  %6496 = vmatprep.subr.bf16.mxu0 %v7991_v28  ;;  %v8118_v35 = vcombine.low %v408_v24, %v412_v25 }
  0x6f   : > { %v276_v31 = vld [vmem:[%s9415_s25 + $0xe0] sm:$0xff]  ;;  %6497 = vmatpush1.bf16.msra.mxu0 %v7990_v34 }
  0x70   : > { %v400_v32 = vld [vmem:[%s9415_s25 + $0x4c0] sm:$0xff]  ;;  %v7983_v36 = vcombine.high %v272_v30, %v276_v31  ;;  %6537 = vmatprep.subr.bf16.mxu1 %v8119_v29  ;;  %v7982_v42 = vcombine.low %v272_v30, %v276_v31 }
  0x71   : > { %v404_v33 = vld [vmem:[%s9415_s25 + $0x4e0] sm:$0xff]  ;;  %6538 = vmatpush1.bf16.msra.mxu1 %v8118_v35 }
  0x72   : > { %v8111_v37 = vcombine.high %v400_v32, %v404_v33  ;;  %v264_v38 = vld [vmem:[%s9415_s25 + $0x80] sm:$0xff]  ;;  %6498 = vmatprep.subr.bf16.mxu0 %v7983_v36  ;;  %v8110_v43 = vcombine.low %v400_v32, %v404_v33 }
  0x73   : > { %v268_v39 = vld [vmem:[%s9415_s25 + $0xa0] sm:$0xff]  ;;  %6499 = vmatpush1.bf16.msra.mxu0 %v7982_v42 }
  0x74   : > { %v392_v40 = vld [vmem:[%s9415_s25 + $0x480] sm:$0xff]  ;;  %v7975_v44 = vcombine.high %v264_v38, %v268_v39  ;;  %6539 = vmatprep.subr.bf16.mxu1 %v8111_v37  ;;  %v7974_v50 = vcombine.low %v264_v38, %v268_v39 }
  0x75   : > { %v396_v41 = vld [vmem:[%s9415_s25 + $0x4a0] sm:$0xff]  ;;  %6540 = vmatpush1.bf16.msra.mxu1 %v8110_v43 }
  0x76   : > { %v8103_v45 = vcombine.high %v392_v40, %v396_v41  ;;  %v256_v46 = vld [vmem:[%s9415_s25 + $0x40] sm:$0xff]  ;;  %6500 = vmatprep.subr.bf16.mxu0 %v7975_v44  ;;  %v8102_v51 = vcombine.low %v392_v40, %v396_v41 }
  0x77   : > { %v260_v47 = vld [vmem:[%s9415_s25 + $0x60] sm:$0xff]  ;;  %6501 = vmatpush1.bf16.msra.mxu0 %v7974_v50 }
  0x78   : > { %v384_v48 = vld [vmem:[%s9415_s25 + $0x440] sm:$0xff]  ;;  %v7967_v52 = vcombine.high %v256_v46, %v260_v47  ;;  %6541 = vmatprep.subr.bf16.mxu1 %v8103_v45  ;;  %v7966_v62 = vcombine.low %v256_v46, %v260_v47 }
  0x79   : > { %v388_v49 = vld [vmem:[%s9415_s25 + $0x460] sm:$0xff]  ;;  %6542 = vmatpush1.bf16.msra.mxu1 %v8102_v51 }
  0x7a   : > { %v9449_v53 = vld [vmem:[#allocation2] sm:$0xff]  ;;  %v8095_v55 = vcombine.high %v384_v48, %v388_v49  ;;  %6502 = vmatprep.subr.bf16.mxu0 %v7967_v52  ;;  %v8094_v63 = vcombine.low %v384_v48, %v388_v49 }
  0x7b   : > { %v248_v56 = vld [vmem:[%s9415_s25] sm:$0xff]  ;;  %v9457_v58 = vcombine.high %v9449_v53, %v9449_v53  ;;  %6503 = vmatpush1.bf16.msra.mxu0 %v7966_v62 }
  0x7c   : > { %v252_v57 = vld [vmem:[%s9415_s25 + $0x20] sm:$0xff]  ;;  %6543 = vmatprep.subr.bf16.mxu1 %v8095_v55 }
  0x7d   : > { %v376_v60 = vld [vmem:[%s9415_s25 + $0x400] sm:$0xff]  ;;  %6522 = vmatprep.mubr.bf16.mxu0 %v9457_v58  ;;  %v7959_v0 = vcombine.high %v248_v56, %v252_v57  ;;  %v7958_v6 = vcombine.low %v248_v56, %v252_v57  ;;  %6544 = vmatpush1.bf16.msra.mxu1 %v8094_v63 }
  0x7e   : > { %v380_v61 = vld [vmem:[%s9415_s25 + $0x420] sm:$0xff] }
  0x7f   : > { %v8087_v1 = vcombine.high %v376_v60, %v380_v61  ;;  %v368_v2 = vld [vmem:[%s9415_s25 + $0x3c0] sm:$0xff]  ;;  %6504 = vmatprep.subr.bf16.mxu0 %v7959_v0  ;;  %v8086_v7 = vcombine.low %v376_v60, %v380_v61 }
  0x80   : > { %v372_v3 = vld [vmem:[%s9415_s25 + $0x3e0] sm:$0xff]  ;;  %6505 = vmatpush1.bf16.msra.mxu0 %v7958_v6 }
  0x81   : > { %v496_v4 = vld [vmem:[%s9415_s25 + $0x7c0] sm:$0xff]  ;;  %v8079_v8 = vcombine.high %v368_v2, %v372_v3  ;;  %6545 = vmatprep.subr.bf16.mxu1 %v8087_v1  ;;  %v8078_v14 = vcombine.low %v368_v2, %v372_v3 }
  0x82   : > { %v500_v5 = vld [vmem:[%s9415_s25 + $0x7e0] sm:$0xff]  ;;  %6546 = vmatpush1.bf16.msra.mxu1 %v8086_v7 }
  0x83   : > { %v8207_v9 = vcombine.high %v496_v4, %v500_v5  ;;  %v360_v10 = vld [vmem:[%s9415_s25 + $0x380] sm:$0xff]  ;;  %6506 = vmatprep.subr.bf16.mxu0 %v8079_v8  ;;  %v8206_v15 = vcombine.low %v496_v4, %v500_v5 }
  0x84   : > { %v364_v11 = vld [vmem:[%s9415_s25 + $0x3a0] sm:$0xff]  ;;  %6507 = vmatpush2.bf16.msra.mxu0 %v8078_v14 }
  0x85   : > { %v488_v12 = vld [vmem:[%s9415_s25 + $0x780] sm:$0xff]  ;;  %v8071_v16 = vcombine.high %v360_v10, %v364_v11  ;;  %6547 = vmatprep.subr.bf16.mxu1 %v8207_v9  ;;  %v8070_v22 = vcombine.low %v360_v10, %v364_v11 }
  0x86   : > { %v492_v13 = vld [vmem:[%s9415_s25 + $0x7a0] sm:$0xff]  ;;  %6548 = vmatpush2.bf16.msra.mxu1 %v8206_v15 }
  0x87   : > { %v8199_v17 = vcombine.high %v488_v12, %v492_v13  ;;  %v352_v18 = vld [vmem:[%s9415_s25 + $0x340] sm:$0xff]  ;;  %6508 = vmatprep.subr.bf16.mxu0 %v8071_v16  ;;  %v8198_v23 = vcombine.low %v488_v12, %v492_v13  ;;  %v9507_v16 = vcombine.low %v9449_v53, %v9449_v53 }
  0x88   : > { %v356_v19 = vld [vmem:[%s9415_s25 + $0x360] sm:$0xff]  ;;  %6509 = vmatpush2.bf16.msra.mxu0 %v8070_v22  ;;  %v9517_v22 = vld [vmem:[#allocation2 + $0x18] sm:$0xff] }
  0x89   : > { %v480_v20 = vld [vmem:[%s9415_s25 + $0x740] sm:$0xff]  ;;  %v8063_v24 = vcombine.high %v352_v18, %v356_v19  ;;  %6549 = vmatprep.subr.bf16.mxu1 %v8199_v17  ;;  %v8062_v30 = vcombine.low %v352_v18, %v356_v19  ;;  %v9511_v19 = vld [vmem:[#allocation2 + $0x10] sm:$0xff] }
  0x8a   : > { %v484_v21 = vld [vmem:[%s9415_s25 + $0x760] sm:$0xff]  ;;  %6550 = vmatpush2.bf16.msra.mxu1 %v8198_v23 }
  0x8b   : > { %v8191_v25 = vcombine.high %v480_v20, %v484_v21  ;;  %v344_v26 = vld [vmem:[%s9415_s25 + $0x300] sm:$0xff]  ;;  %6510 = vmatprep.subr.bf16.mxu0 %v8063_v24  ;;  %v8190_v31 = vcombine.low %v480_v20, %v484_v21  ;;  %v9515_v20 = vcombine.low %v9451_v54, %v9451_v54 }
  0x8c   : > { %v348_v27 = vld [vmem:[%s9415_s25 + $0x320] sm:$0xff]  ;;  %6511 = vmatpush2.bf16.msra.mxu0 %v8062_v30 }
  0x8d   : > { %v472_v28 = vld [vmem:[%s9415_s25 + $0x700] sm:$0xff]  ;;  %v8055_v32 = vcombine.high %v344_v26, %v348_v27  ;;  %6551 = vmatprep.subr.bf16.mxu1 %v8191_v25  ;;  %v8054_v38 = vcombine.low %v344_v26, %v348_v27  ;;  %v9523_v27 = vcombine.high %v9511_v19, %v9511_v19 }
  0x8e   : > { %v476_v29 = vld [vmem:[%s9415_s25 + $0x720] sm:$0xff]  ;;  %6552 = vmatpush2.bf16.msra.mxu1 %v8190_v31 }
  0x8f   : > { %v8183_v33 = vcombine.high %v472_v28, %v476_v29  ;;  %v336_v34 = vld [vmem:[%s9415_s25 + $0x2c0] sm:$0xff]  ;;  %6512 = vmatprep.subr.bf16.mxu0 %v8055_v32  ;;  %v8182_v39 = vcombine.low %v472_v28, %v476_v29  ;;  %v9530_v29 = vcombine.high %v9517_v22, %v9517_v22 }
  0x90   : > { %v340_v35 = vld [vmem:[%s9415_s25 + $0x2e0] sm:$0xff]  ;;  %6513 = vmatpush2.bf16.msra.mxu0 %v8054_v38 }
  0x91   : > { %v464_v36 = vld [vmem:[%s9415_s25 + $0x6c0] sm:$0xff]  ;;  %v8047_v40 = vcombine.high %v336_v34, %v340_v35  ;;  %6553 = vmatprep.subr.bf16.mxu1 %v8183_v33  ;;  %v8046_v46 = vcombine.low %v336_v34, %v340_v35 }
  0x92   : > { %v468_v37 = vld [vmem:[%s9415_s25 + $0x6e0] sm:$0xff]  ;;  %6554 = vmatpush2.bf16.msra.mxu1 %v8182_v39 }
  0x93   : > { %v8175_v41 = vcombine.high %v464_v36, %v468_v37  ;;  %v328_v42 = vld [vmem:[%s9415_s25 + $0x280] sm:$0xff]  ;;  %6514 = vmatprep.subr.bf16.mxu0 %v8047_v40  ;;  %v8174_v47 = vcombine.low %v464_v36, %v468_v37 }
  0x94   : > { %v332_v43 = vld [vmem:[%s9415_s25 + $0x2a0] sm:$0xff]  ;;  %6515 = vmatpush2.bf16.msra.mxu0 %v8046_v46 }
  0x95   : > { %v456_v44 = vld [vmem:[%s9415_s25 + $0x680] sm:$0xff]  ;;  %v8039_v48 = vcombine.high %v328_v42, %v332_v43  ;;  %6555 = vmatprep.subr.bf16.mxu1 %v8175_v41  ;;  %v8038_v56 = vcombine.low %v328_v42, %v332_v43 }
  0x96   : > { %v460_v45 = vld [vmem:[%s9415_s25 + $0x6a0] sm:$0xff]  ;;  %6556 = vmatpush2.bf16.msra.mxu1 %v8174_v47 }
  0x97   : > { %v8167_v49 = vcombine.high %v456_v44, %v460_v45  ;;  %v320_v50 = vld [vmem:[%s9415_s25 + $0x240] sm:$0xff]  ;;  %6516 = vmatprep.subr.bf16.mxu0 %v8039_v48  ;;  %v8166_v57 = vcombine.low %v456_v44, %v460_v45 }
  0x98   : > { %v324_v51 = vld [vmem:[%s9415_s25 + $0x260] sm:$0xff]  ;;  %6517 = vmatpush2.bf16.msra.mxu0 %v8038_v56 }
  0x99   : > { %v448_v52 = vld [vmem:[%s9415_s25 + $0x640] sm:$0xff]  ;;  %v8031_v60 = vcombine.high %v320_v50, %v324_v51  ;;  %6557 = vmatprep.subr.bf16.mxu1 %v8167_v49  ;;  %v8030_v2 = vcombine.low %v320_v50, %v324_v51 }
  0x9a   : > { %v452_v55 = vld [vmem:[%s9415_s25 + $0x660] sm:$0xff]  ;;  %6558 = vmatpush2.bf16.msra.mxu1 %v8166_v57 }
  0x9b   : > { %v8159_v61 = vcombine.high %v448_v52, %v452_v55  ;;  %v312_v62 = vld [vmem:[%s9415_s25 + $0x200] sm:$0xff]  ;;  %6518 = vmatprep.subr.bf16.mxu0 %v8031_v60  ;;  %v8158_v3 = vcombine.low %v448_v52, %v452_v55 }
  0x9c   : > { %v316_v63 = vld [vmem:[%s9415_s25 + $0x220] sm:$0xff]  ;;  %6519 = vmatpush2.bf16.msra.mxu0 %v8030_v2 }
  0x9d   : > { %v440_v0 = vld [vmem:[%s9415_s25 + $0x600] sm:$0xff]  ;;  %v8023_v4 = vcombine.high %v312_v62, %v316_v63  ;;  %6559 = vmatprep.subr.bf16.mxu1 %v8159_v61  ;;  %v8022_v10 = vcombine.low %v312_v62, %v316_v63 }
  0x9e   : > { %v444_v1 = vld [vmem:[%s9415_s25 + $0x620] sm:$0xff]  ;;  %6560 = vmatpush2.bf16.msra.mxu1 %v8158_v3 }
  0x9f   : > { %v8151_v5 = vcombine.high %v440_v0, %v444_v1  ;;  %v560_v6 = vld [vmem:[%s9415_s25 + $0x9c0] sm:$0xff]  ;;  %6520 = vmatprep.subr.bf16.mxu0 %v8023_v4  ;;  %v8150_v11 = vcombine.low %v440_v0, %v444_v1 }
  0xa0   : > { %v564_v7 = vld [vmem:[%s9415_s25 + $0x9e0] sm:$0xff]  ;;  %6521 = vmatpush2.bf16.msra.mxu0 %v8022_v10 }
  0xa1   : > { %v688_v8 = vld [vmem:[%s9415_s25 + $0xdc0] sm:$0xff]  ;;  %v8271_v12 = vcombine.high %v560_v6, %v564_v7  ;;  %6561 = vmatprep.subr.bf16.mxu1 %v8151_v5  ;;  %v8270_v21 = vcombine.low %v560_v6, %v564_v7 }
  0xa2   : > { %v692_v9 = vld [vmem:[%s9415_s25 + $0xde0] sm:$0xff]  ;;  %6562 = vmatpush2.bf16.msra.mxu1 %v8150_v11 }
  0xa3   : > { %v8399_v13 = vcombine.high %v688_v8, %v692_v9  ;;  %v552_v14 = vld [vmem:[%s9415_s25 + $0x980] sm:$0xff]  ;;  %6572 = vmatprep.subr.bf16.mxu0 %v8271_v12  ;;  %v8398_v23 = vcombine.low %v688_v8, %v692_v9  ;;  %6523 = vmatmul.mubr.bf16.vlgmr.msra.gmra.mxu0 %v9507_v16 }
  0xa4   : > { %v556_v15 = vld [vmem:[%s9415_s25 + $0x9a0] sm:$0xff]  ;;  %6573 = vmatpush1.bf16.msra.mxu0 %v8270_v21  ;;  %6604 = vmatprep.mubr.bf16.mxu0 %v9523_v27 }
  0xa5   : > { %v680_v17 = vld [vmem:[%s9415_s25 + $0xd80] sm:$0xff]  ;;  %v8263_v24 = vcombine.high %v552_v14, %v556_v15  ;;  %6613 = vmatprep.subr.bf16.mxu1 %v8399_v13  ;;  %6564 = vmatmul.mubr.bf16.vlgmr.msra.gmra.mxu1 %v9515_v20  ;;  %v8262_v30 = vcombine.low %v552_v14, %v556_v15 }
  0xa6   : > { %v684_v18 = vld [vmem:[%s9415_s25 + $0xda0] sm:$0xff]  ;;  %6614 = vmatpush1.bf16.msra.mxu1 %v8398_v23  ;;  %6645 = vmatprep.mubr.bf16.mxu1 %v9530_v29 }
  0xa7   : > { %v8391_v53 = vcombine.high %v680_v17, %v684_v18  ;;  %v544_v25 = vld [vmem:[%s9415_s25 + $0x940] sm:$0xff]  ;;  %6574 = vmatprep.subr.bf16.mxu0 %v8263_v24  ;;  %v8390_v31 = vcombine.low %v680_v17, %v684_v18 }
  0xa8   : > { %v548_v26 = vld [vmem:[%s9415_s25 + $0x960] sm:$0xff]  ;;  %6575 = vmatpush1.bf16.msra.mxu0 %v8262_v30 }
  0xa9   : > { %v672_v54 = vld [vmem:[%s9415_s25 + $0xd40] sm:$0xff]  ;;  %v8255_v32 = vcombine.high %v544_v25, %v548_v26  ;;  %6615 = vmatprep.subr.bf16.mxu1 %v8391_v53  ;;  %v8254_v38 = vcombine.low %v544_v25, %v548_v26 }
  0xaa   : > { %v676_v28 = vld [vmem:[%s9415_s25 + $0xd60] sm:$0xff]  ;;  %6616 = vmatpush1.bf16.msra.mxu1 %v8390_v31 }
  0xab   : > { %v8383_v33 = vcombine.high %v672_v54, %v676_v28  ;;  %v536_v34 = vld [vmem:[%s9415_s25 + $0x900] sm:$0xff]  ;;  %6576 = vmatprep.subr.bf16.mxu0 %v8255_v32  ;;  %v8382_v39 = vcombine.low %v672_v54, %v676_v28 }
  0xac   : > { %v540_v35 = vld [vmem:[%s9415_s25 + $0x920] sm:$0xff]  ;;  %6577 = vmatpush1.bf16.msra.mxu0 %v8254_v38 }
  0xad   : > { %v664_v36 = vld [vmem:[%s9415_s25 + $0xd00] sm:$0xff]  ;;  %v8247_v40 = vcombine.high %v536_v34, %v540_v35  ;;  %6617 = vmatprep.subr.bf16.mxu1 %v8383_v33  ;;  %v8246_v46 = vcombine.low %v536_v34, %v540_v35 }
  0xae   : > { %v668_v37 = vld [vmem:[%s9415_s25 + $0xd20] sm:$0xff]  ;;  %6618 = vmatpush1.bf16.msra.mxu1 %v8382_v39 }
  0xaf   : > { %v8375_v41 = vcombine.high %v664_v36, %v668_v37  ;;  %v528_v42 = vld [vmem:[%s9415_s25 + $0x8c0] sm:$0xff]  ;;  %6578 = vmatprep.subr.bf16.mxu0 %v8247_v40  ;;  %v8374_v47 = vcombine.low %v664_v36, %v668_v37 }
  0xb0   : > { %v532_v43 = vld [vmem:[%s9415_s25 + $0x8e0] sm:$0xff]  ;;  %6579 = vmatpush1.bf16.msra.mxu0 %v8246_v46 }
  0xb1   : > { %v656_v44 = vld [vmem:[%s9415_s25 + $0xcc0] sm:$0xff]  ;;  %v8239_v48 = vcombine.high %v528_v42, %v532_v43  ;;  %6619 = vmatprep.subr.bf16.mxu1 %v8375_v41  ;;  %v8238_v56 = vcombine.low %v528_v42, %v532_v43 }
  0xb2   : > { %v660_v45 = vld [vmem:[%s9415_s25 + $0xce0] sm:$0xff]  ;;  %6620 = vmatpush1.bf16.msra.mxu1 %v8374_v47 }
  0xb3   : > { %v8367_v49 = vcombine.high %v656_v44, %v660_v45  ;;  %v520_v50 = vld [vmem:[%s9415_s25 + $0x880] sm:$0xff]  ;;  %6580 = vmatprep.subr.bf16.mxu0 %v8239_v48  ;;  %v8366_v57 = vcombine.low %v656_v44, %v660_v45 }
  0xb4   : > { %v524_v51 = vld [vmem:[%s9415_s25 + $0x8a0] sm:$0xff]  ;;  %6581 = vmatpush1.bf16.msra.mxu0 %v8238_v56 }
  0xb5   : > { %v648_v52 = vld [vmem:[%s9415_s25 + $0xc80] sm:$0xff]  ;;  %v8231_v60 = vcombine.high %v520_v50, %v524_v51  ;;  %6621 = vmatprep.subr.bf16.mxu1 %v8367_v49  ;;  %v8230_v2 = vcombine.low %v520_v50, %v524_v51 }
  0xb6   : > { %v652_v55 = vld [vmem:[%s9415_s25 + $0xca0] sm:$0xff]  ;;  %6622 = vmatpush1.bf16.msra.mxu1 %v8366_v57 }
  0xb7   : > { %v8359_v61 = vcombine.high %v648_v52, %v652_v55  ;;  %v512_v62 = vld [vmem:[%s9415_s25 + $0x840] sm:$0xff]  ;;  %6582 = vmatprep.subr.bf16.mxu0 %v8231_v60  ;;  %v8358_v3 = vcombine.low %v648_v52, %v652_v55 }
  0xb8   : > { %v516_v63 = vld [vmem:[%s9415_s25 + $0x860] sm:$0xff]  ;;  %6583 = vmatpush1.bf16.msra.mxu0 %v8230_v2 }
  0xb9   : > { %v640_v0 = vld [vmem:[%s9415_s25 + $0xc40] sm:$0xff]  ;;  %v8223_v4 = vcombine.high %v512_v62, %v516_v63  ;;  %6623 = vmatprep.subr.bf16.mxu1 %v8359_v61  ;;  %v8222_v10 = vcombine.low %v512_v62, %v516_v63 }
  0xba   : > { %v644_v1 = vld [vmem:[%s9415_s25 + $0xc60] sm:$0xff]  ;;  %6624 = vmatpush1.bf16.msra.mxu1 %v8358_v3 }
  0xbb   : > { %v8351_v5 = vcombine.high %v640_v0, %v644_v1  ;;  %v504_v6 = vld [vmem:[%s9415_s25 + $0x800] sm:$0xff]  ;;  %6584 = vmatprep.subr.bf16.mxu0 %v8223_v4  ;;  %v8350_v11 = vcombine.low %v640_v0, %v644_v1 }
  0xbc   : > { %v508_v7 = vld [vmem:[%s9415_s25 + $0x820] sm:$0xff]  ;;  %6585 = vmatpush1.bf16.msra.mxu0 %v8222_v10 }
  0xbd   : > { %v632_v8 = vld [vmem:[%s9415_s25 + $0xc00] sm:$0xff]  ;;  %v8215_v12 = vcombine.high %v504_v6, %v508_v7  ;;  %6625 = vmatprep.subr.bf16.mxu1 %v8351_v5  ;;  %v8214_v21 = vcombine.low %v504_v6, %v508_v7 }
  0xbe   : > { %v636_v9 = vld [vmem:[%s9415_s25 + $0xc20] sm:$0xff]  ;;  %6626 = vmatpush1.bf16.msra.mxu1 %v8350_v11 }
  0xbf   : > { %v8343_v13 = vcombine.high %v632_v8, %v636_v9  ;;  %v624_v14 = vld [vmem:[%s9415_s25 + $0xbc0] sm:$0xff]  ;;  %6586 = vmatprep.subr.bf16.mxu0 %v8215_v12  ;;  %v8342_v23 = vcombine.low %v632_v8, %v636_v9 }
  0xc0   : > { %v628_v15 = vld [vmem:[%s9415_s25 + $0xbe0] sm:$0xff]  ;;  %6587 = vmatpush1.bf16.msra.mxu0 %v8214_v21 }
  0xc1   : > { %v752_v17 = vld [vmem:[%s9415_s25 + $0xfc0] sm:$0xff]  ;;  %v8335_v24 = vcombine.high %v624_v14, %v628_v15  ;;  %6627 = vmatprep.subr.bf16.mxu1 %v8343_v13  ;;  %v8334_v30 = vcombine.low %v624_v14, %v628_v15 }
  0xc2   : > { %v756_v18 = vld [vmem:[%s9415_s25 + $0xfe0] sm:$0xff]  ;;  %6628 = vmatpush1.bf16.msra.mxu1 %v8342_v23 }
  0xc3   : > { %v8463_v53 = vcombine.high %v752_v17, %v756_v18  ;;  %v616_v25 = vld [vmem:[%s9415_s25 + $0xb80] sm:$0xff]  ;;  %6588 = vmatprep.subr.bf16.mxu0 %v8335_v24  ;;  %v8462_v31 = vcombine.low %v752_v17, %v756_v18 }
  0xc4   : > { %v620_v26 = vld [vmem:[%s9415_s25 + $0xba0] sm:$0xff]  ;;  %6589 = vmatpush2.bf16.msra.mxu0 %v8334_v30 }
  0xc5   : > { %v744_v54 = vld [vmem:[%s9415_s25 + $0xf80] sm:$0xff]  ;;  %v8327_v32 = vcombine.high %v616_v25, %v620_v26  ;;  %6629 = vmatprep.subr.bf16.mxu1 %v8463_v53  ;;  %v8326_v38 = vcombine.low %v616_v25, %v620_v26 }
  0xc6   : > { %v748_v28 = vld [vmem:[%s9415_s25 + $0xfa0] sm:$0xff]  ;;  %6630 = vmatpush2.bf16.msra.mxu1 %v8462_v31 }
  0xc7   : > { %v8455_v33 = vcombine.high %v744_v54, %v748_v28  ;;  %v608_v34 = vld [vmem:[%s9415_s25 + $0xb40] sm:$0xff]  ;;  %6590 = vmatprep.subr.bf16.mxu0 %v8327_v32  ;;  %v8454_v39 = vcombine.low %v744_v54, %v748_v28 }
  0xc8   : > { %v612_v35 = vld [vmem:[%s9415_s25 + $0xb60] sm:$0xff]  ;;  %6591 = vmatpush2.bf16.msra.mxu0 %v8326_v38 }
  0xc9   : > { %v736_v36 = vld [vmem:[%s9415_s25 + $0xf40] sm:$0xff]  ;;  %v8319_v40 = vcombine.high %v608_v34, %v612_v35  ;;  %6631 = vmatprep.subr.bf16.mxu1 %v8455_v33  ;;  %v8318_v46 = vcombine.low %v608_v34, %v612_v35 }
  0xca   : > { %v740_v37 = vld [vmem:[%s9415_s25 + $0xf60] sm:$0xff]  ;;  %6632 = vmatpush2.bf16.msra.mxu1 %v8454_v39 }
  0xcb   : > { %v8447_v41 = vcombine.high %v736_v36, %v740_v37  ;;  %v600_v42 = vld [vmem:[%s9415_s25 + $0xb00] sm:$0xff]  ;;  %6592 = vmatprep.subr.bf16.mxu0 %v8319_v40  ;;  %v8446_v47 = vcombine.low %v736_v36, %v740_v37  ;;  %v9595_v36 = vcombine.low %v9511_v19, %v9511_v19  ;;  %v9603_v40 = vcombine.low %v9517_v22, %v9517_v22 }
  0xcc   : > { %v604_v43 = vld [vmem:[%s9415_s25 + $0xb20] sm:$0xff]  ;;  %6593 = vmatpush2.bf16.msra.mxu0 %v8318_v46 }
  0xcd   : > { %v728_v44 = vld [vmem:[%s9415_s25 + $0xf00] sm:$0xff]  ;;  %v8311_v48 = vcombine.high %v600_v42, %v604_v43  ;;  %6633 = vmatprep.subr.bf16.mxu1 %v8447_v41  ;;  %v8310_v56 = vcombine.low %v600_v42, %v604_v43  ;;  %v9605_v42 = vld [vmem:[#allocation2 + $0x28] sm:$0xff] }
  0xce   : > { %v732_v45 = vld [vmem:[%s9415_s25 + $0xf20] sm:$0xff]  ;;  %6634 = vmatpush2.bf16.msra.mxu1 %v8446_v47 }
  0xcf   : > { %v8439_v49 = vcombine.high %v728_v44, %v732_v45  ;;  %v592_v50 = vld [vmem:[%s9415_s25 + $0xac0] sm:$0xff]  ;;  %6594 = vmatprep.subr.bf16.mxu0 %v8311_v48  ;;  %v8438_v57 = vcombine.low %v728_v44, %v732_v45 }
  0xd0   : > { %v596_v51 = vld [vmem:[%s9415_s25 + $0xae0] sm:$0xff]  ;;  %6595 = vmatpush2.bf16.msra.mxu0 %v8310_v56 }
  0xd1   : > { %v720_v52 = vld [vmem:[%s9415_s25 + $0xec0] sm:$0xff]  ;;  %v8303_v60 = vcombine.high %v592_v50, %v596_v51  ;;  %6635 = vmatprep.subr.bf16.mxu1 %v8439_v49  ;;  %v8302_v2 = vcombine.low %v592_v50, %v596_v51  ;;  %v9618_v49 = vcombine.high %v9605_v42, %v9605_v42 }
  0xd2   : > { %v724_v55 = vld [vmem:[%s9415_s25 + $0xee0] sm:$0xff]  ;;  %6636 = vmatpush2.bf16.msra.mxu1 %v8438_v57 }
  0xd3   : > { %v8431_v61 = vcombine.high %v720_v52, %v724_v55  ;;  %v584_v62 = vld [vmem:[%s9415_s25 + $0xa80] sm:$0xff]  ;;  %6596 = vmatprep.subr.bf16.mxu0 %v8303_v60  ;;  %v8430_v3 = vcombine.low %v720_v52, %v724_v55 }
  0xd4   : > { %v588_v63 = vld [vmem:[%s9415_s25 + $0xaa0] sm:$0xff]  ;;  %6597 = vmatpush2.bf16.msra.mxu0 %v8302_v2 }
  0xd5   : > { %v712_v0 = vld [vmem:[%s9415_s25 + $0xe80] sm:$0xff]  ;;  %v8295_v4 = vcombine.high %v584_v62, %v588_v63  ;;  %6637 = vmatprep.subr.bf16.mxu1 %v8431_v61  ;;  %v8294_v10 = vcombine.low %v584_v62, %v588_v63 }
  0xd6   : > { %v716_v1 = vld [vmem:[%s9415_s25 + $0xea0] sm:$0xff]  ;;  %6638 = vmatpush2.bf16.msra.mxu1 %v8430_v3 }
  0xd7   : > { %v8423_v5 = vcombine.high %v712_v0, %v716_v1  ;;  %v576_v6 = vld [vmem:[%s9415_s25 + $0xa40] sm:$0xff]  ;;  %6598 = vmatprep.subr.bf16.mxu0 %v8295_v4  ;;  %v8422_v11 = vcombine.low %v712_v0, %v716_v1 }
  0xd8   : > { %v580_v7 = vld [vmem:[%s9415_s25 + $0xa60] sm:$0xff]  ;;  %6599 = vmatpush2.bf16.msra.mxu0 %v8294_v10 }
  0xd9   : > { %v704_v8 = vld [vmem:[%s9415_s25 + $0xe40] sm:$0xff]  ;;  %v8287_v12 = vcombine.high %v576_v6, %v580_v7  ;;  %6639 = vmatprep.subr.bf16.mxu1 %v8423_v5  ;;  %v8286_v21 = vcombine.low %v576_v6, %v580_v7 }
  0xda   : > { %v708_v9 = vld [vmem:[%s9415_s25 + $0xe60] sm:$0xff]  ;;  %6640 = vmatpush2.bf16.msra.mxu1 %v8422_v11 }
  0xdb   : > { %v8415_v13 = vcombine.high %v704_v8, %v708_v9  ;;  %v568_v14 = vld [vmem:[%s9415_s25 + $0xa00] sm:$0xff]  ;;  %6600 = vmatprep.subr.bf16.mxu0 %v8287_v12  ;;  %v8414_v23 = vcombine.low %v704_v8, %v708_v9 }
  0xdc   : > { %v572_v15 = vld [vmem:[%s9415_s25 + $0xa20] sm:$0xff]  ;;  %6601 = vmatpush2.bf16.msra.mxu0 %v8286_v21 }
  0xdd   : > { %v696_v17 = vld [vmem:[%s9415_s25 + $0xe00] sm:$0xff]  ;;  %v8279_v24 = vcombine.high %v568_v14, %v572_v15  ;;  %6641 = vmatprep.subr.bf16.mxu1 %v8415_v13  ;;  %v8278_v30 = vcombine.low %v568_v14, %v572_v15 }
  0xde   : > { %v700_v18 = vld [vmem:[%s9415_s25 + $0xe20] sm:$0xff]  ;;  %6642 = vmatpush2.bf16.msra.mxu1 %v8414_v23 }
  0xdf   : > { %v8407_v53 = vcombine.high %v696_v17, %v700_v18  ;;  %v816_v25 = vld [vmem:[%s9415_s25 + $0x11c0] sm:$0xff]  ;;  %6602 = vmatprep.subr.bf16.mxu0 %v8279_v24  ;;  %v8406_v31 = vcombine.low %v696_v17, %v700_v18 }
  0xe0   : > { %v820_v26 = vld [vmem:[%s9415_s25 + $0x11e0] sm:$0xff]  ;;  %6603 = vmatpush2.bf16.msra.mxu0 %v8278_v30 }
  0xe1   : > { %v944_v54 = vld [vmem:[%s9415_s25 + $0x15c0] sm:$0xff]  ;;  %v8527_v32 = vcombine.high %v816_v25, %v820_v26  ;;  %6643 = vmatprep.subr.bf16.mxu1 %v8407_v53  ;;  %v8526_v41 = vcombine.low %v816_v25, %v820_v26 }
  0xe2   : > { %v948_v28 = vld [vmem:[%s9415_s25 + $0x15e0] sm:$0xff]  ;;  %6644 = vmatpush2.bf16.msra.mxu1 %v8406_v31 }
  0xe3   : > { %v8655_v33 = vcombine.high %v944_v54, %v948_v28  ;;  %v808_v34 = vld [vmem:[%s9415_s25 + $0x1180] sm:$0xff]  ;;  %6654 = vmatprep.subr.bf16.mxu0 %v8527_v32  ;;  %v8654_v43 = vcombine.low %v944_v54, %v948_v28  ;;  %6605 = vmatmul.mubr.bf16.vlgmr.msra.gmra.mxu0 %v9595_v36 }
  0xe4   : > { %v812_v35 = vld [vmem:[%s9415_s25 + $0x11a0] sm:$0xff]  ;;  %6655 = vmatpush1.bf16.msra.mxu0 %v8526_v41 }
  0xe5   : > { %v936_v37 = vld [vmem:[%s9415_s25 + $0x1580] sm:$0xff]  ;;  %v8519_v44 = vcombine.high %v808_v34, %v812_v35  ;;  %6695 = vmatprep.subr.bf16.mxu1 %v8655_v33  ;;  %6646 = vmatmul.mubr.bf16.vlgmr.msra.gmra.mxu1 %v9603_v40  ;;  %v8518_v50 = vcombine.low %v808_v34, %v812_v35 }
  0xe6   : > { %v940_v38 = vld [vmem:[%s9415_s25 + $0x15a0] sm:$0xff]  ;;  %6696 = vmatpush1.bf16.msra.mxu1 %v8654_v43  ;;  %6727 = vmatprep.mubr.bf16.mxu1 %v9618_v49 }
  0xe7   : > { %v9599_v39 = vld [vmem:[#allocation2 + $0x20] sm:$0xff]  ;;  %v8647_v19 = vcombine.high %v936_v37, %v940_v38  ;;  %6656 = vmatprep.subr.bf16.mxu0 %v8519_v44  ;;  %v8646_v51 = vcombine.low %v936_v37, %v940_v38 }
  0xe8   : > { %v800_v45 = vld [vmem:[%s9415_s25 + $0x1140] sm:$0xff]  ;;  %v9611_v47 = vcombine.high %v9599_v39, %v9599_v39  ;;  %6657 = vmatpush1.bf16.msra.mxu0 %v8518_v50 }
  0xe9   : > { %v804_v46 = vld [vmem:[%s9415_s25 + $0x1160] sm:$0xff]  ;;  %6697 = vmatprep.subr.bf16.mxu1 %v8647_v19 }
  0xea   : > { %v928_v22 = vld [vmem:[%s9415_s25 + $0x1540] sm:$0xff]  ;;  %v8511_v52 = vcombine.high %v800_v45, %v804_v46  ;;  %6686 = vmatprep.mubr.bf16.mxu0 %v9611_v47  ;;  %v8510_v62 = vcombine.low %v800_v45, %v804_v46  ;;  %6698 = vmatpush1.bf16.msra.mxu1 %v8646_v51 }
  0xeb   : > { %v932_v48 = vld [vmem:[%s9415_s25 + $0x1560] sm:$0xff] }
  0xec   : > { %v8639_v55 = vcombine.high %v928_v22, %v932_v48  ;;  %v792_v56 = vld [vmem:[%s9415_s25 + $0x1100] sm:$0xff]  ;;  %6658 = vmatprep.subr.bf16.mxu0 %v8511_v52  ;;  %v8638_v63 = vcombine.low %v928_v22, %v932_v48 }
  0xed   : > { %v796_v57 = vld [vmem:[%s9415_s25 + $0x1120] sm:$0xff]  ;;  %6659 = vmatpush1.bf16.msra.mxu0 %v8510_v62 }
  0xee   : > { %v920_v60 = vld [vmem:[%s9415_s25 + $0x1500] sm:$0xff]  ;;  %v8503_v0 = vcombine.high %v792_v56, %v796_v57  ;;  %6699 = vmatprep.subr.bf16.mxu1 %v8639_v55  ;;  %v8502_v6 = vcombine.low %v792_v56, %v796_v57 }
  0xef   : > { %v924_v61 = vld [vmem:[%s9415_s25 + $0x1520] sm:$0xff]  ;;  %6700 = vmatpush1.bf16.msra.mxu1 %v8638_v63 }
  0xf0   : > { %v8631_v1 = vcombine.high %v920_v60, %v924_v61  ;;  %v784_v2 = vld [vmem:[%s9415_s25 + $0x10c0] sm:$0xff]  ;;  %6660 = vmatprep.subr.bf16.mxu0 %v8503_v0  ;;  %v8630_v7 = vcombine.low %v920_v60, %v924_v61 }
  0xf1   : > { %v788_v3 = vld [vmem:[%s9415_s25 + $0x10e0] sm:$0xff]  ;;  %6661 = vmatpush1.bf16.msra.mxu0 %v8502_v6 }
  0xf2   : > { %v912_v4 = vld [vmem:[%s9415_s25 + $0x14c0] sm:$0xff]  ;;  %v8495_v8 = vcombine.high %v784_v2, %v788_v3  ;;  %6701 = vmatprep.subr.bf16.mxu1 %v8631_v1  ;;  %v8494_v14 = vcombine.low %v784_v2, %v788_v3 }
  0xf3   : > { %v916_v5 = vld [vmem:[%s9415_s25 + $0x14e0] sm:$0xff]  ;;  %6702 = vmatpush1.bf16.msra.mxu1 %v8630_v7 }
  0xf4   : > { %v8623_v9 = vcombine.high %v912_v4, %v916_v5  ;;  %v776_v10 = vld [vmem:[%s9415_s25 + $0x1080] sm:$0xff]  ;;  %6662 = vmatprep.subr.bf16.mxu0 %v8495_v8  ;;  %v8622_v15 = vcombine.low %v912_v4, %v916_v5 }
  0xf5   : > { %v780_v11 = vld [vmem:[%s9415_s25 + $0x10a0] sm:$0xff]  ;;  %6663 = vmatpush1.bf16.msra.mxu0 %v8494_v14 }
  0xf6   : > { %v904_v12 = vld [vmem:[%s9415_s25 + $0x1480] sm:$0xff]  ;;  %v8487_v17 = vcombine.high %v776_v10, %v780_v11  ;;  %6703 = vmatprep.subr.bf16.mxu1 %v8623_v9  ;;  %v8486_v25 = vcombine.low %v776_v10, %v780_v11 }
  0xf7   : > { %v908_v13 = vld [vmem:[%s9415_s25 + $0x14a0] sm:$0xff]  ;;  %6704 = vmatpush1.bf16.msra.mxu1 %v8622_v15 }
  0xf8   : > { %v8615_v18 = vcombine.high %v904_v12, %v908_v13  ;;  %v768_v21 = vld [vmem:[%s9415_s25 + $0x1040] sm:$0xff]  ;;  %6664 = vmatprep.subr.bf16.mxu0 %v8487_v17  ;;  %v8614_v26 = vcombine.low %v904_v12, %v908_v13 }
  0xf9   : > { %v772_v23 = vld [vmem:[%s9415_s25 + $0x1060] sm:$0xff]  ;;  %6665 = vmatpush1.bf16.msra.mxu0 %v8486_v25 }
  0xfa   : > { %v896_v24 = vld [vmem:[%s9415_s25 + $0x1440] sm:$0xff]  ;;  %v8479_v54 = vcombine.high %v768_v21, %v772_v23  ;;  %6705 = vmatprep.subr.bf16.mxu1 %v8615_v18  ;;  %v8478_v34 = vcombine.low %v768_v21, %v772_v23 }
  0xfb   : > { %v900_v53 = vld [vmem:[%s9415_s25 + $0x1460] sm:$0xff]  ;;  %6706 = vmatpush1.bf16.msra.mxu1 %v8614_v26 }
  0xfc   : > { %v8607_v28 = vcombine.high %v896_v24, %v900_v53  ;;  %v760_v30 = vld [vmem:[%s9415_s25 + $0x1000] sm:$0xff]  ;;  %6666 = vmatprep.subr.bf16.mxu0 %v8479_v54  ;;  %v8606_v35 = vcombine.low %v896_v24, %v900_v53 }
  0xfd   : > { %v764_v31 = vld [vmem:[%s9415_s25 + $0x1020] sm:$0xff]  ;;  %6667 = vmatpush1.bf16.msra.mxu0 %v8478_v34 }
  0xfe   : > { %v888_v32 = vld [vmem:[%s9415_s25 + $0x1400] sm:$0xff]  ;;  %v8471_v37 = vcombine.high %v760_v30, %v764_v31  ;;  %6707 = vmatprep.subr.bf16.mxu1 %v8607_v28  ;;  %v8470_v45 = vcombine.low %v760_v30, %v764_v31 }
  0xff   : > { %v892_v33 = vld [vmem:[%s9415_s25 + $0x1420] sm:$0xff]  ;;  %6708 = vmatpush1.bf16.msra.mxu1 %v8606_v35 }
 0x100   : > { %v8599_v38 = vcombine.high %v888_v32, %v892_v33  ;;  %v880_v41 = vld [vmem:[%s9415_s25 + $0x13c0] sm:$0xff]  ;;  %6668 = vmatprep.subr.bf16.mxu0 %v8471_v37  ;;  %v8598_v46 = vcombine.low %v888_v32, %v892_v33 }
 0x101   : > { %v884_v43 = vld [vmem:[%s9415_s25 + $0x13e0] sm:$0xff]  ;;  %6669 = vmatpush1.bf16.msra.mxu0 %v8470_v45 }
 0x102   : > { %v1008_v44 = vld [vmem:[%s9415_s25 + $0x17c0] sm:$0xff]  ;;  %v8591_v22 = vcombine.high %v880_v41, %v884_v43  ;;  %6709 = vmatprep.subr.bf16.mxu1 %v8599_v38  ;;  %v8590_v56 = vcombine.low %v880_v41, %v884_v43 }
 0x103   : > { %v1012_v19 = vld [vmem:[%s9415_s25 + $0x17e0] sm:$0xff]  ;;  %6710 = vmatpush1.bf16.msra.mxu1 %v8598_v46 }
 0x104   : > { %v8719_v48 = vcombine.high %v1008_v44, %v1012_v19  ;;  %v872_v50 = vld [vmem:[%s9415_s25 + $0x1380] sm:$0xff]  ;;  %6670 = vmatprep.subr.bf16.mxu0 %v8591_v22  ;;  %v8718_v57 = vcombine.low %v1008_v44, %v1012_v19 }
 0x105   : > { %v876_v51 = vld [vmem:[%s9415_s25 + $0x13a0] sm:$0xff]  ;;  %6671 = vmatpush2.bf16.msra.mxu0 %v8590_v56 }
 0x106   : > { %v1000_v52 = vld [vmem:[%s9415_s25 + $0x1780] sm:$0xff]  ;;  %v8583_v60 = vcombine.high %v872_v50, %v876_v51  ;;  %6711 = vmatprep.subr.bf16.mxu1 %v8719_v48  ;;  %v8582_v2 = vcombine.low %v872_v50, %v876_v51 }
 0x107   : > { %v1004_v55 = vld [vmem:[%s9415_s25 + $0x17a0] sm:$0xff]  ;;  %6712 = vmatpush2.bf16.msra.mxu1 %v8718_v57 }
 0x108   : > { %v8711_v61 = vcombine.high %v1000_v52, %v1004_v55  ;;  %v864_v62 = vld [vmem:[%s9415_s25 + $0x1340] sm:$0xff]  ;;  %6672 = vmatprep.subr.bf16.mxu0 %v8583_v60  ;;  %v8710_v3 = vcombine.low %v1000_v52, %v1004_v55 }
 0x109   : > { %v868_v63 = vld [vmem:[%s9415_s25 + $0x1360] sm:$0xff]  ;;  %6673 = vmatpush2.bf16.msra.mxu0 %v8582_v2 }
 0x10a   : > { %v992_v0 = vld [vmem:[%s9415_s25 + $0x1740] sm:$0xff]  ;;  %v8575_v4 = vcombine.high %v864_v62, %v868_v63  ;;  %6713 = vmatprep.subr.bf16.mxu1 %v8711_v61  ;;  %v8574_v10 = vcombine.low %v864_v62, %v868_v63 }
 0x10b   : > { %v996_v1 = vld [vmem:[%s9415_s25 + $0x1760] sm:$0xff]  ;;  %6714 = vmatpush2.bf16.msra.mxu1 %v8710_v3 }
 0x10c   : > { %v8703_v5 = vcombine.high %v992_v0, %v996_v1  ;;  %v856_v6 = vld [vmem:[%s9415_s25 + $0x1300] sm:$0xff]  ;;  %6674 = vmatprep.subr.bf16.mxu0 %v8575_v4  ;;  %v8702_v11 = vcombine.low %v992_v0, %v996_v1  ;;  %v9683_v4 = vcombine.low %v9599_v39, %v9599_v39 }
 0x10d   : > { %v860_v7 = vld [vmem:[%s9415_s25 + $0x1320] sm:$0xff]  ;;  %6675 = vmatpush2.bf16.msra.mxu0 %v8574_v10  ;;  %v9693_v10 = vld [vmem:[#allocation2 + $0x38] sm:$0xff] }
 0x10e   : > { %v984_v8 = vld [vmem:[%s9415_s25 + $0x1700] sm:$0xff]  ;;  %v8567_v12 = vcombine.high %v856_v6, %v860_v7  ;;  %6715 = vmatprep.subr.bf16.mxu1 %v8703_v5  ;;  %v8566_v21 = vcombine.low %v856_v6, %v860_v7  ;;  %v9687_v7 = vld [vmem:[#allocation2 + $0x30] sm:$0xff] }
 0x10f   : > { %v988_v9 = vld [vmem:[%s9415_s25 + $0x1720] sm:$0xff]  ;;  %6716 = vmatpush2.bf16.msra.mxu1 %v8702_v11 }
 0x110   : > { %v8695_v13 = vcombine.high %v984_v8, %v988_v9  ;;  %v848_v14 = vld [vmem:[%s9415_s25 + $0x12c0] sm:$0xff]  ;;  %6676 = vmatprep.subr.bf16.mxu0 %v8567_v12  ;;  %v8694_v23 = vcombine.low %v984_v8, %v988_v9  ;;  %v9691_v8 = vcombine.low %v9605_v42, %v9605_v42 }
 0x111   : > { %v852_v15 = vld [vmem:[%s9415_s25 + $0x12e0] sm:$0xff]  ;;  %6677 = vmatpush2.bf16.msra.mxu0 %v8566_v21 }
 0x112   : > { %v976_v17 = vld [vmem:[%s9415_s25 + $0x16c0] sm:$0xff]  ;;  %v8559_v24 = vcombine.high %v848_v14, %v852_v15  ;;  %6717 = vmatprep.subr.bf16.mxu1 %v8695_v13  ;;  %v8558_v30 = vcombine.low %v848_v14, %v852_v15  ;;  %v9699_v15 = vcombine.high %v9687_v7, %v9687_v7 }
 0x113   : > { %v980_v18 = vld [vmem:[%s9415_s25 + $0x16e0] sm:$0xff]  ;;  %6718 = vmatpush2.bf16.msra.mxu1 %v8694_v23 }
 0x114   : > { %v8687_v53 = vcombine.high %v976_v17, %v980_v18  ;;  %v840_v25 = vld [vmem:[%s9415_s25 + $0x1280] sm:$0xff]  ;;  %6678 = vmatprep.subr.bf16.mxu0 %v8559_v24  ;;  %v8686_v31 = vcombine.low %v976_v17, %v980_v18  ;;  %v9706_v18 = vcombine.high %v9693_v10, %v9693_v10 }
 0x115   : > { %v844_v26 = vld [vmem:[%s9415_s25 + $0x12a0] sm:$0xff]  ;;  %6679 = vmatpush2.bf16.msra.mxu0 %v8558_v30 }
 0x116   : > { %v968_v54 = vld [vmem:[%s9415_s25 + $0x1680] sm:$0xff]  ;;  %v8551_v32 = vcombine.high %v840_v25, %v844_v26  ;;  %6719 = vmatprep.subr.bf16.mxu1 %v8687_v53  ;;  %v8550_v41 = vcombine.low %v840_v25, %v844_v26 }
 0x117   : > { %v972_v28 = vld [vmem:[%s9415_s25 + $0x16a0] sm:$0xff]  ;;  %6720 = vmatpush2.bf16.msra.mxu1 %v8686_v31 }
 0x118   : > { %v8679_v33 = vcombine.high %v968_v54, %v972_v28  ;;  %v832_v34 = vld [vmem:[%s9415_s25 + $0x1240] sm:$0xff]  ;;  %6680 = vmatprep.subr.bf16.mxu0 %v8551_v32  ;;  %v8678_v43 = vcombine.low %v968_v54, %v972_v28 }
 0x119   : > { %v836_v35 = vld [vmem:[%s9415_s25 + $0x1260] sm:$0xff]  ;;  %6681 = vmatpush2.bf16.msra.mxu0 %v8550_v41 }
 0x11a   : > { %v960_v37 = vld [vmem:[%s9415_s25 + $0x1640] sm:$0xff]  ;;  %v8543_v44 = vcombine.high %v832_v34, %v836_v35  ;;  %6721 = vmatprep.subr.bf16.mxu1 %v8679_v33  ;;  %v8542_v50 = vcombine.low %v832_v34, %v836_v35 }
 0x11b   : > { %v964_v38 = vld [vmem:[%s9415_s25 + $0x1660] sm:$0xff]  ;;  %6722 = vmatpush2.bf16.msra.mxu1 %v8678_v43 }
 0x11c   : > { %v8671_v19 = vcombine.high %v960_v37, %v964_v38  ;;  %v824_v45 = vld [vmem:[%s9415_s25 + $0x1200] sm:$0xff]  ;;  %6682 = vmatprep.subr.bf16.mxu0 %v8543_v44  ;;  %v8670_v51 = vcombine.low %v960_v37, %v964_v38 }
 0x11d   : > { %v828_v46 = vld [vmem:[%s9415_s25 + $0x1220] sm:$0xff]  ;;  %6683 = vmatpush2.bf16.msra.mxu0 %v8542_v50 }
 0x11e   : > { %v952_v22 = vld [vmem:[%s9415_s25 + $0x1600] sm:$0xff]  ;;  %v8535_v52 = vcombine.high %v824_v45, %v828_v46  ;;  %6723 = vmatprep.subr.bf16.mxu1 %v8671_v19  ;;  %v8534_v62 = vcombine.low %v824_v45, %v828_v46 }
 0x11f   : > { %v956_v48 = vld [vmem:[%s9415_s25 + $0x1620] sm:$0xff]  ;;  %6724 = vmatpush2.bf16.msra.mxu1 %v8670_v51 }
 0x120   : > { %v8663_v55 = vcombine.high %v952_v22, %v956_v48  ;;  %v1072_v56 = vld [vmem:[%s9415_s25 + $0x19c0] sm:$0xff]  ;;  %6684 = vmatprep.subr.bf16.mxu0 %v8535_v52  ;;  %v8662_v63 = vcombine.low %v952_v22, %v956_v48 }
 0x121   : > { %v1076_v57 = vld [vmem:[%s9415_s25 + $0x19e0] sm:$0xff]  ;;  %6685 = vmatpush2.bf16.msra.mxu0 %v8534_v62 }
 0x122   : > { %v1200_v60 = vld [vmem:[%s9415_s25 + $0x1dc0] sm:$0xff]  ;;  %v8783_v0 = vcombine.high %v1072_v56, %v1076_v57  ;;  %6725 = vmatprep.subr.bf16.mxu1 %v8663_v55  ;;  %v8782_v9 = vcombine.low %v1072_v56, %v1076_v57 }
 0x123   : > { %v1204_v61 = vld [vmem:[%s9415_s25 + $0x1de0] sm:$0xff]  ;;  %6726 = vmatpush2.bf16.msra.mxu1 %v8662_v63 }
 0x124   : > { %v8911_v1 = vcombine.high %v1200_v60, %v1204_v61  ;;  %v1064_v2 = vld [vmem:[%s9415_s25 + $0x1980] sm:$0xff]  ;;  %6736 = vmatprep.subr.bf16.mxu0 %v8783_v0  ;;  %v8910_v11 = vcombine.low %v1200_v60, %v1204_v61  ;;  %6687 = vmatmul.mubr.bf16.vlgmr.msra.gmra.mxu0 %v9683_v4 }
 0x125   : > { %v1068_v3 = vld [vmem:[%s9415_s25 + $0x19a0] sm:$0xff]  ;;  %6737 = vmatpush1.bf16.msra.mxu0 %v8782_v9  ;;  %6768 = vmatprep.mubr.bf16.mxu0 %v9699_v15 }
 0x126   : > { %v1192_v5 = vld [vmem:[%s9415_s25 + $0x1d80] sm:$0xff]  ;;  %v8775_v12 = vcombine.high %v1064_v2, %v1068_v3  ;;  %6777 = vmatprep.subr.bf16.mxu1 %v8911_v1  ;;  %6728 = vmatmul.mubr.bf16.vlgmr.msra.gmra.mxu1 %v9691_v8  ;;  %v8774_v21 = vcombine.low %v1064_v2, %v1068_v3 }
 0x127   : > { %v1196_v6 = vld [vmem:[%s9415_s25 + $0x1da0] sm:$0xff]  ;;  %6778 = vmatpush1.bf16.msra.mxu1 %v8910_v11  ;;  %6809 = vmatprep.mubr.bf16.mxu1 %v9706_v18 }
 0x128   : > { %v8903_v39 = vcombine.high %v1192_v5, %v1196_v6  ;;  %v1056_v13 = vld [vmem:[%s9415_s25 + $0x1940] sm:$0xff]  ;;  %6738 = vmatprep.subr.bf16.mxu0 %v8775_v12  ;;  %v8902_v23 = vcombine.low %v1192_v5, %v1196_v6 }
 0x129   : > { %v1060_v14 = vld [vmem:[%s9415_s25 + $0x1960] sm:$0xff]  ;;  %6739 = vmatpush1.bf16.msra.mxu0 %v8774_v21 }
 0x12a   : > { %v1184_v42 = vld [vmem:[%s9415_s25 + $0x1d40] sm:$0xff]  ;;  %v8767_v24 = vcombine.high %v1056_v13, %v1060_v14  ;;  %6779 = vmatprep.subr.bf16.mxu1 %v8903_v39  ;;  %v8766_v30 = vcombine.low %v1056_v13, %v1060_v14 }
 0x12b   : > { %v1188_v17 = vld [vmem:[%s9415_s25 + $0x1d60] sm:$0xff]  ;;  %6780 = vmatpush1.bf16.msra.mxu1 %v8902_v23 }
 0x12c   : > { %v8895_v53 = vcombine.high %v1184_v42, %v1188_v17  ;;  %v1048_v25 = vld [vmem:[%s9415_s25 + $0x1900] sm:$0xff]  ;;  %6740 = vmatprep.subr.bf16.mxu0 %v8767_v24  ;;  %v8894_v31 = vcombine.low %v1184_v42, %v1188_v17 }
 0x12d   : > { %v1052_v26 = vld [vmem:[%s9415_s25 + $0x1920] sm:$0xff]  ;;  %6741 = vmatpush1.bf16.msra.mxu0 %v8766_v30 }
 0x12e   : > { %v1176_v54 = vld [vmem:[%s9415_s25 + $0x1d00] sm:$0xff]  ;;  %v8759_v32 = vcombine.high %v1048_v25, %v1052_v26  ;;  %6781 = vmatprep.subr.bf16.mxu1 %v8895_v53  ;;  %v8758_v41 = vcombine.low %v1048_v25, %v1052_v26 }
 0x12f   : > { %v1180_v28 = vld [vmem:[%s9415_s25 + $0x1d20] sm:$0xff]  ;;  %6782 = vmatpush1.bf16.msra.mxu1 %v8894_v31 }
 0x130   : > { %v8887_v33 = vcombine.high %v1176_v54, %v1180_v28  ;;  %v1040_v34 = vld [vmem:[%s9415_s25 + $0x18c0] sm:$0xff]  ;;  %6742 = vmatprep.subr.bf16.mxu0 %v8759_v32  ;;  %v8886_v43 = vcombine.low %v1176_v54, %v1180_v28 }
 0x131   : > { %v1044_v35 = vld [vmem:[%s9415_s25 + $0x18e0] sm:$0xff]  ;;  %6743 = vmatpush1.bf16.msra.mxu0 %v8758_v41 }
 0x132   : > { %v1168_v37 = vld [vmem:[%s9415_s25 + $0x1cc0] sm:$0xff]  ;;  %v8751_v44 = vcombine.high %v1040_v34, %v1044_v35  ;;  %6783 = vmatprep.subr.bf16.mxu1 %v8887_v33  ;;  %v8750_v50 = vcombine.low %v1040_v34, %v1044_v35 }
 0x133   : > { %v1172_v38 = vld [vmem:[%s9415_s25 + $0x1ce0] sm:$0xff]  ;;  %6784 = vmatpush1.bf16.msra.mxu1 %v8886_v43 }
 0x134   : > { %v8879_v19 = vcombine.high %v1168_v37, %v1172_v38  ;;  %v1032_v45 = vld [vmem:[%s9415_s25 + $0x1880] sm:$0xff]  ;;  %6744 = vmatprep.subr.bf16.mxu0 %v8751_v44  ;;  %v8878_v51 = vcombine.low %v1168_v37, %v1172_v38 }
 0x135   : > { %v1036_v46 = vld [vmem:[%s9415_s25 + $0x18a0] sm:$0xff]  ;;  %6745 = vmatpush1.bf16.msra.mxu0 %v8750_v50 }
 0x136   : > { %v1160_v22 = vld [vmem:[%s9415_s25 + $0x1c80] sm:$0xff]  ;;  %v8743_v52 = vcombine.high %v1032_v45, %v1036_v46  ;;  %6785 = vmatprep.subr.bf16.mxu1 %v8879_v19  ;;  %v8742_v62 = vcombine.low %v1032_v45, %v1036_v46 }
 0x137   : > { %v1164_v48 = vld [vmem:[%s9415_s25 + $0x1ca0] sm:$0xff]  ;;  %6786 = vmatpush1.bf16.msra.mxu1 %v8878_v51 }
 0x138   : > { %v8871_v55 = vcombine.high %v1160_v22, %v1164_v48  ;;  %v1024_v56 = vld [vmem:[%s9415_s25 + $0x1840] sm:$0xff]  ;;  %6746 = vmatprep.subr.bf16.mxu0 %v8743_v52  ;;  %v8870_v63 = vcombine.low %v1160_v22, %v1164_v48 }
 0x139   : > { %v1028_v57 = vld [vmem:[%s9415_s25 + $0x1860] sm:$0xff]  ;;  %6747 = vmatpush1.bf16.msra.mxu0 %v8742_v62 }
 0x13a   : > { %v1152_v60 = vld [vmem:[%s9415_s25 + $0x1c40] sm:$0xff]  ;;  %v8735_v0 = vcombine.high %v1024_v56, %v1028_v57  ;;  %6787 = vmatprep.subr.bf16.mxu1 %v8871_v55  ;;  %v8734_v9 = vcombine.low %v1024_v56, %v1028_v57 }
 0x13b   : > { %v1156_v61 = vld [vmem:[%s9415_s25 + $0x1c60] sm:$0xff]  ;;  %6788 = vmatpush1.bf16.msra.mxu1 %v8870_v63 }
 0x13c   : > { %v8863_v1 = vcombine.high %v1152_v60, %v1156_v61  ;;  %v1016_v2 = vld [vmem:[%s9415_s25 + $0x1800] sm:$0xff]  ;;  %6748 = vmatprep.subr.bf16.mxu0 %v8735_v0  ;;  %v8862_v11 = vcombine.low %v1152_v60, %v1156_v61 }
 0x13d   : > { %v1020_v3 = vld [vmem:[%s9415_s25 + $0x1820] sm:$0xff]  ;;  %6749 = vmatpush1.bf16.msra.mxu0 %v8734_v9 }
 0x13e   : > { %v1144_v5 = vld [vmem:[%s9415_s25 + $0x1c00] sm:$0xff]  ;;  %v8727_v12 = vcombine.high %v1016_v2, %v1020_v3  ;;  %6789 = vmatprep.subr.bf16.mxu1 %v8863_v1  ;;  %v8726_v21 = vcombine.low %v1016_v2, %v1020_v3 }
 0x13f   : > { %v1148_v6 = vld [vmem:[%s9415_s25 + $0x1c20] sm:$0xff]  ;;  %6790 = vmatpush1.bf16.msra.mxu1 %v8862_v11 }
 0x140   : > { %v8855_v39 = vcombine.high %v1144_v5, %v1148_v6  ;;  %v1136_v13 = vld [vmem:[%s9415_s25 + $0x1bc0] sm:$0xff]  ;;  %6750 = vmatprep.subr.bf16.mxu0 %v8727_v12  ;;  %v8854_v23 = vcombine.low %v1144_v5, %v1148_v6 }
 0x141   : > { %v1140_v14 = vld [vmem:[%s9415_s25 + $0x1be0] sm:$0xff]  ;;  %6751 = vmatpush1.bf16.msra.mxu0 %v8726_v21 }
 0x142   : > { %v1264_v42 = vld [vmem:[%s9415_s25 + $0x1fc0] sm:$0xff]  ;;  %v8847_v24 = vcombine.high %v1136_v13, %v1140_v14  ;;  %6791 = vmatprep.subr.bf16.mxu1 %v8855_v39  ;;  %v8846_v30 = vcombine.low %v1136_v13, %v1140_v14 }
 0x143   : > { %v1268_v17 = vld [vmem:[%s9415_s25 + $0x1fe0] sm:$0xff]  ;;  %6792 = vmatpush1.bf16.msra.mxu1 %v8854_v23  ;;  %v1274_v23 = vlaneseq }
 0x144   : > { %v8975_v53 = vcombine.high %v1264_v42, %v1268_v17  ;;  %v1128_v25 = vld [vmem:[%s9415_s25 + $0x1b80] sm:$0xff]  ;;  %6752 = vmatprep.subr.bf16.mxu0 %v8847_v24  ;;  %v8974_v31 = vcombine.low %v1264_v42, %v1268_v17 }
 0x145   : > { %v1132_v26 = vld [vmem:[%s9415_s25 + $0x1ba0] sm:$0xff]  ;;  %6753 = vmatpush2.bf16.msra.mxu0 %v8846_v30 }
 0x146   : > { %v1256_v54 = vld [vmem:[%s9415_s25 + $0x1f80] sm:$0xff]  ;;  %v8839_v32 = vcombine.high %v1128_v25, %v1132_v26  ;;  %6793 = vmatprep.subr.bf16.mxu1 %v8975_v53  ;;  %v8838_v41 = vcombine.low %v1128_v25, %v1132_v26 }
 0x147   : > { %v1260_v28 = vld [vmem:[%s9415_s25 + $0x1fa0] sm:$0xff]  ;;  %6794 = vmatpush2.bf16.msra.mxu1 %v8974_v31 }
 0x148   : > { %v8967_v33 = vcombine.high %v1256_v54, %v1260_v28  ;;  %v1120_v34 = vld [vmem:[%s9415_s25 + $0x1b40] sm:$0xff]  ;;  %6754 = vmatprep.subr.bf16.mxu0 %v8839_v32  ;;  %v8966_v43 = vcombine.low %v1256_v54, %v1260_v28  ;;  %v9764_v32 = vshrl.u32 %v1274_v23, 7 }
 0x149   : > { %v1124_v35 = vld [vmem:[%s9415_s25 + $0x1b60] sm:$0xff]  ;;  %6755 = vmatpush2.bf16.msra.mxu0 %v8838_v41  ;;  %v433_v41 = vld [vmem:[%s9415_s25 + $0x5c8] sm:$0xff] }
 0x14a   : > { %v1248_v37 = vld [vmem:[%s9415_s25 + $0x1f40] sm:$0xff]  ;;  %v8831_v44 = vcombine.high %v1120_v34, %v1124_v35  ;;  %6795 = vmatprep.subr.bf16.mxu1 %v8967_v33  ;;  %v8830_v50 = vcombine.low %v1120_v34, %v1124_v35 }
 0x14b   : > { %v1252_v38 = vld [vmem:[%s9415_s25 + $0x1f60] sm:$0xff]  ;;  %6796 = vmatpush2.bf16.msra.mxu1 %v8966_v43  ;;  %v437_v43 = vld [vmem:[%s9415_s25 + $0x5e8] sm:$0xff] }
 0x14c   : > { %v8959_v19 = vcombine.high %v1248_v37, %v1252_v38  ;;  %v1112_v45 = vld [vmem:[%s9415_s25 + $0x1b00] sm:$0xff]  ;;  %6756 = vmatprep.subr.bf16.mxu0 %v8831_v44  ;;  %v8958_v51 = vcombine.low %v1248_v37, %v1252_v38  ;;  %v305_v37 = vld [vmem:[%s9415_s25 + $0x1c8] sm:$0xff] }
 0x14d   : > { %v1116_v46 = vld [vmem:[%s9415_s25 + $0x1b20] sm:$0xff]  ;;  %6757 = vmatpush2.bf16.msra.mxu0 %v8830_v50  ;;  %v309_v38 = vld [vmem:[%s9415_s25 + $0x1e8] sm:$0xff]  ;;  %v1280_v50 = vsub.s32 1, %v9764_v32 }
 0x14e   : > { %v1240_v22 = vld [vmem:[%s9415_s25 + $0x1f00] sm:$0xff]  ;;  %v8823_v52 = vcombine.high %v1112_v45, %v1116_v46  ;;  %6797 = vmatprep.subr.bf16.mxu1 %v8959_v19  ;;  %v8822_v62 = vcombine.low %v1112_v45, %v1116_v46  ;;  %v1276_v19 = vsub.s32 0, %v9764_v32 }
 0x14f   : > { %v1244_v48 = vld [vmem:[%s9415_s25 + $0x1f20] sm:$0xff]  ;;  %6798 = vmatpush2.bf16.msra.mxu1 %v8958_v51  ;;  %v297_v51 = vld [vmem:[%s9415_s25 + $0x188] sm:$0xff] }
 0x150   : > { %v8951_v55 = vcombine.high %v1240_v22, %v1244_v48  ;;  %v1104_v56 = vld [vmem:[%s9415_s25 + $0x1ac0] sm:$0xff]  ;;  %6758 = vmatprep.subr.bf16.mxu0 %v8823_v52  ;;  %v8950_v63 = vcombine.low %v1240_v22, %v1244_v48  ;;  %v8017_v22 = vcombine.high %v305_v37, %v309_v38  ;;  %v8145_v48 = vcombine.high %v433_v41, %v437_v43  ;;  %v301_v52 = vld [vmem:[%s9415_s25 + $0x1a8] sm:$0xff] }
 0x151   : > { %v1108_v57 = vld [vmem:[%s9415_s25 + $0x1ae0] sm:$0xff]  ;;  %6759 = vmatpush2.bf16.msra.mxu0 %v8822_v62  ;;  %v8016_v62 = vcombine.low %v305_v37, %v309_v38 }
 0x152   : > { %v1232_v60 = vld [vmem:[%s9415_s25 + $0x1ec0] sm:$0xff]  ;;  %v8815_v0 = vcombine.high %v1104_v56, %v1108_v57  ;;  %6799 = vmatprep.subr.bf16.mxu1 %v8951_v55  ;;  %v8814_v9 = vcombine.low %v1104_v56, %v1108_v57  ;;  %v9779_v55 = vcombine.low %v9687_v7, %v9687_v7  ;;  %v425_v56 = vld [vmem:[%s9415_s25 + $0x588] sm:$0xff] }
 0x153   : > { %v1236_v61 = vld [vmem:[%s9415_s25 + $0x1ee0] sm:$0xff]  ;;  %6800 = vmatpush2.bf16.msra.mxu1 %v8950_v63  ;;  %v429_v57 = vld [vmem:[%s9415_s25 + $0x5a8] sm:$0xff]  ;;  %v8144_v63 = vcombine.low %v433_v41, %v437_v43 }
 0x154   : > { %v8943_v1 = vcombine.high %v1232_v60, %v1236_v61  ;;  %v1096_v2 = vld [vmem:[%s9415_s25 + $0x1a80] sm:$0xff]  ;;  %6760 = vmatprep.subr.bf16.mxu0 %v8815_v0  ;;  %v8942_v11 = vcombine.low %v1232_v60, %v1236_v61  ;;  %v9785_v61 = vcombine.low %v9693_v10, %v9693_v10  ;;  %v8009_v0 = vcombine.high %v297_v51, %v301_v52  ;;  %v289_v7 = vld [vmem:[%s9415_s25 + $0x148] sm:$0xff] }
 0x155   : > { %v1100_v3 = vld [vmem:[%s9415_s25 + $0x1aa0] sm:$0xff]  ;;  %6761 = vmatpush2.bf16.msra.mxu0 %v8814_v9  ;;  %v421_v9 = vld [vmem:[%s9415_s25 + $0x568] sm:$0xff] }
 0x156   : > { %v1224_v5 = vld [vmem:[%s9415_s25 + $0x1e80] sm:$0xff]  ;;  %v8807_v12 = vcombine.high %v1096_v2, %v1100_v3  ;;  %6801 = vmatprep.subr.bf16.mxu1 %v8943_v1  ;;  %v8806_v21 = vcombine.low %v1096_v2, %v1100_v3  ;;  %v8137_v2 = vcombine.high %v425_v56, %v429_v57  ;;  %v293_v3 = vld [vmem:[%s9415_s25 + $0x168] sm:$0xff] }
 0x157   : > { %v1228_v6 = vld [vmem:[%s9415_s25 + $0x1ea0] sm:$0xff]  ;;  %6802 = vmatpush2.bf16.msra.mxu1 %v8942_v11  ;;  %v273_v41 = vld [vmem:[%s9415_s25 + $0xc8] sm:$0xff] }
 0x158   : > { %v8935_v39 = vcombine.high %v1224_v5, %v1228_v6  ;;  %v1088_v13 = vld [vmem:[%s9415_s25 + $0x1a40] sm:$0xff]  ;;  %6762 = vmatprep.subr.bf16.mxu0 %v8807_v12  ;;  %v8934_v24 = vcombine.low %v1224_v5, %v1228_v6  ;;  %v417_v6 = vld [vmem:[%s9415_s25 + $0x548] sm:$0xff]  ;;  %v8008_v12 = vcombine.low %v297_v51, %v301_v52 }
 0x159   : > { %v1092_v14 = vld [vmem:[%s9415_s25 + $0x1a60] sm:$0xff]  ;;  %6763 = vmatpush2.bf16.msra.mxu0 %v8806_v21  ;;  %v8129_v23 = vcombine.high %v417_v6, %v421_v9  ;;  %v277_v43 = vld [vmem:[%s9415_s25 + $0xe8] sm:$0xff] }
 0x15a   : > { %v1216_v42 = vld [vmem:[%s9415_s25 + $0x1e40] sm:$0xff]  ;;  %v8799_v53 = vcombine.high %v1088_v13, %v1092_v14  ;;  %6803 = vmatprep.subr.bf16.mxu1 %v8935_v39  ;;  %v8798_v31 = vcombine.low %v1088_v13, %v1092_v14  ;;  %v8136_v13 = vcombine.low %v425_v56, %v429_v57  ;;  %v8001_v14 = vcombine.high %v289_v7, %v293_v3  ;;  %v269_v51 = vld [vmem:[%s9415_s25 + $0xa8] sm:$0xff] }
 0x15b   : > { %v1220_v17 = vld [vmem:[%s9415_s25 + $0x1e60] sm:$0xff]  ;;  %6804 = vmatpush2.bf16.msra.mxu1 %v8934_v24  ;;  %v281_v24 = vld [vmem:[%s9415_s25 + $0x108] sm:$0xff]  ;;  %v7984_v57 = vcombine.low %v273_v41, %v277_v43 }
 0x15c   : > { %v8927_v25 = vcombine.high %v1216_v42, %v1220_v17  ;;  %v1080_v26 = vld [vmem:[%s9415_s25 + $0x1a00] sm:$0xff]  ;;  %6764 = vmatprep.subr.bf16.mxu0 %v8799_v53  ;;  %v8926_v33 = vcombine.low %v1216_v42, %v1220_v17  ;;  %v285_v53 = vld [vmem:[%s9415_s25 + $0x128] sm:$0xff] }
 0x15d   : > { %v1084_v54 = vld [vmem:[%s9415_s25 + $0x1a20] sm:$0xff]  ;;  %6765 = vmatpush2.bf16.msra.mxu0 %v8798_v31  ;;  %v8000_v31 = vcombine.low %v289_v7, %v293_v3  ;;  %v393_v52 = vld [vmem:[%s9415_s25 + $0x488] sm:$0xff] }
 0x15e   : > { %v1208_v28 = vld [vmem:[%s9415_s25 + $0x1e00] sm:$0xff]  ;;  %v8791_v34 = vcombine.high %v1080_v26, %v1084_v54  ;;  %6805 = vmatprep.subr.bf16.mxu1 %v8927_v25  ;;  %v8790_v44 = vcombine.low %v1080_v26, %v1084_v54  ;;  %v409_v26 = vld [vmem:[%s9415_s25 + $0x508] sm:$0xff] }
 0x15f   : > { %v1212_v30 = vld [vmem:[%s9415_s25 + $0x1e20] sm:$0xff]  ;;  %6806 = vmatpush2.bf16.msra.mxu1 %v8926_v33  ;;  %v413_v54 = vld [vmem:[%s9415_s25 + $0x528] sm:$0xff] }
 0x160   : > { %v8919_v35 = vcombine.high %v1208_v28, %v1212_v30  ;;  %6766 = vmatprep.subr.bf16.mxu0 %v8791_v34  ;;  %v8918_v45 = vcombine.low %v1208_v28, %v1212_v30  ;;  %v1272_v46 = vld [vmem:[%s9771_s27] sm:$0xff]  ;;  %v8128_v34 = vcombine.low %v417_v6, %v421_v9  ;;  %v8121_v38 = vcombine.high %v409_v26, %v413_v54 }
 0x161   : > { %6767 = vmatpush2.bf16.msra.mxu0 %v8790_v44  ;;  %v1277_v60 = vrot.slane %v1272_v46, %v1276_v19  ;;  %v1281_v1 = vrot.slane %v1272_v46, %v1280_v50  ;;  %v401_v44 = vld [vmem:[%s9415_s25 + $0x4c8] sm:$0xff]  ;;  %v8120_v46 = vcombine.low %v409_v26, %v413_v54 }
 0x162   : > { %6807 = vmatprep.subr.bf16.mxu1 %v8919_v35  ;;  %6818 = vmatprep.subr.bf16.mxu0 %v8017_v22  ;;  %v7993_v35 = vcombine.high %v281_v24, %v285_v53  ;;  %v405_v19 = vld [vmem:[%s9415_s25 + $0x4e8] sm:$0xff]  ;;  %v7985_v22 = vcombine.high %v273_v41, %v277_v43 }
 0x163   : > { %6808 = vmatpush2.bf16.msra.mxu1 %v8918_v45  ;;  %v6524_v5 = vpop.f32.mrf.mxu0  ;;  %v7992_v45 = vcombine.low %v281_v24, %v285_v53  ;;  %v265_v50 = vld [vmem:[%s9415_s25 + $0x88] sm:$0xff] }
 0x164   : > { %6859 = vmatprep.subr.bf16.mxu1 %v8145_v48  ;;  %6769 = vmatmul.mubr.bf16.vlgmr.msra.gmra.mxu0 %v9779_v55  ;;  %v6525_v11 = vadd.f32 %v6524_v5, %v1277_v60  ;;  %v8113_v48 = vcombine.high %v401_v44, %v405_v19  ;;  %v397_v56 = vld [vmem:[%s9415_s25 + $0x4a8] sm:$0xff]  ;;  %v8112_v60 = vcombine.low %v401_v44, %v405_v19 }
 0x165   : > { %v6565_v10 = vpop.f32.mrf.mxu1  ;;  %6819 = vmatpush1.bf16.msra.mxu0 %v8016_v62  ;;  %v6526_v39 = vpop.f32.mrf.mxu0  ;;  %6850 = vmatprep.mubr.bf16.mxu0 %v9457_v58  ;;  %v7977_v62 = vcombine.high %v265_v50, %v269_v51  ;;  %v389_v7 = vld [vmem:[%s9415_s25 + $0x468] sm:$0xff]  ;;  %v7976_v3 = vcombine.low %v265_v50, %v269_v51  ;;  %v8104_v5 = vcombine.low %v393_v52, %v397_v56 }
 0x166   : > { %6810 = vmatmul.mubr.bf16.vlgmr.msra.gmra.mxu1 %v9785_v61  ;;  %6820 = vmatprep.subr.bf16.mxu0 %v8009_v0  ;;  %v9793_v42 = vadd.f32 %v6565_v10, %v6525_v11  ;;  %v6527_v17 = vadd.f32 %v6526_v39, %v1281_v1  ;;  %v257_v0 = vld [vmem:[%s9415_s25 + $0x48] sm:$0xff] }
 0x167   : > { %6860 = vmatpush1.bf16.msra.mxu1 %v8144_v63  ;;  %v6567_v21 = vpop.f32.mrf.mxu1  ;;  %v6528_v25 = vpop.f32.mrf.mxu0  ;;  %6891 = vmatprep.mubr.bf16.mxu1 %v9461_v59  ;;  %v8105_v63 = vcombine.high %v393_v52, %v397_v56  ;;  %v261_v1 = vld [vmem:[%s9415_s25 + $0x68] sm:$0xff] }
 0x168   : > { %6861 = vmatprep.subr.bf16.mxu1 %v8137_v2  ;;  %v9801_v28 = vadd.f32 %v6567_v21, %v6527_v17  ;;  %v385_v2 = vld [vmem:[%s9415_s25 + $0x448] sm:$0xff]  ;;  %v7969_v6 = vcombine.high %v257_v0, %v261_v1 }
 0x169   : > { %v6569_v30 = vpop.f32.mrf.mxu1  ;;  %6821 = vmatpush1.bf16.msra.mxu0 %v8008_v12  ;;  %v6529_v33 = vpop.f32.mrf.mxu0  ;;  %v8097_v9 = vcombine.high %v385_v2, %v389_v7  ;;  %v249_v11 = vld [vmem:[%s9415_s25 + $0x8] sm:$0xff] }
 0x16a   : > { %6822 = vmatprep.subr.bf16.mxu0 %v8001_v14  ;;  %v253_v10 = vld [vmem:[%s9415_s25 + $0x28] sm:$0xff]  ;;  %v8096_v14 = vcombine.low %v385_v2, %v389_v7 }
 0x16b   : > { %6862 = vmatpush1.bf16.msra.mxu1 %v8136_v13  ;;  %v6570_v37 = vpop.f32.mrf.mxu1  ;;  %v377_v12 = vld [vmem:[%s9415_s25 + $0x408] sm:$0xff]  ;;  %v7968_v13 = vcombine.low %v257_v0, %v261_v1  ;;  %v7961_v17 = vcombine.high %v249_v11, %v253_v10  ;;  %v7960_v26 = vcombine.low %v249_v11, %v253_v10 }
 0x16c   : > { %6863 = vmatprep.subr.bf16.mxu1 %v8129_v23  ;;  %v381_v39 = vld [vmem:[%s9415_s25 + $0x428] sm:$0xff] }
 0x16d   : > { %6823 = vmatpush1.bf16.msra.mxu0 %v8000_v31  ;;  %v8089_v21 = vcombine.high %v377_v12, %v381_v39  ;;  %v369_v23 = vld [vmem:[%s9415_s25 + $0x3c8] sm:$0xff]  ;;  %v8088_v54 = vcombine.low %v377_v12, %v381_v39 }
 0x16e   : > { %6824 = vmatprep.subr.bf16.mxu0 %v7993_v35  ;;  %v373_v24 = vld [vmem:[%s9415_s25 + $0x3e8] sm:$0xff] }
 0x16f   : > { %6864 = vmatpush1.bf16.msra.mxu1 %v8128_v34  ;;  %v497_v53 = vld [vmem:[%s9415_s25 + $0x7c8] sm:$0xff]  ;;  %v8081_v30 = vcombine.high %v369_v23, %v373_v24 }
 0x170   : > { %6865 = vmatprep.subr.bf16.mxu1 %v8121_v38  ;;  %v501_v25 = vld [vmem:[%s9415_s25 + $0x7e8] sm:$0xff]  ;;  %v8080_v38 = vcombine.low %v369_v23, %v373_v24 }
 0x171   : > { %6825 = vmatpush1.bf16.msra.mxu0 %v7992_v45  ;;  %v8209_v31 = vcombine.high %v497_v53, %v501_v25  ;;  %v361_v33 = vld [vmem:[%s9415_s25 + $0x388] sm:$0xff]  ;;  %v8208_v41 = vcombine.low %v497_v53, %v501_v25 }
 0x172   : > { %6826 = vmatprep.subr.bf16.mxu0 %v7985_v22  ;;  %v365_v34 = vld [vmem:[%s9415_s25 + $0x3a8] sm:$0xff] }
 0x173   : > { %6866 = vmatpush1.bf16.msra.mxu1 %v8120_v46  ;;  %v489_v35 = vld [vmem:[%s9415_s25 + $0x788] sm:$0xff]  ;;  %v8073_v43 = vcombine.high %v361_v33, %v365_v34 }
 0x174   : > { %6867 = vmatprep.subr.bf16.mxu1 %v8113_v48  ;;  %v493_v37 = vld [vmem:[%s9415_s25 + $0x7a8] sm:$0xff]  ;;  %v8072_v48 = vcombine.low %v361_v33, %v365_v34 }
 0x175   : > { %6827 = vmatpush1.bf16.msra.mxu0 %v7984_v57  ;;  %v8201_v44 = vcombine.high %v489_v35, %v493_v37  ;;  %v353_v19 = vld [vmem:[%s9415_s25 + $0x348] sm:$0xff]  ;;  %v8200_v50 = vcombine.low %v489_v35, %v493_v37 }
 0x176   : > { %6828 = vmatprep.subr.bf16.mxu0 %v7977_v62  ;;  %v357_v45 = vld [vmem:[%s9415_s25 + $0x368] sm:$0xff] }
 0x177   : > { %6868 = vmatpush1.bf16.msra.mxu1 %v8112_v60  ;;  %v481_v46 = vld [vmem:[%s9415_s25 + $0x748] sm:$0xff]  ;;  %v8065_v51 = vcombine.high %v353_v19, %v357_v45 }
 0x178   : > { %6869 = vmatprep.subr.bf16.mxu1 %v8105_v63  ;;  %v485_v22 = vld [vmem:[%s9415_s25 + $0x768] sm:$0xff]  ;;  %v8064_v63 = vcombine.low %v353_v19, %v357_v45 }
 0x179   : > { %6829 = vmatpush1.bf16.msra.mxu0 %v7976_v3  ;;  %v8193_v52 = vcombine.high %v481_v46, %v485_v22  ;;  %v345_v56 = vld [vmem:[%s9415_s25 + $0x308] sm:$0xff]  ;;  %v8192_v0 = vcombine.low %v481_v46, %v485_v22 }
 0x17a   : > { %6830 = vmatprep.subr.bf16.mxu0 %v7969_v6  ;;  %v349_v57 = vld [vmem:[%s9415_s25 + $0x328] sm:$0xff] }
 0x17b   : > { %6870 = vmatpush1.bf16.msra.mxu1 %v8104_v5  ;;  %v473_v60 = vld [vmem:[%s9415_s25 + $0x708] sm:$0xff]  ;;  %v8057_v1 = vcombine.high %v345_v56, %v349_v57 }
 0x17c   : > { %6871 = vmatprep.subr.bf16.mxu1 %v8097_v9  ;;  %v477_v62 = vld [vmem:[%s9415_s25 + $0x728] sm:$0xff]  ;;  %v8056_v9 = vcombine.low %v345_v56, %v349_v57 }
 0x17d   : > { %6831 = vmatpush1.bf16.msra.mxu0 %v7968_v13  ;;  %v8185_v2 = vcombine.high %v473_v60, %v477_v62  ;;  %v337_v7 = vld [vmem:[%s9415_s25 + $0x2c8] sm:$0xff]  ;;  %v8184_v11 = vcombine.low %v473_v60, %v477_v62 }
 0x17e   : > { %6832 = vmatprep.subr.bf16.mxu0 %v7961_v17  ;;  %v341_v3 = vld [vmem:[%s9415_s25 + $0x2e8] sm:$0xff] }
 0x17f   : > { %6872 = vmatpush1.bf16.msra.mxu1 %v8096_v14  ;;  %v465_v5 = vld [vmem:[%s9415_s25 + $0x6c8] sm:$0xff]  ;;  %v8049_v10 = vcombine.high %v337_v7, %v341_v3 }
 0x180   : > { %6873 = vmatprep.subr.bf16.mxu1 %v8089_v21  ;;  %v469_v6 = vld [vmem:[%s9415_s25 + $0x6e8] sm:$0xff]  ;;  %v8048_v21 = vcombine.low %v337_v7, %v341_v3 }
 0x181   : > { %6833 = vmatpush1.bf16.msra.mxu0 %v7960_v26  ;;  %v8177_v12 = vcombine.high %v465_v5, %v469_v6  ;;  %v329_v39 = vld [vmem:[%s9415_s25 + $0x288] sm:$0xff]  ;;  %v8176_v23 = vcombine.low %v465_v5, %v469_v6 }
 0x182   : > { %6834 = vmatprep.subr.bf16.mxu0 %v8081_v30  ;;  %v333_v13 = vld [vmem:[%s9415_s25 + $0x2a8] sm:$0xff] }
 0x183   : > { %6874 = vmatpush1.bf16.msra.mxu1 %v8088_v54  ;;  %v457_v14 = vld [vmem:[%s9415_s25 + $0x688] sm:$0xff]  ;;  %v8041_v24 = vcombine.high %v329_v39, %v333_v13 }
 0x184   : > { %6875 = vmatprep.subr.bf16.mxu1 %v8209_v31  ;;  %v461_v17 = vld [vmem:[%s9415_s25 + $0x6a8] sm:$0xff]  ;;  %v8040_v31 = vcombine.low %v329_v39, %v333_v13 }
 0x185   : > { %6835 = vmatpush2.bf16.msra.mxu0 %v8080_v38  ;;  %v8169_v53 = vcombine.high %v457_v14, %v461_v17  ;;  %v321_v25 = vld [vmem:[%s9415_s25 + $0x248] sm:$0xff]  ;;  %v8168_v33 = vcombine.low %v457_v14, %v461_v17 }
 0x186   : > { %6836 = vmatprep.subr.bf16.mxu0 %v8073_v43  ;;  %v325_v26 = vld [vmem:[%s9415_s25 + $0x268] sm:$0xff] }
 0x187   : > { %6876 = vmatpush2.bf16.msra.mxu1 %v8208_v41  ;;  %v449_v54 = vld [vmem:[%s9415_s25 + $0x648] sm:$0xff]  ;;  %v8033_v34 = vcombine.high %v321_v25, %v325_v26 }
 0x188   : > { %6877 = vmatprep.subr.bf16.mxu1 %v8201_v44  ;;  %v453_v30 = vld [vmem:[%s9415_s25 + $0x668] sm:$0xff]  ;;  %v8032_v44 = vcombine.low %v321_v25, %v325_v26 }
 0x189   : > { %6837 = vmatpush2.bf16.msra.mxu0 %v8072_v48  ;;  %v8161_v35 = vcombine.high %v449_v54, %v453_v30  ;;  %v313_v37 = vld [vmem:[%s9415_s25 + $0x208] sm:$0xff]  ;;  %v8160_v19 = vcombine.low %v449_v54, %v453_v30 }
 0x18a   : > { %6838 = vmatprep.subr.bf16.mxu0 %v8065_v51  ;;  %v317_v38 = vld [vmem:[%s9415_s25 + $0x228] sm:$0xff] }
 0x18b   : > { %6878 = vmatpush2.bf16.msra.mxu1 %v8200_v50  ;;  %v441_v41 = vld [vmem:[%s9415_s25 + $0x608] sm:$0xff]  ;;  %v8025_v45 = vcombine.high %v313_v37, %v317_v38 }
 0x18c   : > { %6879 = vmatprep.subr.bf16.mxu1 %v8193_v52  ;;  %v445_v43 = vld [vmem:[%s9415_s25 + $0x628] sm:$0xff]  ;;  %v8024_v52 = vcombine.low %v313_v37, %v317_v38 }
 0x18d   : > { %6839 = vmatpush2.bf16.msra.mxu0 %v8064_v63  ;;  %v8153_v46 = vcombine.high %v441_v41, %v445_v43  ;;  %v561_v22 = vld [vmem:[%s9415_s25 + $0x9c8] sm:$0xff]  ;;  %v8152_v56 = vcombine.low %v441_v41, %v445_v43 }
 0x18e   : > { %6840 = vmatprep.subr.bf16.mxu0 %v8057_v1  ;;  %v565_v48 = vld [vmem:[%s9415_s25 + $0x9e8] sm:$0xff] }
 0x18f   : > { %6880 = vmatpush2.bf16.msra.mxu1 %v8192_v0  ;;  %v689_v50 = vld [vmem:[%s9415_s25 + $0xdc8] sm:$0xff]  ;;  %v8273_v57 = vcombine.high %v561_v22, %v565_v48 }
 0x190   : > { %6881 = vmatprep.subr.bf16.mxu1 %v8185_v2  ;;  %v693_v51 = vld [vmem:[%s9415_s25 + $0xde8] sm:$0xff]  ;;  %v8272_v2 = vcombine.low %v561_v22, %v565_v48 }
 0x191   : > { %6841 = vmatpush2.bf16.msra.mxu0 %v8056_v9  ;;  %v8401_v60 = vcombine.high %v689_v50, %v693_v51  ;;  %v553_v62 = vld [vmem:[%s9415_s25 + $0x988] sm:$0xff]  ;;  %v8400_v7 = vcombine.low %v689_v50, %v693_v51 }
 0x192   : > { %6842 = vmatprep.subr.bf16.mxu0 %v8049_v10  ;;  %v557_v63 = vld [vmem:[%s9415_s25 + $0x9a8] sm:$0xff] }
 0x193   : > { %6882 = vmatpush2.bf16.msra.mxu1 %v8184_v11  ;;  %v681_v0 = vld [vmem:[%s9415_s25 + $0xd88] sm:$0xff]  ;;  %v8265_v3 = vcombine.high %v553_v62, %v557_v63  ;;  %v8264_v14 = vcombine.low %v553_v62, %v557_v63 }
 0x194   : > { %6883 = vmatprep.subr.bf16.mxu1 %v8177_v12  ;;  %v685_v1 = vld [vmem:[%s9415_s25 + $0xda8] sm:$0xff] }
 0x195   : > { %6843 = vmatpush2.bf16.msra.mxu0 %v8048_v21  ;;  %v8393_v5 = vcombine.high %v681_v0, %v685_v1  ;;  %v545_v6 = vld [vmem:[%s9415_s25 + $0x948] sm:$0xff]  ;;  %v8392_v21 = vcombine.low %v681_v0, %v685_v1 }
 0x196   : > { %6844 = vmatprep.subr.bf16.mxu0 %v8041_v24  ;;  %v549_v9 = vld [vmem:[%s9415_s25 + $0x968] sm:$0xff] }
 0x197   : > { %6884 = vmatpush2.bf16.msra.mxu1 %v8176_v23  ;;  %v673_v10 = vld [vmem:[%s9415_s25 + $0xd48] sm:$0xff]  ;;  %v8257_v23 = vcombine.high %v545_v6, %v549_v9 }
 0x198   : > { %6885 = vmatprep.subr.bf16.mxu1 %v8169_v53  ;;  %v677_v12 = vld [vmem:[%s9415_s25 + $0xd68] sm:$0xff] }
 0x199   : > { %6845 = vmatpush2.bf16.msra.mxu0 %v8040_v31  ;;  %v537_v26 = vld [vmem:[%s9415_s25 + $0x908] sm:$0xff]  ;;  %v8384_v38 = vcombine.low %v673_v10, %v677_v12 }
 0x19a   : > { %6846 = vmatprep.subr.bf16.mxu0 %v8033_v34  ;;  %v541_v54 = vld [vmem:[%s9415_s25 + $0x928] sm:$0xff] }
 0x19b   : > { %6886 = vmatpush2.bf16.msra.mxu1 %v8168_v33  ;;  %v665_v31 = vld [vmem:[%s9415_s25 + $0xd08] sm:$0xff]  ;;  %v8249_v41 = vcombine.high %v537_v26, %v541_v54  ;;  %v8248_v48 = vcombine.low %v537_v26, %v541_v54 }
 0x19c   : > { %6887 = vmatprep.subr.bf16.mxu1 %v8161_v35  ;;  %v669_v33 = vld [vmem:[%s9415_s25 + $0xd28] sm:$0xff] }
 0x19d   : > { %6847 = vmatpush2.bf16.msra.mxu0 %v8032_v44  ;;  %v8377_v44 = vcombine.high %v665_v31, %v669_v33  ;;  %v661_v22 = vld [vmem:[%s9415_s25 + $0xce8] sm:$0xff]  ;;  %v8376_v50 = vcombine.low %v665_v31, %v669_v33 }
 0x19e   : > { %6848 = vmatprep.subr.bf16.mxu0 %v8025_v45  ;;  %v533_v45 = vld [vmem:[%s9415_s25 + $0x8e8] sm:$0xff] }
 0x19f   : > { %6888 = vmatpush2.bf16.msra.mxu1 %v8160_v19  ;;  %v529_v19 = vld [vmem:[%s9415_s25 + $0x8c8] sm:$0xff] }
 0x1a0   : > { %6889 = vmatprep.subr.bf16.mxu1 %v8153_v46  ;;  %v657_v46 = vld [vmem:[%s9415_s25 + $0xcc8] sm:$0xff]  ;;  %v8241_v51 = vcombine.high %v529_v19, %v533_v45  ;;  %v8240_v63 = vcombine.low %v529_v19, %v533_v45 }
 0x1a1   : > { %6849 = vmatpush2.bf16.msra.mxu0 %v8024_v52  ;;  %v8369_v52 = vcombine.high %v657_v46, %v661_v22  ;;  %v653_v62 = vld [vmem:[%s9415_s25 + $0xca8] sm:$0xff]  ;;  %v8368_v0 = vcombine.low %v657_v46, %v661_v22 }
 0x1a2   : > { %6900 = vmatprep.subr.bf16.mxu0 %v8273_v57  ;;  %v525_v57 = vld [vmem:[%s9415_s25 + $0x8a8] sm:$0xff] }
 0x1a3   : > { %6890 = vmatpush2.bf16.msra.mxu1 %v8152_v56  ;;  %v6606_v11 = vpop.f32.mrf.mxu0  ;;  %v521_v56 = vld [vmem:[%s9415_s25 + $0x888] sm:$0xff] }
 0x1a4   : > { %6941 = vmatprep.subr.bf16.mxu1 %v8401_v60  ;;  %6851 = vmatmul.mubr.bf16.vlgmr.msra.gmra.mxu0 %v9507_v16  ;;  %v6607_v39 = vadd.f32 %v6606_v11, %v9793_v42  ;;  %v8385_v42 = vcombine.high %v673_v10, %v677_v12  ;;  %v649_v60 = vld [vmem:[%s9415_s25 + $0xc88] sm:$0xff]  ;;  %v8233_v1 = vcombine.high %v521_v56, %v525_v57 }
 0x1a5   : > { %v6647_v13 = vpop.f32.mrf.mxu1  ;;  %6901 = vmatpush1.bf16.msra.mxu0 %v8272_v2  ;;  %v6608_v17 = vpop.f32.mrf.mxu0  ;;  %6932 = vmatprep.mubr.bf16.mxu0 %v9523_v27  ;;  %v8361_v2 = vcombine.high %v649_v60, %v653_v62  ;;  %v8360_v11 = vcombine.low %v649_v60, %v653_v62  ;;  %v629_v26 = vld [vmem:[%s9415_s25 + $0xbe8] sm:$0xff] }
 0x1a6   : > { %6892 = vmatmul.mubr.bf16.vlgmr.msra.gmra.mxu1 %v9515_v20  ;;  %6902 = vmatprep.subr.bf16.mxu0 %v8265_v3  ;;  %v9866_v24 = vadd.f32 %v6647_v13, %v6607_v39  ;;  %v6609_v53 = vadd.f32 %v6608_v17, %v9801_v28  ;;  %v8256_v28 = vcombine.low %v545_v6, %v549_v9  ;;  %v517_v3 = vld [vmem:[%s9415_s25 + $0x868] sm:$0xff] }
 0x1a7   : > { %6942 = vmatpush1.bf16.msra.mxu1 %v8400_v7  ;;  %v6649_v25 = vpop.f32.mrf.mxu1  ;;  %v6610_v30 = vpop.f32.mrf.mxu0  ;;  %6973 = vmatprep.mubr.bf16.mxu1 %v9530_v29  ;;  %v513_v7 = vld [vmem:[%s9415_s25 + $0x848] sm:$0xff]  ;;  %v8232_v9 = vcombine.low %v521_v56, %v525_v57 }
 0x1a8   : > { %6943 = vmatprep.subr.bf16.mxu1 %v8393_v5  ;;  %v9875_v34 = vadd.f32 %v6649_v25, %v6609_v53  ;;  %v641_v5 = vld [vmem:[%s9415_s25 + $0xc48] sm:$0xff]  ;;  %v8225_v10 = vcombine.high %v513_v7, %v517_v3 }
 0x1a9   : > { %v6651_v35 = vpop.f32.mrf.mxu1  ;;  %6903 = vmatpush1.bf16.msra.mxu0 %v8264_v14  ;;  %v6611_v37 = vpop.f32.mrf.mxu0  ;;  %v645_v6 = vld [vmem:[%s9415_s25 + $0xc68] sm:$0xff] }
 0x1aa   : > { %6904 = vmatprep.subr.bf16.mxu0 %v8257_v23  ;;  %v8353_v12 = vcombine.high %v641_v5, %v645_v6  ;;  %v505_v39 = vld [vmem:[%s9415_s25 + $0x808] sm:$0xff]  ;;  %v8352_v23 = vcombine.low %v641_v5, %v645_v6 }
 0x1ab   : > { %6944 = vmatpush1.bf16.msra.mxu1 %v8392_v21  ;;  %v6652_v43 = vpop.f32.mrf.mxu1  ;;  %v509_v13 = vld [vmem:[%s9415_s25 + $0x828] sm:$0xff]  ;;  %v8224_v21 = vcombine.low %v513_v7, %v517_v3 }
 0x1ac   : > { %6945 = vmatprep.subr.bf16.mxu1 %v8385_v42  ;;  %v633_v14 = vld [vmem:[%s9415_s25 + $0xc08] sm:$0xff]  ;;  %v8217_v53 = vcombine.high %v505_v39, %v509_v13  ;;  %v8216_v31 = vcombine.low %v505_v39, %v509_v13 }
 0x1ad   : > { %6905 = vmatpush1.bf16.msra.mxu0 %v8256_v28  ;;  %v637_v17 = vld [vmem:[%s9415_s25 + $0xc28] sm:$0xff] }
 0x1ae   : > { %6906 = vmatprep.subr.bf16.mxu0 %v8249_v41  ;;  %v8345_v25 = vcombine.high %v633_v14, %v637_v17  ;;  %v625_v42 = vld [vmem:[%s9415_s25 + $0xbc8] sm:$0xff]  ;;  %v8344_v33 = vcombine.low %v633_v14, %v637_v17 }
 0x1af   : > { %6946 = vmatpush1.bf16.msra.mxu1 %v8384_v38  ;;  %v753_v54 = vld [vmem:[%s9415_s25 + $0xfc8] sm:$0xff]  ;;  %v8337_v35 = vcombine.high %v625_v42, %v629_v26 }
 0x1b0   : > { %6947 = vmatprep.subr.bf16.mxu1 %v8377_v44  ;;  %v757_v30 = vld [vmem:[%s9415_s25 + $0xfe8] sm:$0xff]  ;;  %v8336_v44 = vcombine.low %v625_v42, %v629_v26 }
 0x1b1   : > { %6907 = vmatpush1.bf16.msra.mxu0 %v8248_v48  ;;  %v8465_v28 = vcombine.high %v753_v54, %v757_v30  ;;  %v617_v37 = vld [vmem:[%s9415_s25 + $0xb88] sm:$0xff]  ;;  %v8464_v19 = vcombine.low %v753_v54, %v757_v30 }
 0x1b2   : > { %6908 = vmatprep.subr.bf16.mxu0 %v8241_v51  ;;  %v621_v38 = vld [vmem:[%s9415_s25 + $0xba8] sm:$0xff] }
 0x1b3   : > { %6948 = vmatpush1.bf16.msra.mxu1 %v8376_v50  ;;  %v745_v41 = vld [vmem:[%s9415_s25 + $0xf88] sm:$0xff]  ;;  %v8329_v45 = vcombine.high %v617_v37, %v621_v38 }
 0x1b4   : > { %6949 = vmatprep.subr.bf16.mxu1 %v8369_v52  ;;  %v749_v43 = vld [vmem:[%s9415_s25 + $0xfa8] sm:$0xff]  ;;  %v8328_v52 = vcombine.low %v617_v37, %v621_v38 }
 0x1b5   : > { %6909 = vmatpush1.bf16.msra.mxu0 %v8240_v63  ;;  %v8457_v46 = vcombine.high %v745_v41, %v749_v43  ;;  %v609_v22 = vld [vmem:[%s9415_s25 + $0xb48] sm:$0xff]  ;;  %v8456_v56 = vcombine.low %v745_v41, %v749_v43 }
 0x1b6   : > { %6910 = vmatprep.subr.bf16.mxu0 %v8233_v1  ;;  %v613_v48 = vld [vmem:[%s9415_s25 + $0xb68] sm:$0xff] }
 0x1b7   : > { %6950 = vmatpush1.bf16.msra.mxu1 %v8368_v0  ;;  %v737_v50 = vld [vmem:[%s9415_s25 + $0xf48] sm:$0xff]  ;;  %v8321_v57 = vcombine.high %v609_v22, %v613_v48 }
 0x1b8   : > { %6951 = vmatprep.subr.bf16.mxu1 %v8361_v2  ;;  %v741_v51 = vld [vmem:[%s9415_s25 + $0xf68] sm:$0xff]  ;;  %v8320_v2 = vcombine.low %v609_v22, %v613_v48 }
 0x1b9   : > { %6911 = vmatpush1.bf16.msra.mxu0 %v8232_v9  ;;  %v8449_v60 = vcombine.high %v737_v50, %v741_v51  ;;  %v601_v62 = vld [vmem:[%s9415_s25 + $0xb08] sm:$0xff]  ;;  %v8448_v7 = vcombine.low %v737_v50, %v741_v51 }
 0x1ba   : > { %6912 = vmatprep.subr.bf16.mxu0 %v8225_v10  ;;  %v605_v63 = vld [vmem:[%s9415_s25 + $0xb28] sm:$0xff] }
 0x1bb   : > { %6952 = vmatpush1.bf16.msra.mxu1 %v8360_v11  ;;  %v729_v0 = vld [vmem:[%s9415_s25 + $0xf08] sm:$0xff]  ;;  %v8313_v3 = vcombine.high %v601_v62, %v605_v63 }
 0x1bc   : > { %6953 = vmatprep.subr.bf16.mxu1 %v8353_v12  ;;  %v733_v1 = vld [vmem:[%s9415_s25 + $0xf28] sm:$0xff]  ;;  %v8312_v12 = vcombine.low %v601_v62, %v605_v63 }
 0x1bd   : > { %6913 = vmatpush1.bf16.msra.mxu0 %v8224_v21  ;;  %v8441_v5 = vcombine.high %v729_v0, %v733_v1  ;;  %v593_v6 = vld [vmem:[%s9415_s25 + $0xac8] sm:$0xff]  ;;  %v8440_v39 = vcombine.low %v729_v0, %v733_v1 }
 0x1be   : > { %6914 = vmatprep.subr.bf16.mxu0 %v8217_v53  ;;  %v597_v9 = vld [vmem:[%s9415_s25 + $0xae8] sm:$0xff] }
 0x1bf   : > { %6954 = vmatpush1.bf16.msra.mxu1 %v8352_v23  ;;  %v721_v11 = vld [vmem:[%s9415_s25 + $0xec8] sm:$0xff]  ;;  %v8305_v13 = vcombine.high %v593_v6, %v597_v9 }
 0x1c0   : > { %6955 = vmatprep.subr.bf16.mxu1 %v8345_v25  ;;  %v725_v10 = vld [vmem:[%s9415_s25 + $0xee8] sm:$0xff]  ;;  %v8304_v25 = vcombine.low %v593_v6, %v597_v9 }
 0x1c1   : > { %6915 = vmatpush1.bf16.msra.mxu0 %v8216_v31  ;;  %v8433_v14 = vcombine.high %v721_v11, %v725_v10  ;;  %v585_v17 = vld [vmem:[%s9415_s25 + $0xa88] sm:$0xff]  ;;  %v8432_v42 = vcombine.low %v721_v11, %v725_v10 }
 0x1c2   : > { %6916 = vmatprep.subr.bf16.mxu0 %v8337_v35  ;;  %v589_v21 = vld [vmem:[%s9415_s25 + $0xaa8] sm:$0xff] }
 0x1c3   : > { %6956 = vmatpush1.bf16.msra.mxu1 %v8344_v33  ;;  %v713_v23 = vld [vmem:[%s9415_s25 + $0xe88] sm:$0xff]  ;;  %v8297_v26 = vcombine.high %v585_v17, %v589_v21 }
 0x1c4   : > { %6957 = vmatprep.subr.bf16.mxu1 %v8465_v28  ;;  %v717_v53 = vld [vmem:[%s9415_s25 + $0xea8] sm:$0xff]  ;;  %v8296_v28 = vcombine.low %v585_v17, %v589_v21 }
 0x1c5   : > { %6917 = vmatpush2.bf16.msra.mxu0 %v8336_v44  ;;  %v8425_v54 = vcombine.high %v713_v23, %v717_v53  ;;  %v577_v30 = vld [vmem:[%s9415_s25 + $0xa48] sm:$0xff]  ;;  %v8424_v37 = vcombine.low %v713_v23, %v717_v53 }
 0x1c6   : > { %6918 = vmatprep.subr.bf16.mxu0 %v8329_v45  ;;  %v581_v31 = vld [vmem:[%s9415_s25 + $0xa68] sm:$0xff] }
 0x1c7   : > { %6958 = vmatpush2.bf16.msra.mxu1 %v8464_v19  ;;  %v705_v33 = vld [vmem:[%s9415_s25 + $0xe48] sm:$0xff]  ;;  %v8289_v38 = vcombine.high %v577_v30, %v581_v31 }
 0x1c8   : > { %6959 = vmatprep.subr.bf16.mxu1 %v8457_v46  ;;  %v709_v35 = vld [vmem:[%s9415_s25 + $0xe68] sm:$0xff]  ;;  %v8288_v46 = vcombine.low %v577_v30, %v581_v31 }
 0x1c9   : > { %6919 = vmatpush2.bf16.msra.mxu0 %v8328_v52  ;;  %v8417_v41 = vcombine.high %v705_v33, %v709_v35  ;;  %v569_v43 = vld [vmem:[%s9415_s25 + $0xa08] sm:$0xff]  ;;  %v8416_v22 = vcombine.low %v705_v33, %v709_v35 }
 0x1ca   : > { %6920 = vmatprep.subr.bf16.mxu0 %v8321_v57  ;;  %v573_v44 = vld [vmem:[%s9415_s25 + $0xa28] sm:$0xff] }
 0x1cb   : > { %6960 = vmatpush2.bf16.msra.mxu1 %v8456_v56  ;;  %v697_v19 = vld [vmem:[%s9415_s25 + $0xe08] sm:$0xff]  ;;  %v8281_v48 = vcombine.high %v569_v43, %v573_v44 }
 0x1cc   : > { %6961 = vmatprep.subr.bf16.mxu1 %v8449_v60  ;;  %v701_v45 = vld [vmem:[%s9415_s25 + $0xe28] sm:$0xff]  ;;  %v8280_v60 = vcombine.low %v569_v43, %v573_v44 }
 0x1cd   : > { %6921 = vmatpush2.bf16.msra.mxu0 %v8320_v2  ;;  %v8409_v50 = vcombine.high %v697_v19, %v701_v45  ;;  %v817_v51 = vld [vmem:[%s9415_s25 + $0x11c8] sm:$0xff]  ;;  %v8408_v62 = vcombine.low %v697_v19, %v701_v45 }
 0x1ce   : > { %6922 = vmatprep.subr.bf16.mxu0 %v8313_v3  ;;  %v821_v52 = vld [vmem:[%s9415_s25 + $0x11e8] sm:$0xff] }
 0x1cf   : > { %6962 = vmatpush2.bf16.msra.mxu1 %v8448_v7  ;;  %v945_v56 = vld [vmem:[%s9415_s25 + $0x15c8] sm:$0xff]  ;;  %v8529_v63 = vcombine.high %v817_v51, %v821_v52 }
 0x1d0   : > { %6963 = vmatprep.subr.bf16.mxu1 %v8441_v5  ;;  %v949_v57 = vld [vmem:[%s9415_s25 + $0x15e8] sm:$0xff]  ;;  %v8528_v5 = vcombine.low %v817_v51, %v821_v52 }
 0x1d1   : > { %6923 = vmatpush2.bf16.msra.mxu0 %v8312_v12  ;;  %v8657_v0 = vcombine.high %v945_v56, %v949_v57  ;;  %v809_v1 = vld [vmem:[%s9415_s25 + $0x1188] sm:$0xff]  ;;  %v8656_v6 = vcombine.low %v945_v56, %v949_v57 }
 0x1d2   : > { %6924 = vmatprep.subr.bf16.mxu0 %v8305_v13  ;;  %v813_v2 = vld [vmem:[%s9415_s25 + $0x11a8] sm:$0xff] }
 0x1d3   : > { %6964 = vmatpush2.bf16.msra.mxu1 %v8440_v39  ;;  %v937_v7 = vld [vmem:[%s9415_s25 + $0x1588] sm:$0xff]  ;;  %v8521_v9 = vcombine.high %v809_v1, %v813_v2  ;;  %v8520_v21 = vcombine.low %v809_v1, %v813_v2 }
 0x1d4   : > { %6965 = vmatprep.subr.bf16.mxu1 %v8433_v14  ;;  %v941_v3 = vld [vmem:[%s9415_s25 + $0x15a8] sm:$0xff] }
 0x1d5   : > { %6925 = vmatpush2.bf16.msra.mxu0 %v8304_v25  ;;  %v8649_v11 = vcombine.high %v937_v7, %v941_v3  ;;  %v801_v10 = vld [vmem:[%s9415_s25 + $0x1148] sm:$0xff]  ;;  %v8648_v53 = vcombine.low %v937_v7, %v941_v3 }
 0x1d6   : > { %6926 = vmatprep.subr.bf16.mxu0 %v8297_v26  ;;  %v805_v12 = vld [vmem:[%s9415_s25 + $0x1168] sm:$0xff] }
 0x1d7   : > { %6966 = vmatpush2.bf16.msra.mxu1 %v8432_v42  ;;  %v929_v13 = vld [vmem:[%s9415_s25 + $0x1548] sm:$0xff]  ;;  %v8513_v25 = vcombine.high %v801_v10, %v805_v12 }
 0x1d8   : > { %6967 = vmatprep.subr.bf16.mxu1 %v8425_v54  ;;  %v933_v14 = vld [vmem:[%s9415_s25 + $0x1568] sm:$0xff] }
 0x1d9   : > { %6927 = vmatpush2.bf16.msra.mxu0 %v8296_v28  ;;  %v8641_v26 = vcombine.high %v929_v13, %v933_v14  ;;  %v793_v54 = vld [vmem:[%s9415_s25 + $0x1108] sm:$0xff] }
 0x1da   : > { %6928 = vmatprep.subr.bf16.mxu0 %v8289_v38  ;;  %v797_v30 = vld [vmem:[%s9415_s25 + $0x1128] sm:$0xff] }
 0x1db   : > { %6968 = vmatpush2.bf16.msra.mxu1 %v8424_v37  ;;  %v921_v33 = vld [vmem:[%s9415_s25 + $0x1508] sm:$0xff]  ;;  %v8512_v37 = vcombine.low %v801_v10, %v805_v12  ;;  %v8505_v43 = vcombine.high %v793_v54, %v797_v30 }
 0x1dc   : > { %6969 = vmatprep.subr.bf16.mxu1 %v8417_v41  ;;  %v925_v35 = vld [vmem:[%s9415_s25 + $0x1528] sm:$0xff]  ;;  %v8640_v41 = vcombine.low %v929_v13, %v933_v14 }
 0x1dd   : > { %6929 = vmatpush2.bf16.msra.mxu0 %v8288_v46  ;;  %v8633_v19 = vcombine.high %v921_v33, %v925_v35  ;;  %v785_v45 = vld [vmem:[%s9415_s25 + $0x10c8] sm:$0xff]  ;;  %v8632_v51 = vcombine.low %v921_v33, %v925_v35 }
 0x1de   : > { %6930 = vmatprep.subr.bf16.mxu0 %v8281_v48  ;;  %v789_v46 = vld [vmem:[%s9415_s25 + $0x10e8] sm:$0xff] }
 0x1df   : > { %6970 = vmatpush2.bf16.msra.mxu1 %v8416_v22  ;;  %v913_v22 = vld [vmem:[%s9415_s25 + $0x14c8] sm:$0xff]  ;;  %v8497_v52 = vcombine.high %v785_v45, %v789_v46 }
 0x1e0   : > { %6971 = vmatprep.subr.bf16.mxu1 %v8409_v50  ;;  %v917_v48 = vld [vmem:[%s9415_s25 + $0x14e8] sm:$0xff]  ;;  %v8504_v50 = vcombine.low %v793_v54, %v797_v30 }
 0x1e1   : > { %6931 = vmatpush2.bf16.msra.mxu0 %v8280_v60  ;;  %v8625_v56 = vcombine.high %v913_v22, %v917_v48  ;;  %v777_v57 = vld [vmem:[%s9415_s25 + $0x1088] sm:$0xff]  ;;  %v8624_v1 = vcombine.low %v913_v22, %v917_v48 }
 0x1e2   : > { %6982 = vmatprep.subr.bf16.mxu0 %v8529_v63  ;;  %v781_v60 = vld [vmem:[%s9415_s25 + $0x10a8] sm:$0xff] }
 0x1e3   : > { %6972 = vmatpush2.bf16.msra.mxu1 %v8408_v62  ;;  %v905_v62 = vld [vmem:[%s9415_s25 + $0x1488] sm:$0xff]  ;;  %v8489_v2 = vcombine.high %v777_v57, %v781_v60 }
 0x1e4   : > { %7023 = vmatprep.subr.bf16.mxu1 %v8657_v0  ;;  %v9935_v39 = vpop.f32.mrf.mxu0  ;;  %6933 = vmatmul.mubr.bf16.vlgmr.msra.gmra.mxu0 %v9595_v36  ;;  %v909_v63 = vld [vmem:[%s9415_s25 + $0x14a8] sm:$0xff]  ;;  %v8496_v0 = vcombine.low %v785_v45, %v789_v46 }
 0x1e5   : > { %6983 = vmatpush1.bf16.msra.mxu0 %v8528_v5  ;;  %7014 = vmatprep.mubr.bf16.mxu0 %v9611_v47  ;;  %v8617_v7 = vcombine.high %v905_v62, %v909_v63  ;;  %v769_v3 = vld [vmem:[%s9415_s25 + $0x1048] sm:$0xff]  ;;  %v8616_v10 = vcombine.low %v905_v62, %v909_v63 }
 0x1e6   : > { %v9940_v17 = vpop.f32.mrf.mxu1  ;;  %6974 = vmatmul.mubr.bf16.vlgmr.msra.gmra.mxu1 %v9603_v40  ;;  %v9943_v23 = vpop.f32.mrf.mxu0  ;;  %6984 = vmatprep.subr.bf16.mxu0 %v8521_v9  ;;  %v773_v5 = vld [vmem:[%s9415_s25 + $0x1068] sm:$0xff] }
 0x1e7   : > { %7024 = vmatpush1.bf16.msra.mxu1 %v8656_v6  ;;  %7055 = vmatprep.mubr.bf16.mxu1 %v9618_v49  ;;  %v897_v6 = vld [vmem:[%s9415_s25 + $0x1448] sm:$0xff]  ;;  %v8481_v12 = vcombine.high %v769_v3, %v773_v5 }
 0x1e8   : > { %v9945_v42 = vpop.f32.mrf.mxu1  ;;  %7025 = vmatprep.subr.bf16.mxu1 %v8649_v11  ;;  %v6692_v31 = vpop.f32.mrf.mxu0  ;;  %v901_v9 = vld [vmem:[%s9415_s25 + $0x1468] sm:$0xff]  ;;  %v8488_v11 = vcombine.low %v777_v57, %v781_v60 }
 0x1e9   : > { %6985 = vmatpush1.bf16.msra.mxu0 %v8520_v21  ;;  %v8609_v13 = vcombine.high %v897_v6, %v901_v9  ;;  %v761_v14 = vld [vmem:[%s9415_s25 + $0x1008] sm:$0xff]  ;;  %v8608_v54 = vcombine.low %v897_v6, %v901_v9 }
 0x1ea   : > { %v6733_v28 = vpop.f32.mrf.mxu1  ;;  %v6693_v38 = vpop.f32.mrf.mxu0  ;;  %6986 = vmatprep.subr.bf16.mxu0 %v8513_v25  ;;  %v765_v21 = vld [vmem:[%s9415_s25 + $0x1028] sm:$0xff] }
 0x1eb   : > { %7026 = vmatpush1.bf16.msra.mxu1 %v8648_v53  ;;  %v889_v53 = vld [vmem:[%s9415_s25 + $0x1408] sm:$0xff]  ;;  %v8473_v30 = vcombine.high %v761_v14, %v765_v21  ;;  %v8472_v38 = vcombine.low %v761_v14, %v765_v21 }
 0x1ec   : > { %v6734_v44 = vpop.f32.mrf.mxu1  ;;  %7027 = vmatprep.subr.bf16.mxu1 %v8641_v26  ;;  %v893_v25 = vld [vmem:[%s9415_s25 + $0x1428] sm:$0xff]  ;;  %v8480_v26 = vcombine.low %v769_v3, %v773_v5 }
 0x1ed   : > { %6987 = vmatpush1.bf16.msra.mxu0 %v8512_v37  ;;  %v8601_v31 = vcombine.high %v889_v53, %v893_v25  ;;  %v881_v33 = vld [vmem:[%s9415_s25 + $0x13c8] sm:$0xff] }
 0x1ee   : > { %6988 = vmatprep.subr.bf16.mxu0 %v8505_v43  ;;  %v885_v35 = vld [vmem:[%s9415_s25 + $0x13e8] sm:$0xff] }
 0x1ef   : > { %7028 = vmatpush1.bf16.msra.mxu1 %v8640_v41  ;;  %v1009_v28 = vld [vmem:[%s9415_s25 + $0x17c8] sm:$0xff]  ;;  %v8600_v41 = vcombine.low %v889_v53, %v893_v25  ;;  %v8593_v43 = vcombine.high %v881_v33, %v885_v35  ;;  %v8592_v48 = vcombine.low %v881_v33, %v885_v35 }
 0x1f0   : > { %7029 = vmatprep.subr.bf16.mxu1 %v8633_v19  ;;  %v1013_v37 = vld [vmem:[%s9415_s25 + $0x17e8] sm:$0xff] }
 0x1f1   : > { %6989 = vmatpush1.bf16.msra.mxu0 %v8504_v50  ;;  %v8721_v44 = vcombine.high %v1009_v28, %v1013_v37  ;;  %v873_v19 = vld [vmem:[%s9415_s25 + $0x1388] sm:$0xff]  ;;  %v8720_v50 = vcombine.low %v1009_v28, %v1013_v37 }
 0x1f2   : > { %6990 = vmatprep.subr.bf16.mxu0 %v8497_v52  ;;  %v877_v45 = vld [vmem:[%s9415_s25 + $0x13a8] sm:$0xff] }
 0x1f3   : > { %7030 = vmatpush1.bf16.msra.mxu1 %v8632_v51  ;;  %v1001_v46 = vld [vmem:[%s9415_s25 + $0x1788] sm:$0xff]  ;;  %v8585_v51 = vcombine.high %v873_v19, %v877_v45  ;;  %v8584_v63 = vcombine.low %v873_v19, %v877_v45 }
 0x1f4   : > { %7031 = vmatprep.subr.bf16.mxu1 %v8625_v56  ;;  %v1005_v22 = vld [vmem:[%s9415_s25 + $0x17a8] sm:$0xff] }
 0x1f5   : > { %6991 = vmatpush1.bf16.msra.mxu0 %v8496_v0  ;;  %v8713_v52 = vcombine.high %v1001_v46, %v1005_v22  ;;  %v865_v56 = vld [vmem:[%s9415_s25 + $0x1348] sm:$0xff]  ;;  %v8712_v0 = vcombine.low %v1001_v46, %v1005_v22 }
 0x1f6   : > { %6992 = vmatprep.subr.bf16.mxu0 %v8489_v2  ;;  %v869_v57 = vld [vmem:[%s9415_s25 + $0x1368] sm:$0xff] }
 0x1f7   : > { %7032 = vmatpush1.bf16.msra.mxu1 %v8624_v1  ;;  %v993_v60 = vld [vmem:[%s9415_s25 + $0x1748] sm:$0xff]  ;;  %v8577_v1 = vcombine.high %v865_v56, %v869_v57  ;;  %v8576_v9 = vcombine.low %v865_v56, %v869_v57 }
 0x1f8   : > { %7033 = vmatprep.subr.bf16.mxu1 %v8617_v7  ;;  %v997_v62 = vld [vmem:[%s9415_s25 + $0x1768] sm:$0xff] }
 0x1f9   : > { %6993 = vmatpush1.bf16.msra.mxu0 %v8488_v11  ;;  %v8705_v2 = vcombine.high %v993_v60, %v997_v62  ;;  %v857_v7 = vld [vmem:[%s9415_s25 + $0x1308] sm:$0xff]  ;;  %v8704_v11 = vcombine.low %v993_v60, %v997_v62 }
 0x1fa   : > { %6994 = vmatprep.subr.bf16.mxu0 %v8481_v12  ;;  %v861_v3 = vld [vmem:[%s9415_s25 + $0x1328] sm:$0xff] }
 0x1fb   : > { %7034 = vmatpush1.bf16.msra.mxu1 %v8616_v10  ;;  %v985_v5 = vld [vmem:[%s9415_s25 + $0x1708] sm:$0xff]  ;;  %v8569_v10 = vcombine.high %v857_v7, %v861_v3  ;;  %v8568_v25 = vcombine.low %v857_v7, %v861_v3 }
 0x1fc   : > { %7035 = vmatprep.subr.bf16.mxu1 %v8609_v13  ;;  %v989_v6 = vld [vmem:[%s9415_s25 + $0x1728] sm:$0xff] }
 0x1fd   : > { %6995 = vmatpush1.bf16.msra.mxu0 %v8480_v26  ;;  %v8697_v12 = vcombine.high %v985_v5, %v989_v6  ;;  %v849_v13 = vld [vmem:[%s9415_s25 + $0x12c8] sm:$0xff]  ;;  %v8696_v26 = vcombine.low %v985_v5, %v989_v6 }
 0x1fe   : > { %6996 = vmatprep.subr.bf16.mxu0 %v8473_v30  ;;  %v853_v14 = vld [vmem:[%s9415_s25 + $0x12e8] sm:$0xff] }
 0x1ff   : > { %7036 = vmatpush1.bf16.msra.mxu1 %v8608_v54  ;;  %v977_v21 = vld [vmem:[%s9415_s25 + $0x16c8] sm:$0xff]  ;;  %v8561_v54 = vcombine.high %v849_v13, %v853_v14  ;;  %v8560_v37 = vcombine.low %v849_v13, %v853_v14 }
 0x200   : > { %7037 = vmatprep.subr.bf16.mxu1 %v8601_v31  ;;  %v981_v53 = vld [vmem:[%s9415_s25 + $0x16e8] sm:$0xff] }
 0x201   : > { %6997 = vmatpush1.bf16.msra.mxu0 %v8472_v38  ;;  %v8689_v30 = vcombine.high %v977_v21, %v981_v53  ;;  %v841_v31 = vld [vmem:[%s9415_s25 + $0x1288] sm:$0xff]  ;;  %v8688_v38 = vcombine.low %v977_v21, %v981_v53 }
 0x202   : > { %6998 = vmatprep.subr.bf16.mxu0 %v8593_v43  ;;  %v845_v33 = vld [vmem:[%s9415_s25 + $0x12a8] sm:$0xff] }
 0x203   : > { %7038 = vmatpush1.bf16.msra.mxu1 %v8600_v41  ;;  %v969_v35 = vld [vmem:[%s9415_s25 + $0x1688] sm:$0xff]  ;;  %v8553_v41 = vcombine.high %v841_v31, %v845_v33  ;;  %v8552_v22 = vcombine.low %v841_v31, %v845_v33 }
 0x204   : > { %7039 = vmatprep.subr.bf16.mxu1 %v8721_v44  ;;  %v973_v28 = vld [vmem:[%s9415_s25 + $0x16a8] sm:$0xff] }
 0x205   : > { %6999 = vmatpush2.bf16.msra.mxu0 %v8592_v48  ;;  %v8681_v43 = vcombine.high %v969_v35, %v973_v28  ;;  %v833_v44 = vld [vmem:[%s9415_s25 + $0x1248] sm:$0xff]  ;;  %v8680_v48 = vcombine.low %v969_v35, %v973_v28 }
 0x206   : > { %7000 = vmatprep.subr.bf16.mxu0 %v8585_v51  ;;  %v837_v19 = vld [vmem:[%s9415_s25 + $0x1268] sm:$0xff] }
 0x207   : > { %7040 = vmatpush2.bf16.msra.mxu1 %v8720_v50  ;;  %v961_v45 = vld [vmem:[%s9415_s25 + $0x1648] sm:$0xff]  ;;  %v8545_v50 = vcombine.high %v833_v44, %v837_v19  ;;  %v8544_v62 = vcombine.low %v833_v44, %v837_v19 }
 0x208   : > { %7041 = vmatprep.subr.bf16.mxu1 %v8713_v52  ;;  %v965_v46 = vld [vmem:[%s9415_s25 + $0x1668] sm:$0xff] }
 0x209   : > { %7001 = vmatpush2.bf16.msra.mxu0 %v8584_v63  ;;  %v8673_v51 = vcombine.high %v961_v45, %v965_v46  ;;  %v825_v52 = vld [vmem:[%s9415_s25 + $0x1208] sm:$0xff]  ;;  %v8672_v63 = vcombine.low %v961_v45, %v965_v46 }
 0x20a   : > { %7002 = vmatprep.subr.bf16.mxu0 %v8577_v1  ;;  %v829_v56 = vld [vmem:[%s9415_s25 + $0x1228] sm:$0xff] }
 0x20b   : > { %7042 = vmatpush2.bf16.msra.mxu1 %v8712_v0  ;;  %v953_v57 = vld [vmem:[%s9415_s25 + $0x1608] sm:$0xff]  ;;  %v8537_v0 = vcombine.high %v825_v52, %v829_v56  ;;  %v8536_v6 = vcombine.low %v825_v52, %v829_v56 }
 0x20c   : > { %7043 = vmatprep.subr.bf16.mxu1 %v8705_v2  ;;  %v957_v60 = vld [vmem:[%s9415_s25 + $0x1628] sm:$0xff] }
 0x20d   : > { %7003 = vmatpush2.bf16.msra.mxu0 %v8576_v9  ;;  %v8665_v1 = vcombine.high %v953_v57, %v957_v60  ;;  %v1073_v2 = vld [vmem:[%s9415_s25 + $0x19c8] sm:$0xff]  ;;  %v8664_v9 = vcombine.low %v953_v57, %v957_v60 }
 0x20e   : > { %7004 = vmatprep.subr.bf16.mxu0 %v8569_v10  ;;  %v1077_v7 = vld [vmem:[%s9415_s25 + $0x19e8] sm:$0xff]  ;;  %v6689_v10 = vadd.f32 %v9935_v39, %v9866_v24 }
 0x20f   : > { %7044 = vmatpush2.bf16.msra.mxu1 %v8704_v11  ;;  %v1201_v3 = vld [vmem:[%s9415_s25 + $0x1dc8] sm:$0xff]  ;;  %v8785_v11 = vcombine.high %v1073_v2, %v1077_v7 }
 0x210   : > { %7045 = vmatprep.subr.bf16.mxu1 %v8697_v12  ;;  %v1205_v5 = vld [vmem:[%s9415_s25 + $0x1de8] sm:$0xff]  ;;  %v6730_v24 = vadd.f32 %v9940_v17, %v6689_v10 }
 0x211   : > { %7005 = vmatpush2.bf16.msra.mxu0 %v8568_v25  ;;  %v8913_v12 = vcombine.high %v1201_v3, %v1205_v5  ;;  %v1065_v13 = vld [vmem:[%s9415_s25 + $0x1988] sm:$0xff]  ;;  %v6691_v25 = vadd.f32 %v9943_v23, %v9875_v34 }
 0x212   : > { %7006 = vmatprep.subr.bf16.mxu0 %v8561_v54  ;;  %v1069_v14 = vld [vmem:[%s9415_s25 + $0x19a8] sm:$0xff]  ;;  %v8912_v54 = vcombine.low %v1201_v3, %v1205_v5 }
 0x213   : > { %7046 = vmatpush2.bf16.msra.mxu1 %v8696_v26  ;;  %v1193_v21 = vld [vmem:[%s9415_s25 + $0x1d88] sm:$0xff]  ;;  %v8784_v26 = vcombine.low %v1073_v2, %v1077_v7  ;;  %v6732_v34 = vadd.f32 %v9945_v42, %v6691_v25  ;;  %v8776_v17 = vcombine.low %v1065_v13, %v1069_v14 }
 0x214   : > { %7047 = vmatprep.subr.bf16.mxu1 %v8689_v30  ;;  %v1197_v53 = vld [vmem:[%s9415_s25 + $0x1da8] sm:$0xff]  ;;  %v8777_v30 = vcombine.high %v1065_v13, %v1069_v14 }
 0x215   : > { %7007 = vmatpush2.bf16.msra.mxu0 %v8560_v37  ;;  %v8905_v39 = vcombine.high %v1193_v21, %v1197_v53  ;;  %v1057_v31 = vld [vmem:[%s9415_s25 + $0x1948] sm:$0xff] }
 0x216   : > { %7008 = vmatprep.subr.bf16.mxu0 %v8553_v41  ;;  %v1061_v33 = vld [vmem:[%s9415_s25 + $0x1968] sm:$0xff] }
 0x217   : > { %7048 = vmatpush2.bf16.msra.mxu1 %v8688_v38  ;;  %v1185_v28 = vld [vmem:[%s9415_s25 + $0x1d48] sm:$0xff]  ;;  %v8769_v44 = vcombine.high %v1057_v31, %v1061_v33  ;;  %v8768_v60 = vcombine.low %v1057_v31, %v1061_v33 }
 0x218   : > { %7049 = vmatprep.subr.bf16.mxu1 %v8681_v43  ;;  %v1189_v37 = vld [vmem:[%s9415_s25 + $0x1d68] sm:$0xff]  ;;  %v8904_v43 = vcombine.low %v1193_v21, %v1197_v53 }
 0x219   : > { %7009 = vmatpush2.bf16.msra.mxu0 %v8552_v22  ;;  %v8897_v42 = vcombine.high %v1185_v28, %v1189_v37  ;;  %v1049_v22 = vld [vmem:[%s9415_s25 + $0x1908] sm:$0xff] }
 0x21a   : > { %7010 = vmatprep.subr.bf16.mxu0 %v8545_v50  ;;  %v1181_v52 = vld [vmem:[%s9415_s25 + $0x1d28] sm:$0xff] }
 0x21b   : > { %7050 = vmatpush2.bf16.msra.mxu1 %v8680_v48  ;;  %v1053_v48 = vld [vmem:[%s9415_s25 + $0x1928] sm:$0xff] }
 0x21c   : > { %7051 = vmatprep.subr.bf16.mxu1 %v8673_v51  ;;  %v1177_v51 = vld [vmem:[%s9415_s25 + $0x1d08] sm:$0xff] }
 0x21d   : > { %7011 = vmatpush2.bf16.msra.mxu0 %v8544_v62  ;;  %v8889_v2 = vcombine.high %v1177_v51, %v1181_v52  ;;  %v1041_v7 = vld [vmem:[%s9415_s25 + $0x18c8] sm:$0xff] }
 0x21e   : > { %7012 = vmatprep.subr.bf16.mxu0 %v8537_v0  ;;  %v8761_v0 = vcombine.high %v1049_v22, %v1053_v48  ;;  %v1045_v3 = vld [vmem:[%s9415_s25 + $0x18e8] sm:$0xff] }
 0x21f   : > { %7052 = vmatpush2.bf16.msra.mxu1 %v8672_v63  ;;  %v8896_v63 = vcombine.low %v1185_v28, %v1189_v37  ;;  %v1169_v5 = vld [vmem:[%s9415_s25 + $0x1cc8] sm:$0xff]  ;;  %v8753_v10 = vcombine.high %v1041_v7, %v1045_v3  ;;  %v8752_v25 = vcombine.low %v1041_v7, %v1045_v3 }
 0x220   : > { %7053 = vmatprep.subr.bf16.mxu1 %v8665_v1  ;;  %v1033_v13 = vld [vmem:[%s9415_s25 + $0x1888] sm:$0xff] }
 0x221   : > { %7013 = vmatpush2.bf16.msra.mxu0 %v8536_v6  ;;  %v1173_v6 = vld [vmem:[%s9415_s25 + $0x1ce8] sm:$0xff] }
 0x222   : > { %7064 = vmatprep.subr.bf16.mxu0 %v8785_v11  ;;  %v8888_v11 = vcombine.low %v1177_v51, %v1181_v52  ;;  %v1037_v14 = vld [vmem:[%s9415_s25 + $0x18a8] sm:$0xff] }
 0x223   : > { %7054 = vmatpush2.bf16.msra.mxu1 %v8664_v9  ;;  %v8760_v9 = vcombine.low %v1049_v22, %v1053_v48  ;;  %v1161_v21 = vld [vmem:[%s9415_s25 + $0x1c88] sm:$0xff] }
 0x224   : > { %7105 = vmatprep.subr.bf16.mxu1 %v8913_v12  ;;  %v6770_v35 = vpop.f32.mrf.mxu0  ;;  %7015 = vmatmul.mubr.bf16.vlgmr.msra.gmra.mxu0 %v9683_v4  ;;  %v8881_v12 = vcombine.high %v1169_v5, %v1173_v6  ;;  %v1165_v53 = vld [vmem:[%s9415_s25 + $0x1ca8] sm:$0xff] }
 0x225   : > { %v6771_v23 = vadd.f32 %v6770_v35, %v6730_v24  ;;  %7065 = vmatpush1.bf16.msra.mxu0 %v8784_v26  ;;  %7096 = vmatprep.mubr.bf16.mxu0 %v9699_v15  ;;  %v8880_v26 = vcombine.low %v1169_v5, %v1173_v6  ;;  %v1025_v24 = vld [vmem:[%s9415_s25 + $0x1848] sm:$0xff]  ;;  %v8744_v35 = vcombine.low %v1033_v13, %v1037_v14 }
 0x226   : > { %v6811_v38 = vpop.f32.mrf.mxu1  ;;  %7056 = vmatmul.mubr.bf16.vlgmr.msra.gmra.mxu1 %v9691_v8  ;;  %v6772_v41 = vpop.f32.mrf.mxu0  ;;  %7066 = vmatprep.subr.bf16.mxu0 %v8777_v30  ;;  %v8873_v30 = vcombine.high %v1161_v21, %v1165_v53  ;;  %v1153_v31 = vld [vmem:[%s9415_s25 + $0x1c48] sm:$0xff]  ;;  %v8872_v28 = vcombine.low %v1161_v21, %v1165_v53 }
 0x227   : > { %7106 = vmatpush1.bf16.msra.mxu1 %v8912_v54  ;;  %v6812_v19 = vadd.f32 %v6811_v38, %v6771_v23  ;;  %v6773_v45 = vadd.f32 %v6772_v41, %v6732_v34  ;;  %7137 = vmatprep.mubr.bf16.mxu1 %v9706_v18  ;;  %v8745_v54 = vcombine.high %v1033_v13, %v1037_v14  ;;  %v1157_v33 = vld [vmem:[%s9415_s25 + $0x1c68] sm:$0xff] }
 0x228   : > { %v6813_v46 = vpop.f32.mrf.mxu1  ;;  %7107 = vmatprep.subr.bf16.mxu1 %v8905_v39  ;;  %v6774_v50 = vpop.f32.mrf.mxu0  ;;  %v1029_v39 = vld [vmem:[%s9415_s25 + $0x1868] sm:$0xff]  ;;  %v8865_v34 = vcombine.high %v1153_v31, %v1157_v33 }
 0x229   : > { %7802 = vst [vmem:[%s10030_s10] sm:$0xff] %v6812_v19  ;;  %v6814_v56 = vadd.f32 %v6813_v46, %v6773_v45  ;;  %7067 = vmatpush1.bf16.msra.mxu0 %v8776_v17  ;;  %v8737_v37 = vcombine.high %v1025_v24, %v1029_v39  ;;  %v1017_v23 = vld [vmem:[%s9415_s25 + $0x1808] sm:$0xff] }
 0x22a   : > { %v6815_v57 = vpop.f32.mrf.mxu1  ;;  %v6775_v62 = vpop.f32.mrf.mxu0  ;;  %7068 = vmatprep.subr.bf16.mxu0 %v8769_v44  ;;  %v1021_v38 = vld [vmem:[%s9415_s25 + $0x1828] sm:$0xff]  ;;  %v8864_v44 = vcombine.low %v1153_v31, %v1157_v33 }
 0x22b   : > { %7108 = vmatpush1.bf16.msra.mxu1 %v8904_v43  ;;  %7803 = vst [vmem:[%s10030_s10 + $0x8] sm:$0xff] %v6814_v56  ;;  %v1145_v17 = vld [vmem:[%s9415_s25 + $0x1c08] sm:$0xff]  ;;  %v8736_v43 = vcombine.low %v1025_v24, %v1029_v39  ;;  %v8729_v19 = vcombine.high %v1017_v23, %v1021_v38  ;;  %v8728_v50 = vcombine.low %v1017_v23, %v1021_v38 }
 0x22c   : > { %v6816_v1 = vpop.f32.mrf.mxu1  ;;  %7109 = vmatprep.subr.bf16.mxu1 %v8897_v42  ;;  %v1149_v41 = vld [vmem:[%s9415_s25 + $0x1c28] sm:$0xff] }
 0x22d   : > { %7069 = vmatpush1.bf16.msra.mxu0 %v8768_v60  ;;  %v8857_v45 = vcombine.high %v1145_v17, %v1149_v41  ;;  %v1137_v46 = vld [vmem:[%s9415_s25 + $0x1bc8] sm:$0xff]  ;;  %v8856_v51 = vcombine.low %v1145_v17, %v1149_v41 }
 0x22e   : > { %7070 = vmatprep.subr.bf16.mxu0 %v8761_v0  ;;  %v1141_v42 = vld [vmem:[%s9415_s25 + $0x1be8] sm:$0xff] }
 0x22f   : > { %7110 = vmatpush1.bf16.msra.mxu1 %v8896_v63  ;;  %v1265_v22 = vld [vmem:[%s9415_s25 + $0x1fc8] sm:$0xff]  ;;  %v8849_v52 = vcombine.high %v1137_v46, %v1141_v42  ;;  %v8848_v0 = vcombine.low %v1137_v46, %v1141_v42 }
 0x230   : > { %7111 = vmatprep.subr.bf16.mxu1 %v8889_v2  ;;  %v1269_v48 = vld [vmem:[%s9415_s25 + $0x1fe8] sm:$0xff] }
 0x231   : > { %7071 = vmatpush1.bf16.msra.mxu0 %v8760_v9  ;;  %v8977_v56 = vcombine.high %v1265_v22, %v1269_v48  ;;  %v1129_v57 = vld [vmem:[%s9415_s25 + $0x1b88] sm:$0xff]  ;;  %v8976_v1 = vcombine.low %v1265_v22, %v1269_v48 }
 0x232   : > { %7072 = vmatprep.subr.bf16.mxu0 %v8753_v10  ;;  %v1133_v60 = vld [vmem:[%s9415_s25 + $0x1ba8] sm:$0xff] }
 0x233   : > { %7112 = vmatpush1.bf16.msra.mxu1 %v8888_v11  ;;  %v1257_v62 = vld [vmem:[%s9415_s25 + $0x1f88] sm:$0xff]  ;;  %v8841_v2 = vcombine.high %v1129_v57, %v1133_v60  ;;  %v8840_v11 = vcombine.low %v1129_v57, %v1133_v60 }
 0x234   : > { %7113 = vmatprep.subr.bf16.mxu1 %v8881_v12  ;;  %v1261_v63 = vld [vmem:[%s9415_s25 + $0x1fa8] sm:$0xff] }
 0x235   : > { %7073 = vmatpush1.bf16.msra.mxu0 %v8752_v25  ;;  %v8969_v7 = vcombine.high %v1257_v62, %v1261_v63  ;;  %v1121_v3 = vld [vmem:[%s9415_s25 + $0x1b48] sm:$0xff]  ;;  %v8968_v10 = vcombine.low %v1257_v62, %v1261_v63 }
 0x236   : > { %7074 = vmatprep.subr.bf16.mxu0 %v8745_v54  ;;  %v1125_v5 = vld [vmem:[%s9415_s25 + $0x1b68] sm:$0xff] }
 0x237   : > { %7114 = vmatpush1.bf16.msra.mxu1 %v8880_v26  ;;  %v1249_v6 = vld [vmem:[%s9415_s25 + $0x1f48] sm:$0xff]  ;;  %v8833_v12 = vcombine.high %v1121_v3, %v1125_v5  ;;  %v8832_v26 = vcombine.low %v1121_v3, %v1125_v5  ;;  %v306_v5 = vld [vmem:[%s9415_s25 + $0x1d0] sm:$0xff] }
 0x238   : > { %7115 = vmatprep.subr.bf16.mxu1 %v8873_v30  ;;  %v1253_v9 = vld [vmem:[%s9415_s25 + $0x1f68] sm:$0xff] }
 0x239   : > { %7075 = vmatpush1.bf16.msra.mxu0 %v8744_v35  ;;  %v8961_v13 = vcombine.high %v1249_v6, %v1253_v9  ;;  %v1113_v14 = vld [vmem:[%s9415_s25 + $0x1b08] sm:$0xff]  ;;  %v8960_v54 = vcombine.low %v1249_v6, %v1253_v9  ;;  %v310_v6 = vld [vmem:[%s9415_s25 + $0x1f0] sm:$0xff] }
 0x23a   : > { %7076 = vmatprep.subr.bf16.mxu0 %v8737_v37  ;;  %v1117_v21 = vld [vmem:[%s9415_s25 + $0x1b28] sm:$0xff]  ;;  %v434_v9 = vld [vmem:[%s9415_s25 + $0x5d0] sm:$0xff] }
 0x23b   : > { %7116 = vmatpush1.bf16.msra.mxu1 %v8872_v28  ;;  %v1241_v53 = vld [vmem:[%s9415_s25 + $0x1f08] sm:$0xff]  ;;  %v8825_v30 = vcombine.high %v1113_v14, %v1117_v21  ;;  %v8824_v28 = vcombine.low %v1113_v14, %v1117_v21  ;;  %v8019_v14 = vcombine.high %v306_v5, %v310_v6 }
 0x23c   : > { %7117 = vmatprep.subr.bf16.mxu1 %v8865_v34  ;;  %v1245_v25 = vld [vmem:[%s9415_s25 + $0x1f28] sm:$0xff] }
 0x23d   : > { %7077 = vmatpush1.bf16.msra.mxu0 %v8736_v43  ;;  %v8953_v24 = vcombine.high %v1241_v53, %v1245_v25  ;;  %v1105_v39 = vld [vmem:[%s9415_s25 + $0x1ac8] sm:$0xff]  ;;  %v8952_v37 = vcombine.low %v1241_v53, %v1245_v25  ;;  %v1288_v53 = vsub.s32 3, %v9764_v32  ;;  %v298_v25 = vld [vmem:[%s9415_s25 + $0x190] sm:$0xff] }
 0x23e   : > { %7078 = vmatprep.subr.bf16.mxu0 %v8729_v19  ;;  %v1109_v31 = vld [vmem:[%s9415_s25 + $0x1ae8] sm:$0xff] }
 0x23f   : > { %7118 = vmatpush1.bf16.msra.mxu1 %v8864_v44  ;;  %v1233_v33 = vld [vmem:[%s9415_s25 + $0x1ec8] sm:$0xff]  ;;  %v8817_v34 = vcombine.high %v1105_v39, %v1109_v31  ;;  %v8816_v44 = vcombine.low %v1105_v39, %v1109_v31  ;;  %v8018_v31 = vcombine.low %v306_v5, %v310_v6 }
 0x240   : > { %7119 = vmatprep.subr.bf16.mxu1 %v8857_v45  ;;  %v1237_v35 = vld [vmem:[%s9415_s25 + $0x1ee8] sm:$0xff] }
 0x241   : > { %7079 = vmatpush1.bf16.msra.mxu0 %v8728_v50  ;;  %v8945_v23 = vcombine.high %v1233_v33, %v1237_v35  ;;  %v1097_v38 = vld [vmem:[%s9415_s25 + $0x1a88] sm:$0xff]  ;;  %v8944_v19 = vcombine.low %v1233_v33, %v1237_v35 }
 0x242   : > { %7080 = vmatprep.subr.bf16.mxu0 %v8849_v52  ;;  %v1101_v17 = vld [vmem:[%s9415_s25 + $0x1aa8] sm:$0xff] }
 0x243   : > { %7120 = vmatpush1.bf16.msra.mxu1 %v8856_v51  ;;  %v1225_v41 = vld [vmem:[%s9415_s25 + $0x1e88] sm:$0xff]  ;;  %v8809_v45 = vcombine.high %v1097_v38, %v1101_v17  ;;  %v8808_v51 = vcombine.low %v1097_v38, %v1101_v17  ;;  %v418_v17 = vld [vmem:[%s9415_s25 + $0x550] sm:$0xff] }
 0x244   : > { %7121 = vmatprep.subr.bf16.mxu1 %v8977_v56  ;;  %v1229_v43 = vld [vmem:[%s9415_s25 + $0x1ea8] sm:$0xff] }
 0x245   : > { %7081 = vmatpush2.bf16.msra.mxu0 %v8848_v0  ;;  %v8937_v46 = vcombine.high %v1225_v41, %v1229_v43  ;;  %v1089_v42 = vld [vmem:[%s9415_s25 + $0x1a48] sm:$0xff]  ;;  %v8936_v52 = vcombine.low %v1225_v41, %v1229_v43  ;;  %v422_v41 = vld [vmem:[%s9415_s25 + $0x570] sm:$0xff] }
 0x246   : > { %7082 = vmatprep.subr.bf16.mxu0 %v8841_v2  ;;  %v1093_v22 = vld [vmem:[%s9415_s25 + $0x1a68] sm:$0xff] }
 0x247   : > { %7122 = vmatpush2.bf16.msra.mxu1 %v8976_v1  ;;  %v1217_v48 = vld [vmem:[%s9415_s25 + $0x1e48] sm:$0xff]  ;;  %v8801_v56 = vcombine.high %v1089_v42, %v1093_v22  ;;  %v8800_v1 = vcombine.low %v1089_v42, %v1093_v22 }
 0x248   : > { %7123 = vmatprep.subr.bf16.mxu1 %v8969_v7  ;;  %v1221_v50 = vld [vmem:[%s9415_s25 + $0x1e68] sm:$0xff] }
 0x249   : > { %7083 = vmatpush2.bf16.msra.mxu0 %v8840_v11  ;;  %v8929_v57 = vcombine.high %v1217_v48, %v1221_v50  ;;  %v1081_v60 = vld [vmem:[%s9415_s25 + $0x1a08] sm:$0xff]  ;;  %v8928_v2 = vcombine.low %v1217_v48, %v1221_v50  ;;  %v438_v11 = vld [vmem:[%s9415_s25 + $0x5f0] sm:$0xff] }
 0x24a   : > { %7084 = vmatprep.subr.bf16.mxu0 %v8833_v12  ;;  %v1085_v62 = vld [vmem:[%s9415_s25 + $0x1a28] sm:$0xff]  ;;  %v1284_v12 = vsub.s32 2, %v9764_v32  ;;  %v8147_v21 = vcombine.high %v434_v9, %v438_v11  ;;  %v8146_v33 = vcombine.low %v434_v9, %v438_v11  ;;  %v274_v9 = vld [vmem:[%s9415_s25 + $0xd0] sm:$0xff] }
 0x24b   : > { %7124 = vmatpush2.bf16.msra.mxu1 %v8968_v10  ;;  %v1209_v63 = vld [vmem:[%s9415_s25 + $0x1e08] sm:$0xff]  ;;  %v8793_v7 = vcombine.high %v1081_v60, %v1085_v62  ;;  %v8792_v10 = vcombine.low %v1081_v60, %v1085_v62  ;;  %v410_v60 = vld [vmem:[%s9415_s25 + $0x510] sm:$0xff] }
 0x24c   : > { %7125 = vmatprep.subr.bf16.mxu1 %v8961_v13  ;;  %v1213_v0 = vld [vmem:[%s9415_s25 + $0x1e28] sm:$0xff]  ;;  %v414_v62 = vld [vmem:[%s9415_s25 + $0x530] sm:$0xff] }
 0x24d   : > { %7085 = vmatpush2.bf16.msra.mxu0 %v8832_v26  ;;  %v8921_v3 = vcombine.high %v1209_v63, %v1213_v0  ;;  %v8920_v13 = vcombine.low %v1209_v63, %v1213_v0  ;;  %v302_v26 = vld [vmem:[%s9415_s25 + $0x1b0] sm:$0xff]  ;;  %v8123_v6 = vcombine.high %v410_v60, %v414_v62 }
 0x24e   : > { %7086 = vmatprep.subr.bf16.mxu0 %v8825_v30  ;;  %v430_v30 = vld [vmem:[%s9415_s25 + $0x5b0] sm:$0xff]  ;;  %v8011_v35 = vcombine.high %v298_v25, %v302_v26 }
 0x24f   : > { %7126 = vmatpush2.bf16.msra.mxu1 %v8960_v54  ;;  %v426_v54 = vld [vmem:[%s9415_s25 + $0x590] sm:$0xff] }
 0x250   : > { %7127 = vmatprep.subr.bf16.mxu1 %v8953_v24  ;;  %v9071_v24 = vld [vmem:[%s9771_s27] sm:$0xff]  ;;  %v278_v11 = vld [vmem:[%s9415_s25 + $0xf0] sm:$0xff] }
 0x251   : > { %7087 = vmatpush2.bf16.msra.mxu0 %v8824_v28  ;;  %v1285_v39 = vrot.slane %v9071_v24, %v1284_v12  ;;  %v1289_v28 = vrot.slane %v9071_v24, %v1288_v53  ;;  %v406_v12 = vld [vmem:[%s9415_s25 + $0x4f0] sm:$0xff]  ;;  %v7986_v24 = vcombine.low %v274_v9, %v278_v11 }
 0x252   : > { %7088 = vmatprep.subr.bf16.mxu0 %v8817_v34  ;;  %v290_v34 = vld [vmem:[%s9415_s25 + $0x150] sm:$0xff] }
 0x253   : > { %7128 = vmatpush2.bf16.msra.mxu1 %v8952_v37  ;;  %v8139_v37 = vcombine.high %v426_v54, %v430_v30 }
 0x254   : > { %7129 = vmatprep.subr.bf16.mxu1 %v8945_v23  ;;  %v294_v23 = vld [vmem:[%s9415_s25 + $0x170] sm:$0xff] }
 0x255   : > { %7089 = vmatpush2.bf16.msra.mxu0 %v8816_v44  ;;  %v8003_v42 = vcombine.high %v290_v34, %v294_v23 }
 0x256   : > { %7090 = vmatprep.subr.bf16.mxu0 %v8809_v45 }
 0x257   : > { %7130 = vmatpush2.bf16.msra.mxu1 %v8944_v19  ;;  %v8010_v19 = vcombine.low %v298_v25, %v302_v26  ;;  %v266_v25 = vld [vmem:[%s9415_s25 + $0x90] sm:$0xff] }
 0x258   : > { %7131 = vmatprep.subr.bf16.mxu1 %v8937_v46  ;;  %v8138_v46 = vcombine.low %v426_v54, %v430_v30  ;;  %v270_v26 = vld [vmem:[%s9415_s25 + $0xb0] sm:$0xff] }
 0x259   : > { %7091 = vmatpush2.bf16.msra.mxu0 %v8808_v51  ;;  %v8131_v51 = vcombine.high %v418_v17, %v422_v41  ;;  %v394_v54 = vld [vmem:[%s9415_s25 + $0x490] sm:$0xff] }
 0x25a   : > { %7092 = vmatprep.subr.bf16.mxu0 %v8801_v56  ;;  %v286_v56 = vld [vmem:[%s9415_s25 + $0x130] sm:$0xff] }
 0x25b   : > { %7132 = vmatpush2.bf16.msra.mxu1 %v8936_v52  ;;  %v282_v52 = vld [vmem:[%s9415_s25 + $0x110] sm:$0xff] }
 0x25c   : > { %7133 = vmatprep.subr.bf16.mxu1 %v8929_v57  ;;  %v398_v30 = vld [vmem:[%s9415_s25 + $0x4b0] sm:$0xff] }
 0x25d   : > { %7093 = vmatpush2.bf16.msra.mxu0 %v8800_v1  ;;  %v8002_v1 = vcombine.low %v290_v34, %v294_v23  ;;  %v390_v34 = vld [vmem:[%s9415_s25 + $0x470] sm:$0xff]  ;;  %v7978_v23 = vcombine.low %v266_v25, %v270_v26 }
 0x25e   : > { %7094 = vmatprep.subr.bf16.mxu0 %v8793_v7  ;;  %v8130_v7 = vcombine.low %v418_v17, %v422_v41 }
 0x25f   : > { %7134 = vmatpush2.bf16.msra.mxu1 %v8928_v2 }
 0x260   : > { %7135 = vmatprep.subr.bf16.mxu1 %v8921_v3  ;;  %v7995_v3 = vcombine.high %v282_v52, %v286_v56 }
 0x261   : > { %7095 = vmatpush2.bf16.msra.mxu0 %v8792_v10  ;;  %v402_v10 = vld [vmem:[%s9415_s25 + $0x4d0] sm:$0xff] }
 0x262   : > { %7146 = vmatprep.subr.bf16.mxu0 %v8019_v14  ;;  %v8122_v14 = vcombine.low %v410_v60, %v414_v62  ;;  %v8115_v53 = vcombine.high %v402_v10, %v406_v12 }
 0x263   : > { %7136 = vmatpush2.bf16.msra.mxu1 %v8920_v13  ;;  %v7994_v13 = vcombine.low %v282_v52, %v286_v56  ;;  %v374_v52 = vld [vmem:[%s9415_s25 + $0x3f0] sm:$0xff] }
 0x264   : > { %7187 = vmatprep.subr.bf16.mxu1 %v8147_v21  ;;  %v6852_v38 = vpop.f32.mrf.mxu0  ;;  %7097 = vmatmul.mubr.bf16.vlgmr.msra.gmra.mxu0 %v9779_v55  ;;  %v7987_v21 = vcombine.high %v274_v9, %v278_v11  ;;  %v498_v56 = vld [vmem:[%s9415_s25 + $0x7d0] sm:$0xff] }
 0x265   : > { %v6853_v43 = vadd.f32 %v6852_v38, %v1285_v39  ;;  %7147 = vmatpush1.bf16.msra.mxu0 %v8018_v31  ;;  %7178 = vmatprep.mubr.bf16.mxu0 %v9457_v58  ;;  %v8114_v39 = vcombine.low %v402_v10, %v406_v12  ;;  %v7979_v31 = vcombine.high %v266_v25, %v270_v26  ;;  %v354_v12 = vld [vmem:[%s9415_s25 + $0x350] sm:$0xff] }
 0x266   : > { %v6893_v44 = vpop.f32.mrf.mxu1  ;;  %7138 = vmatmul.mubr.bf16.vlgmr.msra.gmra.mxu1 %v9785_v61  ;;  %v6854_v45 = vpop.f32.mrf.mxu0  ;;  %7148 = vmatprep.subr.bf16.mxu0 %v8011_v35  ;;  %v258_v35 = vld [vmem:[%s9415_s25 + $0x50] sm:$0xff]  ;;  %v8106_v38 = vcombine.low %v394_v54, %v398_v30 }
 0x267   : > { %7188 = vmatpush1.bf16.msra.mxu1 %v8146_v33  ;;  %v10099_v22 = vadd.f32 %v6893_v44, %v6853_v43  ;;  %v6855_v48 = vadd.f32 %v6854_v45, %v1289_v28  ;;  %7219 = vmatprep.mubr.bf16.mxu1 %v9461_v59  ;;  %v8107_v33 = vcombine.high %v394_v54, %v398_v30  ;;  %v262_v28 = vld [vmem:[%s9415_s25 + $0x70] sm:$0xff] }
 0x268   : > { %v6895_v50 = vpop.f32.mrf.mxu1  ;;  %7189 = vmatprep.subr.bf16.mxu1 %v8139_v37  ;;  %v6856_v57 = vpop.f32.mrf.mxu0  ;;  %v386_v37 = vld [vmem:[%s9415_s25 + $0x450] sm:$0xff]  ;;  %v7971_v17 = vcombine.high %v258_v35, %v262_v28 }
 0x269   : > { %v10107_v63 = vadd.f32 %v6895_v50, %v6855_v48  ;;  %7149 = vmatpush1.bf16.msra.mxu0 %v8010_v19  ;;  %v8099_v41 = vcombine.high %v386_v37, %v390_v34  ;;  %v250_v43 = vld [vmem:[%s9415_s25 + $0x10] sm:$0xff] }
 0x26a   : > { %v6897_v0 = vpop.f32.mrf.mxu1  ;;  %v6857_v2 = vpop.f32.mrf.mxu0  ;;  %7150 = vmatprep.subr.bf16.mxu0 %v8003_v42  ;;  %v254_v44 = vld [vmem:[%s9415_s25 + $0x30] sm:$0xff]  ;;  %v8098_v42 = vcombine.low %v386_v37, %v390_v34 }
 0x26b   : > { %7190 = vmatpush1.bf16.msra.mxu1 %v8138_v46  ;;  %v378_v19 = vld [vmem:[%s9415_s25 + $0x410] sm:$0xff]  ;;  %v7970_v46 = vcombine.low %v258_v35, %v262_v28  ;;  %v7963_v48 = vcombine.high %v250_v43, %v254_v44  ;;  %v7962_v60 = vcombine.low %v250_v43, %v254_v44 }
 0x26c   : > { %v6898_v5 = vpop.f32.mrf.mxu1  ;;  %7191 = vmatprep.subr.bf16.mxu1 %v8131_v51  ;;  %v382_v45 = vld [vmem:[%s9415_s25 + $0x430] sm:$0xff] }
 0x26d   : > { %7151 = vmatpush1.bf16.msra.mxu0 %v8002_v1  ;;  %v8091_v50 = vcombine.high %v378_v19, %v382_v45  ;;  %v370_v51 = vld [vmem:[%s9415_s25 + $0x3d0] sm:$0xff]  ;;  %v8090_v62 = vcombine.low %v378_v19, %v382_v45 }
 0x26e   : > { %7152 = vmatprep.subr.bf16.mxu0 %v7995_v3  ;;  %v502_v57 = vld [vmem:[%s9415_s25 + $0x7f0] sm:$0xff]  ;;  %v8083_v0 = vcombine.high %v370_v51, %v374_v52 }
 0x26f   : > { %7192 = vmatpush1.bf16.msra.mxu1 %v8130_v7  ;;  %v8211_v1 = vcombine.high %v498_v56, %v502_v57  ;;  %v362_v2 = vld [vmem:[%s9415_s25 + $0x390] sm:$0xff]  ;;  %v8210_v9 = vcombine.low %v498_v56, %v502_v57 }
 0x270   : > { %7193 = vmatprep.subr.bf16.mxu1 %v8123_v6  ;;  %v366_v7 = vld [vmem:[%s9415_s25 + $0x3b0] sm:$0xff]  ;;  %v8082_v6 = vcombine.low %v370_v51, %v374_v52 }
 0x271   : > { %7153 = vmatpush1.bf16.msra.mxu0 %v7994_v13  ;;  %v490_v3 = vld [vmem:[%s9415_s25 + $0x790] sm:$0xff]  ;;  %v8075_v11 = vcombine.high %v362_v2, %v366_v7 }
 0x272   : > { %7154 = vmatprep.subr.bf16.mxu0 %v7987_v21  ;;  %v494_v5 = vld [vmem:[%s9415_s25 + $0x7b0] sm:$0xff] }
 0x273   : > { %7194 = vmatpush1.bf16.msra.mxu1 %v8122_v14  ;;  %v8203_v10 = vcombine.high %v490_v3, %v494_v5  ;;  %v358_v13 = vld [vmem:[%s9415_s25 + $0x370] sm:$0xff]  ;;  %v8202_v25 = vcombine.low %v490_v3, %v494_v5 }
 0x274   : > { %7195 = vmatprep.subr.bf16.mxu1 %v8115_v53  ;;  %v482_v14 = vld [vmem:[%s9415_s25 + $0x750] sm:$0xff]  ;;  %v8074_v53 = vcombine.low %v362_v2, %v366_v7  ;;  %v8067_v26 = vcombine.high %v354_v12, %v358_v13 }
 0x275   : > { %7155 = vmatpush1.bf16.msra.mxu0 %v7986_v24  ;;  %v486_v21 = vld [vmem:[%s9415_s25 + $0x770] sm:$0xff] }
 0x276   : > { %7156 = vmatprep.subr.bf16.mxu0 %v7979_v31  ;;  %v8195_v54 = vcombine.high %v482_v14, %v486_v21  ;;  %v346_v30 = vld [vmem:[%s9415_s25 + $0x310] sm:$0xff]  ;;  %v8194_v35 = vcombine.low %v482_v14, %v486_v21 }
 0x277   : > { %7196 = vmatpush1.bf16.msra.mxu1 %v8114_v39  ;;  %v350_v24 = vld [vmem:[%s9415_s25 + $0x330] sm:$0xff] }
 0x278   : > { %7197 = vmatprep.subr.bf16.mxu1 %v8107_v33  ;;  %v474_v39 = vld [vmem:[%s9415_s25 + $0x710] sm:$0xff]  ;;  %v8066_v33 = vcombine.low %v354_v12, %v358_v13  ;;  %v8059_v28 = vcombine.high %v346_v30, %v350_v24 }
 0x279   : > { %7157 = vmatpush1.bf16.msra.mxu0 %v7978_v23  ;;  %v478_v31 = vld [vmem:[%s9415_s25 + $0x730] sm:$0xff] }
 0x27a   : > { %7158 = vmatprep.subr.bf16.mxu0 %v7971_v17  ;;  %v8187_v37 = vcombine.high %v474_v39, %v478_v31  ;;  %v338_v34 = vld [vmem:[%s9415_s25 + $0x2d0] sm:$0xff]  ;;  %v8186_v43 = vcombine.low %v474_v39, %v478_v31 }
 0x27b   : > { %7198 = vmatpush1.bf16.msra.mxu1 %v8106_v38  ;;  %v342_v23 = vld [vmem:[%s9415_s25 + $0x2f0] sm:$0xff] }
 0x27c   : > { %7199 = vmatprep.subr.bf16.mxu1 %v8099_v41  ;;  %v466_v38 = vld [vmem:[%s9415_s25 + $0x6d0] sm:$0xff]  ;;  %v8058_v41 = vcombine.low %v346_v30, %v350_v24  ;;  %v8051_v44 = vcombine.high %v338_v34, %v342_v23 }
 0x27d   : > { %7159 = vmatpush1.bf16.msra.mxu0 %v7970_v46  ;;  %v470_v17 = vld [vmem:[%s9415_s25 + $0x6f0] sm:$0xff] }
 0x27e   : > { %7160 = vmatprep.subr.bf16.mxu0 %v7963_v48  ;;  %v8179_v19 = vcombine.high %v466_v38, %v470_v17  ;;  %v330_v45 = vld [vmem:[%s9415_s25 + $0x290] sm:$0xff]  ;;  %v8178_v51 = vcombine.low %v466_v38, %v470_v17 }
 0x27f   : > { %7200 = vmatpush1.bf16.msra.mxu1 %v8098_v42  ;;  %v334_v46 = vld [vmem:[%s9415_s25 + $0x2b0] sm:$0xff] }
 0x280   : > { %7201 = vmatprep.subr.bf16.mxu1 %v8091_v50  ;;  %v458_v42 = vld [vmem:[%s9415_s25 + $0x690] sm:$0xff]  ;;  %v8050_v50 = vcombine.low %v338_v34, %v342_v23  ;;  %v8043_v52 = vcombine.high %v330_v45, %v334_v46 }
 0x281   : > { %7161 = vmatpush1.bf16.msra.mxu0 %v7962_v60  ;;  %v462_v48 = vld [vmem:[%s9415_s25 + $0x6b0] sm:$0xff] }
 0x282   : > { %7162 = vmatprep.subr.bf16.mxu0 %v8083_v0  ;;  %v8171_v56 = vcombine.high %v458_v42, %v462_v48  ;;  %v322_v57 = vld [vmem:[%s9415_s25 + $0x250] sm:$0xff]  ;;  %v8170_v2 = vcombine.low %v458_v42, %v462_v48 }
 0x283   : > { %7202 = vmatpush1.bf16.msra.mxu1 %v8090_v62  ;;  %v326_v60 = vld [vmem:[%s9415_s25 + $0x270] sm:$0xff] }
 0x284   : > { %7203 = vmatprep.subr.bf16.mxu1 %v8211_v1  ;;  %v450_v62 = vld [vmem:[%s9415_s25 + $0x650] sm:$0xff]  ;;  %v8042_v1 = vcombine.low %v330_v45, %v334_v46  ;;  %v8035_v7 = vcombine.high %v322_v57, %v326_v60 }
 0x285   : > { %7163 = vmatpush2.bf16.msra.mxu0 %v8082_v6  ;;  %v454_v0 = vld [vmem:[%s9415_s25 + $0x670] sm:$0xff] }
 0x286   : > { %7164 = vmatprep.subr.bf16.mxu0 %v8075_v11  ;;  %v8163_v3 = vcombine.high %v450_v62, %v454_v0  ;;  %v314_v5 = vld [vmem:[%s9415_s25 + $0x210] sm:$0xff]  ;;  %v8162_v12 = vcombine.low %v450_v62, %v454_v0 }
 0x287   : > { %7204 = vmatpush2.bf16.msra.mxu1 %v8210_v9  ;;  %v318_v6 = vld [vmem:[%s9415_s25 + $0x230] sm:$0xff] }
 0x288   : > { %7205 = vmatprep.subr.bf16.mxu1 %v8203_v10  ;;  %v442_v9 = vld [vmem:[%s9415_s25 + $0x610] sm:$0xff]  ;;  %v8034_v10 = vcombine.low %v322_v57, %v326_v60  ;;  %v8027_v13 = vcombine.high %v314_v5, %v318_v6 }
 0x289   : > { %7165 = vmatpush2.bf16.msra.mxu0 %v8074_v53  ;;  %v446_v11 = vld [vmem:[%s9415_s25 + $0x630] sm:$0xff] }
 0x28a   : > { %7166 = vmatprep.subr.bf16.mxu0 %v8067_v26  ;;  %v8155_v14 = vcombine.high %v442_v9, %v446_v11  ;;  %v562_v21 = vld [vmem:[%s9415_s25 + $0x9d0] sm:$0xff]  ;;  %v8154_v30 = vcombine.low %v442_v9, %v446_v11 }
 0x28b   : > { %7206 = vmatpush2.bf16.msra.mxu1 %v8202_v25  ;;  %v566_v53 = vld [vmem:[%s9415_s25 + $0x9f0] sm:$0xff] }
 0x28c   : > { %7207 = vmatprep.subr.bf16.mxu1 %v8195_v54  ;;  %v690_v25 = vld [vmem:[%s9415_s25 + $0xdd0] sm:$0xff]  ;;  %v8026_v54 = vcombine.low %v314_v5, %v318_v6  ;;  %v8275_v24 = vcombine.high %v562_v21, %v566_v53 }
 0x28d   : > { %7167 = vmatpush2.bf16.msra.mxu0 %v8066_v33  ;;  %v694_v26 = vld [vmem:[%s9415_s25 + $0xdf0] sm:$0xff] }
 0x28e   : > { %7168 = vmatprep.subr.bf16.mxu0 %v8059_v28  ;;  %v8403_v39 = vcombine.high %v690_v25, %v694_v26  ;;  %v554_v31 = vld [vmem:[%s9415_s25 + $0x990] sm:$0xff]  ;;  %v8402_v34 = vcombine.low %v690_v25, %v694_v26 }
 0x28f   : > { %7208 = vmatpush2.bf16.msra.mxu1 %v8194_v35  ;;  %v558_v33 = vld [vmem:[%s9415_s25 + $0x9b0] sm:$0xff] }
 0x290   : > { %7209 = vmatprep.subr.bf16.mxu1 %v8187_v37  ;;  %v682_v35 = vld [vmem:[%s9415_s25 + $0xd90] sm:$0xff]  ;;  %v8274_v37 = vcombine.low %v562_v21, %v566_v53  ;;  %v8267_v23 = vcombine.high %v554_v31, %v558_v33  ;;  %v8266_v42 = vcombine.low %v554_v31, %v558_v33 }
 0x291   : > { %7169 = vmatpush2.bf16.msra.mxu0 %v8058_v41  ;;  %v686_v28 = vld [vmem:[%s9415_s25 + $0xdb0] sm:$0xff] }
 0x292   : > { %7170 = vmatprep.subr.bf16.mxu0 %v8051_v44  ;;  %v8395_v38 = vcombine.high %v682_v35, %v686_v28  ;;  %v546_v17 = vld [vmem:[%s9415_s25 + $0x950] sm:$0xff] }
 0x293   : > { %7210 = vmatpush2.bf16.msra.mxu1 %v8186_v43  ;;  %v550_v41 = vld [vmem:[%s9415_s25 + $0x970] sm:$0xff] }
 0x294   : > { %7211 = vmatprep.subr.bf16.mxu1 %v8179_v19  ;;  %v674_v44 = vld [vmem:[%s9415_s25 + $0xd50] sm:$0xff] }
 0x295   : > { %7171 = vmatpush2.bf16.msra.mxu0 %v8050_v50  ;;  %v678_v19 = vld [vmem:[%s9415_s25 + $0xd70] sm:$0xff]  ;;  %v8394_v50 = vcombine.low %v682_v35, %v686_v28 }
 0x296   : > { %7172 = vmatprep.subr.bf16.mxu0 %v8043_v52  ;;  %v538_v60 = vld [vmem:[%s9415_s25 + $0x910] sm:$0xff]  ;;  %v8386_v6 = vcombine.low %v674_v44, %v678_v19 }
 0x297   : > { %7212 = vmatpush2.bf16.msra.mxu1 %v8178_v51  ;;  %v8259_v51 = vcombine.high %v546_v17, %v550_v41  ;;  %v542_v62 = vld [vmem:[%s9415_s25 + $0x930] sm:$0xff] }
 0x298   : > { %7213 = vmatprep.subr.bf16.mxu1 %v8171_v56  ;;  %v8251_v9 = vcombine.high %v538_v60, %v542_v62  ;;  %v662_v21 = vld [vmem:[%s9415_s25 + $0xcf0] sm:$0xff]  ;;  %v8250_v53 = vcombine.low %v538_v60, %v542_v62 }
 0x299   : > { %7173 = vmatpush2.bf16.msra.mxu0 %v8042_v1  ;;  %v666_v1 = vld [vmem:[%s9415_s25 + $0xd10] sm:$0xff] }
 0x29a   : > { %7174 = vmatprep.subr.bf16.mxu0 %v8035_v7  ;;  %v654_v31 = vld [vmem:[%s9415_s25 + $0xcb0] sm:$0xff] }
 0x29b   : > { %7214 = vmatpush2.bf16.msra.mxu1 %v8170_v2  ;;  %v670_v2 = vld [vmem:[%s9415_s25 + $0xd30] sm:$0xff] }
 0x29c   : > { %7215 = vmatprep.subr.bf16.mxu1 %v8163_v3  ;;  %v8378_v25 = vcombine.low %v666_v1, %v670_v2  ;;  %v630_v60 = vld [vmem:[%s9415_s25 + $0xbf0] sm:$0xff] }
 0x29d   : > { %7175 = vmatpush2.bf16.msra.mxu0 %v8034_v10  ;;  %v8379_v10 = vcombine.high %v666_v1, %v670_v2  ;;  %v754_v62 = vld [vmem:[%s9415_s25 + $0xfd0] sm:$0xff] }
 0x29e   : > { %7176 = vmatprep.subr.bf16.mxu0 %v8027_v13  ;;  %v534_v13 = vld [vmem:[%s9415_s25 + $0x8f0] sm:$0xff] }
 0x29f   : > { %7216 = vmatpush2.bf16.msra.mxu1 %v8162_v12  ;;  %v530_v12 = vld [vmem:[%s9415_s25 + $0x8d0] sm:$0xff] }
 0x2a0   : > { %7217 = vmatprep.subr.bf16.mxu1 %v8155_v14  ;;  %v658_v14 = vld [vmem:[%s9415_s25 + $0xcd0] sm:$0xff]  ;;  %v8243_v26 = vcombine.high %v530_v12, %v534_v13  ;;  %v8242_v33 = vcombine.low %v530_v12, %v534_v13 }
 0x2a1   : > { %7177 = vmatpush2.bf16.msra.mxu0 %v8026_v54  ;;  %v8371_v54 = vcombine.high %v658_v14, %v662_v21  ;;  %v8370_v35 = vcombine.low %v658_v14, %v662_v21  ;;  %v610_v21 = vld [vmem:[%s9415_s25 + $0xb50] sm:$0xff] }
 0x2a2   : > { %7228 = vmatprep.subr.bf16.mxu0 %v8275_v24  ;;  %v526_v24 = vld [vmem:[%s9415_s25 + $0x8b0] sm:$0xff] }
 0x2a3   : > { %7218 = vmatpush2.bf16.msra.mxu1 %v8154_v30  ;;  %v522_v30 = vld [vmem:[%s9415_s25 + $0x890] sm:$0xff] }
 0x2a4   : > { %7269 = vmatprep.subr.bf16.mxu1 %v8403_v39  ;;  %v6934_v43 = vpop.f32.mrf.mxu0  ;;  %7179 = vmatmul.mubr.bf16.vlgmr.msra.gmra.mxu0 %v9507_v16  ;;  %v650_v39 = vld [vmem:[%s9415_s25 + $0xc90] sm:$0xff]  ;;  %v8235_v28 = vcombine.high %v522_v30, %v526_v24 }
 0x2a5   : > { %v6935_v45 = vadd.f32 %v6934_v43, %v10099_v22  ;;  %7229 = vmatpush1.bf16.msra.mxu0 %v8274_v37  ;;  %v8387_v22 = vcombine.high %v674_v44, %v678_v19  ;;  %7260 = vmatprep.mubr.bf16.mxu0 %v9523_v27  ;;  %v8363_v37 = vcombine.high %v650_v39, %v654_v31 }
 0x2a6   : > { %v6975_v46 = vpop.f32.mrf.mxu1  ;;  %7220 = vmatmul.mubr.bf16.vlgmr.msra.gmra.mxu1 %v9515_v20  ;;  %v6936_v48 = vpop.f32.mrf.mxu0  ;;  %7230 = vmatprep.subr.bf16.mxu0 %v8267_v23  ;;  %v518_v23 = vld [vmem:[%s9415_s25 + $0x870] sm:$0xff]  ;;  %v8362_v43 = vcombine.low %v650_v39, %v654_v31 }
 0x2a7   : > { %7270 = vmatpush1.bf16.msra.mxu1 %v8402_v34  ;;  %v10172_v52 = vadd.f32 %v6975_v46, %v6935_v45  ;;  %v6937_v56 = vadd.f32 %v6936_v48, %v10107_v63  ;;  %7301 = vmatprep.mubr.bf16.mxu1 %v9530_v29  ;;  %v8258_v63 = vcombine.low %v546_v17, %v550_v41  ;;  %v514_v34 = vld [vmem:[%s9415_s25 + $0x850] sm:$0xff] }
 0x2a8   : > { %v6977_v57 = vpop.f32.mrf.mxu1  ;;  %7271 = vmatprep.subr.bf16.mxu1 %v8395_v38  ;;  %v6938_v0 = vpop.f32.mrf.mxu0  ;;  %v642_v38 = vld [vmem:[%s9415_s25 + $0xc50] sm:$0xff]  ;;  %v8234_v41 = vcombine.low %v522_v30, %v526_v24  ;;  %v8227_v44 = vcombine.high %v514_v34, %v518_v23 }
 0x2a9   : > { %v10181_v7 = vadd.f32 %v6977_v57, %v6937_v56  ;;  %7231 = vmatpush1.bf16.msra.mxu0 %v8266_v42  ;;  %v646_v17 = vld [vmem:[%s9415_s25 + $0xc70] sm:$0xff] }
 0x2aa   : > { %v6979_v3 = vpop.f32.mrf.mxu1  ;;  %v6939_v5 = vpop.f32.mrf.mxu0  ;;  %7232 = vmatprep.subr.bf16.mxu0 %v8259_v51  ;;  %v8355_v19 = vcombine.high %v642_v38, %v646_v17  ;;  %v506_v45 = vld [vmem:[%s9415_s25 + $0x810] sm:$0xff]  ;;  %v8354_v51 = vcombine.low %v642_v38, %v646_v17 }
 0x2ab   : > { %7272 = vmatpush1.bf16.msra.mxu1 %v8394_v50  ;;  %v510_v46 = vld [vmem:[%s9415_s25 + $0x830] sm:$0xff]  ;;  %v8226_v50 = vcombine.low %v514_v34, %v518_v23 }
 0x2ac   : > { %v6980_v11 = vpop.f32.mrf.mxu1  ;;  %7273 = vmatprep.subr.bf16.mxu1 %v8387_v22  ;;  %v634_v42 = vld [vmem:[%s9415_s25 + $0xc10] sm:$0xff]  ;;  %v8219_v56 = vcombine.high %v506_v45, %v510_v46  ;;  %v8218_v1 = vcombine.low %v506_v45, %v510_v46 }
 0x2ad   : > { %7233 = vmatpush1.bf16.msra.mxu0 %v8258_v63  ;;  %v638_v48 = vld [vmem:[%s9415_s25 + $0xc30] sm:$0xff] }
 0x2ae   : > { %7234 = vmatprep.subr.bf16.mxu0 %v8251_v9  ;;  %v8347_v57 = vcombine.high %v634_v42, %v638_v48  ;;  %v626_v22 = vld [vmem:[%s9415_s25 + $0xbd0] sm:$0xff]  ;;  %v8346_v2 = vcombine.low %v634_v42, %v638_v48 }
 0x2af   : > { %7274 = vmatpush1.bf16.msra.mxu1 %v8386_v6  ;;  %v758_v0 = vld [vmem:[%s9415_s25 + $0xff0] sm:$0xff]  ;;  %v8339_v3 = vcombine.high %v626_v22, %v630_v60 }
 0x2b0   : > { %7275 = vmatprep.subr.bf16.mxu1 %v8379_v10  ;;  %v8467_v63 = vcombine.high %v754_v62, %v758_v0  ;;  %v618_v5 = vld [vmem:[%s9415_s25 + $0xb90] sm:$0xff]  ;;  %v8338_v10 = vcombine.low %v626_v22, %v630_v60  ;;  %v8466_v12 = vcombine.low %v754_v62, %v758_v0 }
 0x2b1   : > { %7235 = vmatpush1.bf16.msra.mxu0 %v8250_v53  ;;  %v622_v6 = vld [vmem:[%s9415_s25 + $0xbb0] sm:$0xff] }
 0x2b2   : > { %7236 = vmatprep.subr.bf16.mxu0 %v8243_v26  ;;  %v746_v9 = vld [vmem:[%s9415_s25 + $0xf90] sm:$0xff]  ;;  %v8331_v13 = vcombine.high %v618_v5, %v622_v6 }
 0x2b3   : > { %7276 = vmatpush1.bf16.msra.mxu1 %v8378_v25  ;;  %v750_v11 = vld [vmem:[%s9415_s25 + $0xfb0] sm:$0xff] }
 0x2b4   : > { %7277 = vmatprep.subr.bf16.mxu1 %v8371_v54  ;;  %v8459_v14 = vcombine.high %v746_v9, %v750_v11  ;;  %v614_v53 = vld [vmem:[%s9415_s25 + $0xb70] sm:$0xff]  ;;  %v8330_v54 = vcombine.low %v618_v5, %v622_v6  ;;  %v8458_v30 = vcombine.low %v746_v9, %v750_v11 }
 0x2b5   : > { %7237 = vmatpush1.bf16.msra.mxu0 %v8242_v33  ;;  %v738_v25 = vld [vmem:[%s9415_s25 + $0xf50] sm:$0xff]  ;;  %v8323_v24 = vcombine.high %v610_v21, %v614_v53 }
 0x2b6   : > { %7238 = vmatprep.subr.bf16.mxu0 %v8235_v28  ;;  %v742_v26 = vld [vmem:[%s9415_s25 + $0xf70] sm:$0xff] }
 0x2b7   : > { %7278 = vmatpush1.bf16.msra.mxu1 %v8370_v35  ;;  %v8451_v39 = vcombine.high %v738_v25, %v742_v26  ;;  %v602_v31 = vld [vmem:[%s9415_s25 + $0xb10] sm:$0xff]  ;;  %v8450_v34 = vcombine.low %v738_v25, %v742_v26 }
 0x2b8   : > { %7279 = vmatprep.subr.bf16.mxu1 %v8363_v37  ;;  %v606_v33 = vld [vmem:[%s9415_s25 + $0xb30] sm:$0xff]  ;;  %v8322_v37 = vcombine.low %v610_v21, %v614_v53 }
 0x2b9   : > { %7239 = vmatpush1.bf16.msra.mxu0 %v8234_v41  ;;  %v730_v35 = vld [vmem:[%s9415_s25 + $0xf10] sm:$0xff]  ;;  %v8315_v23 = vcombine.high %v602_v31, %v606_v33 }
 0x2ba   : > { %7240 = vmatprep.subr.bf16.mxu0 %v8227_v44  ;;  %v734_v28 = vld [vmem:[%s9415_s25 + $0xf30] sm:$0xff] }
 0x2bb   : > { %7280 = vmatpush1.bf16.msra.mxu1 %v8362_v43  ;;  %v8443_v38 = vcombine.high %v730_v35, %v734_v28  ;;  %v594_v17 = vld [vmem:[%s9415_s25 + $0xad0] sm:$0xff]  ;;  %v8442_v45 = vcombine.low %v730_v35, %v734_v28 }
 0x2bc   : > { %7281 = vmatprep.subr.bf16.mxu1 %v8355_v19  ;;  %v598_v41 = vld [vmem:[%s9415_s25 + $0xaf0] sm:$0xff]  ;;  %v8314_v19 = vcombine.low %v602_v31, %v606_v33 }
 0x2bd   : > { %7241 = vmatpush1.bf16.msra.mxu0 %v8226_v50  ;;  %v722_v43 = vld [vmem:[%s9415_s25 + $0xed0] sm:$0xff]  ;;  %v8307_v46 = vcombine.high %v594_v17, %v598_v41 }
 0x2be   : > { %7242 = vmatprep.subr.bf16.mxu0 %v8219_v56  ;;  %v726_v44 = vld [vmem:[%s9415_s25 + $0xef0] sm:$0xff] }
 0x2bf   : > { %7282 = vmatpush1.bf16.msra.mxu1 %v8354_v51  ;;  %v8435_v42 = vcombine.high %v722_v43, %v726_v44  ;;  %v586_v48 = vld [vmem:[%s9415_s25 + $0xa90] sm:$0xff]  ;;  %v8434_v22 = vcombine.low %v722_v43, %v726_v44 }
 0x2c0   : > { %7283 = vmatprep.subr.bf16.mxu1 %v8347_v57  ;;  %v590_v50 = vld [vmem:[%s9415_s25 + $0xab0] sm:$0xff]  ;;  %v8306_v57 = vcombine.low %v594_v17, %v598_v41 }
 0x2c1   : > { %7243 = vmatpush1.bf16.msra.mxu0 %v8218_v1  ;;  %v714_v51 = vld [vmem:[%s9415_s25 + $0xe90] sm:$0xff]  ;;  %v8299_v60 = vcombine.high %v586_v48, %v590_v50 }
 0x2c2   : > { %7244 = vmatprep.subr.bf16.mxu0 %v8339_v3  ;;  %v718_v56 = vld [vmem:[%s9415_s25 + $0xeb0] sm:$0xff] }
 0x2c3   : > { %7284 = vmatpush1.bf16.msra.mxu1 %v8346_v2  ;;  %v8427_v62 = vcombine.high %v714_v51, %v718_v56  ;;  %v578_v0 = vld [vmem:[%s9415_s25 + $0xa50] sm:$0xff]  ;;  %v8426_v5 = vcombine.low %v714_v51, %v718_v56 }
 0x2c4   : > { %7285 = vmatprep.subr.bf16.mxu1 %v8467_v63  ;;  %v582_v1 = vld [vmem:[%s9415_s25 + $0xa70] sm:$0xff]  ;;  %v8298_v63 = vcombine.low %v586_v48, %v590_v50 }
 0x2c5   : > { %7245 = vmatpush2.bf16.msra.mxu0 %v8338_v10  ;;  %v706_v2 = vld [vmem:[%s9415_s25 + $0xe50] sm:$0xff]  ;;  %v8291_v6 = vcombine.high %v578_v0, %v582_v1 }
 0x2c6   : > { %7246 = vmatprep.subr.bf16.mxu0 %v8331_v13  ;;  %v710_v3 = vld [vmem:[%s9415_s25 + $0xe70] sm:$0xff] }
 0x2c7   : > { %7286 = vmatpush2.bf16.msra.mxu1 %v8466_v12  ;;  %v8419_v9 = vcombine.high %v706_v2, %v710_v3  ;;  %v570_v11 = vld [vmem:[%s9415_s25 + $0xa10] sm:$0xff]  ;;  %v8418_v21 = vcombine.low %v706_v2, %v710_v3 }
 0x2c8   : > { %7287 = vmatprep.subr.bf16.mxu1 %v8459_v14  ;;  %v574_v10 = vld [vmem:[%s9415_s25 + $0xa30] sm:$0xff]  ;;  %v8290_v14 = vcombine.low %v578_v0, %v582_v1 }
 0x2c9   : > { %7247 = vmatpush2.bf16.msra.mxu0 %v8330_v54  ;;  %v698_v12 = vld [vmem:[%s9415_s25 + $0xe10] sm:$0xff]  ;;  %v8283_v53 = vcombine.high %v570_v11, %v574_v10 }
 0x2ca   : > { %7248 = vmatprep.subr.bf16.mxu0 %v8323_v24  ;;  %v702_v13 = vld [vmem:[%s9415_s25 + $0xe30] sm:$0xff] }
 0x2cb   : > { %7288 = vmatpush2.bf16.msra.mxu1 %v8458_v30  ;;  %v8411_v25 = vcombine.high %v698_v12, %v702_v13  ;;  %v818_v26 = vld [vmem:[%s9415_s25 + $0x11d0] sm:$0xff]  ;;  %v8410_v31 = vcombine.low %v698_v12, %v702_v13 }
 0x2cc   : > { %7289 = vmatprep.subr.bf16.mxu1 %v8451_v39  ;;  %v822_v54 = vld [vmem:[%s9415_s25 + $0x11f0] sm:$0xff]  ;;  %v8282_v39 = vcombine.low %v570_v11, %v574_v10 }
 0x2cd   : > { %7249 = vmatpush2.bf16.msra.mxu0 %v8322_v37  ;;  %v946_v30 = vld [vmem:[%s9415_s25 + $0x15d0] sm:$0xff]  ;;  %v8531_v33 = vcombine.high %v818_v26, %v822_v54 }
 0x2ce   : > { %7250 = vmatprep.subr.bf16.mxu0 %v8315_v23  ;;  %v950_v24 = vld [vmem:[%s9415_s25 + $0x15f0] sm:$0xff] }
 0x2cf   : > { %7290 = vmatpush2.bf16.msra.mxu1 %v8450_v34  ;;  %v8659_v35 = vcombine.high %v946_v30, %v950_v24  ;;  %v810_v28 = vld [vmem:[%s9415_s25 + $0x1190] sm:$0xff]  ;;  %v8658_v17 = vcombine.low %v946_v30, %v950_v24 }
 0x2d0   : > { %7291 = vmatprep.subr.bf16.mxu1 %v8443_v38  ;;  %v814_v37 = vld [vmem:[%s9415_s25 + $0x11b0] sm:$0xff]  ;;  %v8530_v38 = vcombine.low %v818_v26, %v822_v54 }
 0x2d1   : > { %7251 = vmatpush2.bf16.msra.mxu0 %v8314_v19  ;;  %v938_v34 = vld [vmem:[%s9415_s25 + $0x1590] sm:$0xff]  ;;  %v8523_v41 = vcombine.high %v810_v28, %v814_v37  ;;  %v8522_v50 = vcombine.low %v810_v28, %v814_v37 }
 0x2d2   : > { %7252 = vmatprep.subr.bf16.mxu0 %v8307_v46  ;;  %v942_v23 = vld [vmem:[%s9415_s25 + $0x15b0] sm:$0xff] }
 0x2d3   : > { %7292 = vmatpush2.bf16.msra.mxu1 %v8442_v45  ;;  %v8651_v43 = vcombine.high %v938_v34, %v942_v23  ;;  %v802_v44 = vld [vmem:[%s9415_s25 + $0x1150] sm:$0xff]  ;;  %v8650_v56 = vcombine.low %v938_v34, %v942_v23 }
 0x2d4   : > { %7293 = vmatprep.subr.bf16.mxu1 %v8435_v42  ;;  %v806_v19 = vld [vmem:[%s9415_s25 + $0x1170] sm:$0xff] }
 0x2d5   : > { %7253 = vmatpush2.bf16.msra.mxu0 %v8306_v57  ;;  %v930_v46 = vld [vmem:[%s9415_s25 + $0x1550] sm:$0xff]  ;;  %v8515_v57 = vcombine.high %v802_v44, %v806_v19 }
 0x2d6   : > { %7254 = vmatprep.subr.bf16.mxu0 %v8299_v60  ;;  %v934_v42 = vld [vmem:[%s9415_s25 + $0x1570] sm:$0xff] }
 0x2d7   : > { %7294 = vmatpush2.bf16.msra.mxu1 %v8434_v22  ;;  %v8643_v60 = vcombine.high %v930_v46, %v934_v42  ;;  %v798_v0 = vld [vmem:[%s9415_s25 + $0x1130] sm:$0xff] }
 0x2d8   : > { %7295 = vmatprep.subr.bf16.mxu1 %v8427_v62  ;;  %v794_v62 = vld [vmem:[%s9415_s25 + $0x1110] sm:$0xff] }
 0x2d9   : > { %7255 = vmatpush2.bf16.msra.mxu0 %v8298_v63  ;;  %v922_v2 = vld [vmem:[%s9415_s25 + $0x1510] sm:$0xff]  ;;  %v8507_v11 = vcombine.high %v794_v62, %v798_v0 }
 0x2da   : > { %7256 = vmatprep.subr.bf16.mxu0 %v8291_v6  ;;  %v926_v3 = vld [vmem:[%s9415_s25 + $0x1530] sm:$0xff] }
 0x2db   : > { %7296 = vmatpush2.bf16.msra.mxu1 %v8426_v5  ;;  %v8514_v5 = vcombine.low %v802_v44, %v806_v19  ;;  %v8635_v12 = vcombine.high %v922_v2, %v926_v3  ;;  %v786_v13 = vld [vmem:[%s9415_s25 + $0x10d0] sm:$0xff]  ;;  %v8634_v26 = vcombine.low %v922_v2, %v926_v3 }
 0x2dc   : > { %7297 = vmatprep.subr.bf16.mxu1 %v8419_v9  ;;  %v8642_v9 = vcombine.low %v930_v46, %v934_v42  ;;  %v778_v24 = vld [vmem:[%s9415_s25 + $0x1090] sm:$0xff] }
 0x2dd   : > { %7257 = vmatpush2.bf16.msra.mxu0 %v8290_v14  ;;  %v790_v14 = vld [vmem:[%s9415_s25 + $0x10f0] sm:$0xff] }
 0x2de   : > { %7258 = vmatprep.subr.bf16.mxu0 %v8283_v53  ;;  %v918_v53 = vld [vmem:[%s9415_s25 + $0x14f0] sm:$0xff]  ;;  %v8499_v54 = vcombine.high %v786_v13, %v790_v14 }
 0x2df   : > { %7298 = vmatpush2.bf16.msra.mxu1 %v8418_v21  ;;  %v914_v21 = vld [vmem:[%s9415_s25 + $0x14d0] sm:$0xff] }
 0x2e0   : > { %7299 = vmatprep.subr.bf16.mxu1 %v8411_v25  ;;  %v8506_v25 = vcombine.low %v794_v62, %v798_v0  ;;  %v8627_v30 = vcombine.high %v914_v21, %v918_v53  ;;  %v8626_v28 = vcombine.low %v914_v21, %v918_v53  ;;  %v770_v23 = vld [vmem:[%s9415_s25 + $0x1050] sm:$0xff] }
 0x2e1   : > { %7259 = vmatpush2.bf16.msra.mxu0 %v8282_v39  ;;  %v782_v39 = vld [vmem:[%s9415_s25 + $0x10b0] sm:$0xff] }
 0x2e2   : > { %7310 = vmatprep.subr.bf16.mxu0 %v8531_v33  ;;  %v910_v33 = vld [vmem:[%s9415_s25 + $0x14b0] sm:$0xff]  ;;  %v8491_v37 = vcombine.high %v778_v24, %v782_v39 }
 0x2e3   : > { %7300 = vmatpush2.bf16.msra.mxu1 %v8410_v31  ;;  %v906_v31 = vld [vmem:[%s9415_s25 + $0x1490] sm:$0xff] }
 0x2e4   : > { %7351 = vmatprep.subr.bf16.mxu1 %v8659_v35  ;;  %v10241_v45 = vpop.f32.mrf.mxu0  ;;  %7261 = vmatmul.mubr.bf16.vlgmr.msra.gmra.mxu0 %v9595_v36  ;;  %v8498_v35 = vcombine.low %v786_v13, %v790_v14  ;;  %v8619_v34 = vcombine.high %v906_v31, %v910_v33  ;;  %v8618_v44 = vcombine.low %v906_v31, %v910_v33  ;;  %v762_v42 = vld [vmem:[%s9415_s25 + $0x1010] sm:$0xff] }
 0x2e5   : > { %7311 = vmatpush1.bf16.msra.mxu0 %v8530_v38  ;;  %7342 = vmatprep.mubr.bf16.mxu0 %v9611_v47  ;;  %v774_v38 = vld [vmem:[%s9415_s25 + $0x1070] sm:$0xff] }
 0x2e6   : > { %v10246_v48 = vpop.f32.mrf.mxu1  ;;  %7302 = vmatmul.mubr.bf16.vlgmr.msra.gmra.mxu1 %v9603_v40  ;;  %v10249_v51 = vpop.f32.mrf.mxu0  ;;  %7312 = vmatprep.subr.bf16.mxu0 %v8523_v41  ;;  %v902_v41 = vld [vmem:[%s9415_s25 + $0x1470] sm:$0xff]  ;;  %v8483_v19 = vcombine.high %v770_v23, %v774_v38 }
 0x2e7   : > { %7352 = vmatpush1.bf16.msra.mxu1 %v8658_v17  ;;  %7383 = vmatprep.mubr.bf16.mxu1 %v9618_v49  ;;  %v898_v17 = vld [vmem:[%s9415_s25 + $0x1450] sm:$0xff] }
 0x2e8   : > { %v10251_v22 = vpop.f32.mrf.mxu1  ;;  %7353 = vmatprep.subr.bf16.mxu1 %v8651_v43  ;;  %v7020_v1 = vpop.f32.mrf.mxu0  ;;  %v8490_v43 = vcombine.low %v778_v24, %v782_v39  ;;  %v8611_v46 = vcombine.high %v898_v17, %v902_v41  ;;  %v8610_v62 = vcombine.low %v898_v17, %v902_v41  ;;  %v882_v2 = vld [vmem:[%s9415_s25 + $0x13d0] sm:$0xff] }
 0x2e9   : > { %7313 = vmatpush1.bf16.msra.mxu0 %v8522_v50  ;;  %v766_v50 = vld [vmem:[%s9415_s25 + $0x1030] sm:$0xff] }
 0x2ea   : > { %v7061_v63 = vpop.f32.mrf.mxu1  ;;  %v7021_v6 = vpop.f32.mrf.mxu0  ;;  %7314 = vmatprep.subr.bf16.mxu0 %v8515_v57  ;;  %v894_v57 = vld [vmem:[%s9415_s25 + $0x1430] sm:$0xff]  ;;  %v8475_v0 = vcombine.high %v762_v42, %v766_v50 }
 0x2eb   : > { %7354 = vmatpush1.bf16.msra.mxu1 %v8650_v56  ;;  %v890_v56 = vld [vmem:[%s9415_s25 + $0x1410] sm:$0xff]  ;;  %v8474_v6 = vcombine.low %v762_v42, %v766_v50 }
 0x2ec   : > { %v7062_v10 = vpop.f32.mrf.mxu1  ;;  %7355 = vmatprep.subr.bf16.mxu1 %v8643_v60  ;;  %v8482_v60 = vcombine.low %v770_v23, %v774_v38  ;;  %v8603_v1 = vcombine.high %v890_v56, %v894_v57  ;;  %v886_v3 = vld [vmem:[%s9415_s25 + $0x13f0] sm:$0xff] }
 0x2ed   : > { %7315 = vmatpush1.bf16.msra.mxu0 %v8514_v5  ;;  %v1010_v63 = vld [vmem:[%s9415_s25 + $0x17d0] sm:$0xff]  ;;  %v8594_v53 = vcombine.low %v882_v2, %v886_v3 }
 0x2ee   : > { %7316 = vmatprep.subr.bf16.mxu0 %v8507_v11  ;;  %v1014_v5 = vld [vmem:[%s9415_s25 + $0x17f0] sm:$0xff]  ;;  %v8595_v11 = vcombine.high %v882_v2, %v886_v3 }
 0x2ef   : > { %7356 = vmatpush1.bf16.msra.mxu1 %v8642_v9  ;;  %v8602_v9 = vcombine.low %v890_v56, %v894_v57  ;;  %v8723_v10 = vcombine.high %v1010_v63, %v1014_v5  ;;  %v878_v13 = vld [vmem:[%s9415_s25 + $0x13b0] sm:$0xff] }
 0x2f0   : > { %7357 = vmatprep.subr.bf16.mxu1 %v8635_v12  ;;  %v874_v12 = vld [vmem:[%s9415_s25 + $0x1390] sm:$0xff] }
 0x2f1   : > { %7317 = vmatpush1.bf16.msra.mxu0 %v8506_v25  ;;  %v1002_v14 = vld [vmem:[%s9415_s25 + $0x1790] sm:$0xff]  ;;  %v8722_v25 = vcombine.low %v1010_v63, %v1014_v5  ;;  %v8586_v33 = vcombine.low %v874_v12, %v878_v13 }
 0x2f2   : > { %7318 = vmatprep.subr.bf16.mxu0 %v8499_v54  ;;  %v1006_v21 = vld [vmem:[%s9415_s25 + $0x17b0] sm:$0xff] }
 0x2f3   : > { %7358 = vmatpush1.bf16.msra.mxu1 %v8634_v26  ;;  %v8587_v26 = vcombine.high %v874_v12, %v878_v13  ;;  %v8715_v54 = vcombine.high %v1002_v14, %v1006_v21  ;;  %v870_v24 = vld [vmem:[%s9415_s25 + $0x1370] sm:$0xff] }
 0x2f4   : > { %7359 = vmatprep.subr.bf16.mxu1 %v8627_v30  ;;  %v866_v30 = vld [vmem:[%s9415_s25 + $0x1350] sm:$0xff] }
 0x2f5   : > { %7319 = vmatpush1.bf16.msra.mxu0 %v8498_v35  ;;  %v994_v39 = vld [vmem:[%s9415_s25 + $0x1750] sm:$0xff]  ;;  %v8714_v35 = vcombine.low %v1002_v14, %v1006_v21  ;;  %v8578_v41 = vcombine.low %v866_v30, %v870_v24 }
 0x2f6   : > { %7320 = vmatprep.subr.bf16.mxu0 %v8491_v37  ;;  %v998_v31 = vld [vmem:[%s9415_s25 + $0x1770] sm:$0xff] }
 0x2f7   : > { %7360 = vmatpush1.bf16.msra.mxu1 %v8626_v28  ;;  %v8579_v28 = vcombine.high %v866_v30, %v870_v24  ;;  %v8707_v37 = vcombine.high %v994_v39, %v998_v31  ;;  %v862_v23 = vld [vmem:[%s9415_s25 + $0x1330] sm:$0xff] }
 0x2f8   : > { %7361 = vmatprep.subr.bf16.mxu1 %v8619_v34  ;;  %v858_v34 = vld [vmem:[%s9415_s25 + $0x1310] sm:$0xff] }
 0x2f9   : > { %7321 = vmatpush1.bf16.msra.mxu0 %v8490_v43  ;;  %v986_v38 = vld [vmem:[%s9415_s25 + $0x1710] sm:$0xff]  ;;  %v8706_v43 = vcombine.low %v994_v39, %v998_v31  ;;  %v8570_v57 = vcombine.low %v858_v34, %v862_v23 }
 0x2fa   : > { %7322 = vmatprep.subr.bf16.mxu0 %v8483_v19  ;;  %v990_v17 = vld [vmem:[%s9415_s25 + $0x1730] sm:$0xff] }
 0x2fb   : > { %7362 = vmatpush1.bf16.msra.mxu1 %v8618_v44  ;;  %v8571_v44 = vcombine.high %v858_v34, %v862_v23  ;;  %v8699_v19 = vcombine.high %v986_v38, %v990_v17  ;;  %v854_v42 = vld [vmem:[%s9415_s25 + $0x12f0] sm:$0xff] }
 0x2fc   : > { %7363 = vmatprep.subr.bf16.mxu1 %v8611_v46  ;;  %v850_v46 = vld [vmem:[%s9415_s25 + $0x12d0] sm:$0xff] }
 0x2fd   : > { %7323 = vmatpush1.bf16.msra.mxu0 %v8482_v60  ;;  %v978_v50 = vld [vmem:[%s9415_s25 + $0x16d0] sm:$0xff]  ;;  %v8698_v60 = vcombine.low %v986_v38, %v990_v17  ;;  %v8562_v5 = vcombine.low %v850_v46, %v854_v42 }
 0x2fe   : > { %7324 = vmatprep.subr.bf16.mxu0 %v8475_v0  ;;  %v982_v56 = vld [vmem:[%s9415_s25 + $0x16f0] sm:$0xff] }
 0x2ff   : > { %7364 = vmatpush1.bf16.msra.mxu1 %v8610_v62  ;;  %v8563_v62 = vcombine.high %v850_v46, %v854_v42  ;;  %v8691_v0 = vcombine.high %v978_v50, %v982_v56  ;;  %v846_v2 = vld [vmem:[%s9415_s25 + $0x12b0] sm:$0xff] }
 0x300   : > { %7365 = vmatprep.subr.bf16.mxu1 %v8603_v1  ;;  %v842_v1 = vld [vmem:[%s9415_s25 + $0x1290] sm:$0xff] }
 0x301   : > { %7325 = vmatpush1.bf16.msra.mxu0 %v8474_v6  ;;  %v970_v3 = vld [vmem:[%s9415_s25 + $0x1690] sm:$0xff]  ;;  %v8690_v6 = vcombine.low %v978_v50, %v982_v56  ;;  %v8554_v21 = vcombine.low %v842_v1, %v846_v2 }
 0x302   : > { %7326 = vmatprep.subr.bf16.mxu0 %v8595_v11  ;;  %v974_v63 = vld [vmem:[%s9415_s25 + $0x16b0] sm:$0xff] }
 0x303   : > { %7366 = vmatpush1.bf16.msra.mxu1 %v8602_v9  ;;  %v8555_v9 = vcombine.high %v842_v1, %v846_v2  ;;  %v8683_v11 = vcombine.high %v970_v3, %v974_v63  ;;  %v838_v12 = vld [vmem:[%s9415_s25 + $0x1270] sm:$0xff] }
 0x304   : > { %7367 = vmatprep.subr.bf16.mxu1 %v8723_v10  ;;  %v834_v10 = vld [vmem:[%s9415_s25 + $0x1250] sm:$0xff] }
 0x305   : > { %7327 = vmatpush2.bf16.msra.mxu0 %v8594_v53  ;;  %v962_v13 = vld [vmem:[%s9415_s25 + $0x1650] sm:$0xff]  ;;  %v8682_v53 = vcombine.low %v970_v3, %v974_v63  ;;  %v8546_v31 = vcombine.low %v834_v10, %v838_v12 }
 0x306   : > { %7328 = vmatprep.subr.bf16.mxu0 %v8587_v26  ;;  %v966_v14 = vld [vmem:[%s9415_s25 + $0x1670] sm:$0xff] }
 0x307   : > { %7368 = vmatpush2.bf16.msra.mxu1 %v8722_v25  ;;  %v8547_v25 = vcombine.high %v834_v10, %v838_v12  ;;  %v8675_v26 = vcombine.high %v962_v13, %v966_v14  ;;  %v830_v30 = vld [vmem:[%s9415_s25 + $0x1230] sm:$0xff] }
 0x308   : > { %7369 = vmatprep.subr.bf16.mxu1 %v8715_v54  ;;  %v826_v54 = vld [vmem:[%s9415_s25 + $0x1210] sm:$0xff] }
 0x309   : > { %7329 = vmatpush2.bf16.msra.mxu0 %v8586_v33  ;;  %v954_v24 = vld [vmem:[%s9415_s25 + $0x1610] sm:$0xff]  ;;  %v8674_v33 = vcombine.low %v962_v13, %v966_v14  ;;  %v8538_v17 = vcombine.low %v826_v54, %v830_v30 }
 0x30a   : > { %7330 = vmatprep.subr.bf16.mxu0 %v8579_v28  ;;  %v958_v39 = vld [vmem:[%s9415_s25 + $0x1630] sm:$0xff] }
 0x30b   : > { %7370 = vmatpush2.bf16.msra.mxu1 %v8714_v35  ;;  %v8539_v35 = vcombine.high %v826_v54, %v830_v30  ;;  %v8667_v28 = vcombine.high %v954_v24, %v958_v39  ;;  %v1078_v34 = vld [vmem:[%s9415_s25 + $0x19f0] sm:$0xff] }
 0x30c   : > { %7371 = vmatprep.subr.bf16.mxu1 %v8707_v37  ;;  %v1074_v37 = vld [vmem:[%s9415_s25 + $0x19d0] sm:$0xff] }
 0x30d   : > { %7331 = vmatpush2.bf16.msra.mxu0 %v8578_v41  ;;  %v1202_v23 = vld [vmem:[%s9415_s25 + $0x1dd0] sm:$0xff]  ;;  %v8666_v41 = vcombine.low %v954_v24, %v958_v39 }
 0x30e   : > { %7332 = vmatprep.subr.bf16.mxu0 %v8571_v44  ;;  %v1206_v38 = vld [vmem:[%s9415_s25 + $0x1df0] sm:$0xff]  ;;  %v7017_v44 = vadd.f32 %v10241_v45, %v10172_v52 }
 0x30f   : > { %7372 = vmatpush2.bf16.msra.mxu1 %v8706_v43  ;;  %v8787_v43 = vcombine.high %v1074_v37, %v1078_v34  ;;  %v1066_v46 = vld [vmem:[%s9415_s25 + $0x1990] sm:$0xff] }
 0x310   : > { %7373 = vmatprep.subr.bf16.mxu1 %v8699_v19  ;;  %v8915_v19 = vcombine.high %v1202_v23, %v1206_v38  ;;  %v1070_v42 = vld [vmem:[%s9415_s25 + $0x19b0] sm:$0xff]  ;;  %v7058_v52 = vadd.f32 %v10246_v48, %v7017_v44 }
 0x311   : > { %7333 = vmatpush2.bf16.msra.mxu0 %v8570_v57  ;;  %v1194_v50 = vld [vmem:[%s9415_s25 + $0x1d90] sm:$0xff]  ;;  %v7019_v57 = vadd.f32 %v10249_v51, %v10181_v7  ;;  %v8778_v48 = vcombine.low %v1066_v46, %v1070_v42 }
 0x312   : > { %7334 = vmatprep.subr.bf16.mxu0 %v8563_v62  ;;  %v1198_v56 = vld [vmem:[%s9415_s25 + $0x1db0] sm:$0xff]  ;;  %v8914_v62 = vcombine.low %v1202_v23, %v1206_v38 }
 0x313   : > { %7374 = vmatpush2.bf16.msra.mxu1 %v8698_v60  ;;  %v8786_v60 = vcombine.low %v1074_v37, %v1078_v34  ;;  %v8907_v45 = vcombine.high %v1194_v50, %v1198_v56  ;;  %v1058_v1 = vld [vmem:[%s9415_s25 + $0x1950] sm:$0xff] }
 0x314   : > { %7375 = vmatprep.subr.bf16.mxu1 %v8691_v0  ;;  %v8779_v0 = vcombine.high %v1066_v46, %v1070_v42  ;;  %v1062_v2 = vld [vmem:[%s9415_s25 + $0x1970] sm:$0xff] }
 0x315   : > { %7335 = vmatpush2.bf16.msra.mxu0 %v8562_v5  ;;  %v1186_v63 = vld [vmem:[%s9415_s25 + $0x1d50] sm:$0xff]  ;;  %v8771_v10 = vcombine.high %v1058_v1, %v1062_v2  ;;  %v8770_v39 = vcombine.low %v1058_v1, %v1062_v2 }
 0x316   : > { %7336 = vmatprep.subr.bf16.mxu0 %v8555_v9  ;;  %v1190_v5 = vld [vmem:[%s9415_s25 + $0x1d70] sm:$0xff] }
 0x317   : > { %7376 = vmatpush2.bf16.msra.mxu1 %v8690_v6  ;;  %v7060_v6 = vadd.f32 %v10251_v22, %v7019_v57  ;;  %v8899_v22 = vcombine.high %v1186_v63, %v1190_v5  ;;  %v1182_v54 = vld [vmem:[%s9415_s25 + $0x1d30] sm:$0xff] }
 0x318   : > { %7377 = vmatprep.subr.bf16.mxu1 %v8683_v11  ;;  %v8906_v11 = vcombine.low %v1194_v50, %v1198_v56  ;;  %v1042_v34 = vld [vmem:[%s9415_s25 + $0x18d0] sm:$0xff] }
 0x319   : > { %7337 = vmatpush2.bf16.msra.mxu0 %v8554_v21  ;;  %v1050_v21 = vld [vmem:[%s9415_s25 + $0x1910] sm:$0xff] }
 0x31a   : > { %7338 = vmatprep.subr.bf16.mxu0 %v8547_v25  ;;  %v1046_v23 = vld [vmem:[%s9415_s25 + $0x18f0] sm:$0xff] }
 0x31b   : > { %7378 = vmatpush2.bf16.msra.mxu1 %v8682_v53  ;;  %v1054_v53 = vld [vmem:[%s9415_s25 + $0x1930] sm:$0xff]  ;;  %v8755_v44 = vcombine.high %v1042_v34, %v1046_v23  ;;  %v8754_v57 = vcombine.low %v1042_v34, %v1046_v23 }
 0x31c   : > { %7379 = vmatprep.subr.bf16.mxu1 %v8675_v26  ;;  %v1178_v26 = vld [vmem:[%s9415_s25 + $0x1d10] sm:$0xff] }
 0x31d   : > { %7339 = vmatpush2.bf16.msra.mxu0 %v8546_v31  ;;  %v8891_v37 = vcombine.high %v1178_v26, %v1182_v54  ;;  %v1170_v38 = vld [vmem:[%s9415_s25 + $0x1cd0] sm:$0xff] }
 0x31e   : > { %7340 = vmatprep.subr.bf16.mxu0 %v8539_v35  ;;  %v8763_v35 = vcombine.high %v1050_v21, %v1054_v53  ;;  %v1034_v46 = vld [vmem:[%s9415_s25 + $0x1890] sm:$0xff] }
 0x31f   : > { %7380 = vmatpush2.bf16.msra.mxu1 %v8674_v33  ;;  %v8898_v33 = vcombine.low %v1186_v63, %v1190_v5  ;;  %v1038_v42 = vld [vmem:[%s9415_s25 + $0x18b0] sm:$0xff] }
 0x320   : > { %7381 = vmatprep.subr.bf16.mxu1 %v8667_v28  ;;  %v1162_v50 = vld [vmem:[%s9415_s25 + $0x1c90] sm:$0xff] }
 0x321   : > { %7341 = vmatpush2.bf16.msra.mxu0 %v8538_v17  ;;  %v1174_v17 = vld [vmem:[%s9415_s25 + $0x1cf0] sm:$0xff] }
 0x322   : > { %7392 = vmatprep.subr.bf16.mxu0 %v8787_v43  ;;  %v8890_v43 = vcombine.low %v1178_v26, %v1182_v54  ;;  %v1166_v56 = vld [vmem:[%s9415_s25 + $0x1cb0] sm:$0xff] }
 0x323   : > { %7382 = vmatpush2.bf16.msra.mxu1 %v8666_v41  ;;  %v8762_v41 = vcombine.low %v1050_v21, %v1054_v53  ;;  %v1154_v1 = vld [vmem:[%s9415_s25 + $0x1c50] sm:$0xff]  ;;  %v8874_v63 = vcombine.low %v1162_v50, %v1166_v56 }
 0x324   : > { %7433 = vmatprep.subr.bf16.mxu1 %v8915_v19  ;;  %v7098_v3 = vpop.f32.mrf.mxu0  ;;  %7343 = vmatmul.mubr.bf16.vlgmr.msra.gmra.mxu0 %v9683_v4  ;;  %v8883_v19 = vcombine.high %v1170_v38, %v1174_v17  ;;  %v1158_v2 = vld [vmem:[%s9415_s25 + $0x1c70] sm:$0xff] }
 0x325   : > { %v7099_v7 = vadd.f32 %v7098_v3, %v7058_v52  ;;  %7393 = vmatpush1.bf16.msra.mxu0 %v8786_v60  ;;  %7424 = vmatprep.mubr.bf16.mxu0 %v9699_v15  ;;  %v8882_v60 = vcombine.low %v1170_v38, %v1174_v17  ;;  %v1026_v52 = vld [vmem:[%s9415_s25 + $0x1850] sm:$0xff]  ;;  %v8746_v3 = vcombine.low %v1034_v46, %v1038_v42 }
 0x326   : > { %v7139_v51 = vpop.f32.mrf.mxu1  ;;  %7384 = vmatmul.mubr.bf16.vlgmr.msra.gmra.mxu1 %v9691_v8  ;;  %v7100_v9 = vpop.f32.mrf.mxu0  ;;  %7394 = vmatprep.subr.bf16.mxu0 %v8779_v0  ;;  %v8875_v0 = vcombine.high %v1162_v50, %v1166_v56  ;;  %v1266_v21 = vld [vmem:[%s9415_s25 + $0x1fd0] sm:$0xff] }
 0x327   : > { %7434 = vmatpush1.bf16.msra.mxu1 %v8914_v62  ;;  %v7140_v12 = vadd.f32 %v7139_v51, %v7099_v7  ;;  %v7101_v13 = vadd.f32 %v7100_v9, %v7060_v6  ;;  %7465 = vmatprep.mubr.bf16.mxu1 %v9706_v18  ;;  %v8747_v62 = vcombine.high %v1034_v46, %v1038_v42  ;;  %v1018_v7 = vld [vmem:[%s9415_s25 + $0x1810] sm:$0xff] }
 0x328   : > { %v7141_v14 = vpop.f32.mrf.mxu1  ;;  %7435 = vmatprep.subr.bf16.mxu1 %v8907_v45  ;;  %v7102_v25 = vpop.f32.mrf.mxu0  ;;  %v1030_v45 = vld [vmem:[%s9415_s25 + $0x1870] sm:$0xff]  ;;  %v8867_v6 = vcombine.high %v1154_v1, %v1158_v2 }
 0x329   : > { %7804 = vst [vmem:[%s10030_s10 + $0x10] sm:$0xff] %v7140_v12  ;;  %v7142_v30 = vadd.f32 %v7141_v14, %v7101_v13  ;;  %7395 = vmatpush1.bf16.msra.mxu0 %v8778_v48  ;;  %v8739_v5 = vcombine.high %v1026_v52, %v1030_v45  ;;  %v1022_v51 = vld [vmem:[%s9415_s25 + $0x1830] sm:$0xff] }
 0x32a   : > { %v7143_v24 = vpop.f32.mrf.mxu1  ;;  %v7103_v31 = vpop.f32.mrf.mxu0  ;;  %7396 = vmatprep.subr.bf16.mxu0 %v8771_v10  ;;  %v1146_v48 = vld [vmem:[%s9415_s25 + $0x1c10] sm:$0xff]  ;;  %v8866_v10 = vcombine.low %v1154_v1, %v1158_v2  ;;  %v8731_v12 = vcombine.high %v1018_v7, %v1022_v51  ;;  %v8730_v25 = vcombine.low %v1018_v7, %v1022_v51 }
 0x32b   : > { %7436 = vmatpush1.bf16.msra.mxu1 %v8906_v11  ;;  %7805 = vst [vmem:[%s10030_s10 + $0x18] sm:$0xff] %v7142_v30  ;;  %v1150_v9 = vld [vmem:[%s9415_s25 + $0x1c30] sm:$0xff]  ;;  %v8738_v11 = vcombine.low %v1026_v52, %v1030_v45 }
 0x32c   : > { %v7144_v28 = vpop.f32.mrf.mxu1  ;;  %7437 = vmatprep.subr.bf16.mxu1 %v8899_v22  ;;  %v8859_v13 = vcombine.high %v1146_v48, %v1150_v9  ;;  %v1138_v14 = vld [vmem:[%s9415_s25 + $0x1bd0] sm:$0xff]  ;;  %v8858_v26 = vcombine.low %v1146_v48, %v1150_v9 }
 0x32d   : > { %7397 = vmatpush1.bf16.msra.mxu0 %v8770_v39  ;;  %v1142_v22 = vld [vmem:[%s9415_s25 + $0x1bf0] sm:$0xff] }
 0x32e   : > { %7398 = vmatprep.subr.bf16.mxu0 %v8763_v35  ;;  %v1270_v53 = vld [vmem:[%s9415_s25 + $0x1ff0] sm:$0xff]  ;;  %v8851_v54 = vcombine.high %v1138_v14, %v1142_v22  ;;  %v8850_v35 = vcombine.low %v1138_v14, %v1142_v22 }
 0x32f   : > { %7438 = vmatpush1.bf16.msra.mxu1 %v8898_v33  ;;  %v8979_v30 = vcombine.high %v1266_v21, %v1270_v53  ;;  %v1130_v24 = vld [vmem:[%s9415_s25 + $0x1b90] sm:$0xff]  ;;  %v8978_v28 = vcombine.low %v1266_v21, %v1270_v53 }
 0x330   : > { %7439 = vmatprep.subr.bf16.mxu1 %v8891_v37  ;;  %v1134_v39 = vld [vmem:[%s9415_s25 + $0x1bb0] sm:$0xff] }
 0x331   : > { %7399 = vmatpush1.bf16.msra.mxu0 %v8762_v41  ;;  %v1258_v31 = vld [vmem:[%s9415_s25 + $0x1f90] sm:$0xff]  ;;  %v8843_v37 = vcombine.high %v1130_v24, %v1134_v39 }
 0x332   : > { %7400 = vmatprep.subr.bf16.mxu0 %v8755_v44  ;;  %v1262_v33 = vld [vmem:[%s9415_s25 + $0x1fb0] sm:$0xff] }
 0x333   : > { %7440 = vmatpush1.bf16.msra.mxu1 %v8890_v43  ;;  %v8971_v34 = vcombine.high %v1258_v31, %v1262_v33  ;;  %v1122_v23 = vld [vmem:[%s9415_s25 + $0x1b50] sm:$0xff]  ;;  %v8842_v43 = vcombine.low %v1130_v24, %v1134_v39  ;;  %v8970_v44 = vcombine.low %v1258_v31, %v1262_v33 }
 0x334   : > { %7441 = vmatprep.subr.bf16.mxu1 %v8883_v19  ;;  %v1126_v38 = vld [vmem:[%s9415_s25 + $0x1b70] sm:$0xff] }
 0x335   : > { %7401 = vmatpush1.bf16.msra.mxu0 %v8754_v57  ;;  %v1250_v17 = vld [vmem:[%s9415_s25 + $0x1f50] sm:$0xff]  ;;  %v8835_v19 = vcombine.high %v1122_v23, %v1126_v38 }
 0x336   : > { %7402 = vmatprep.subr.bf16.mxu0 %v8747_v62  ;;  %v1254_v41 = vld [vmem:[%s9415_s25 + $0x1f70] sm:$0xff] }
 0x337   : > { %7442 = vmatpush1.bf16.msra.mxu1 %v8882_v60  ;;  %v8963_v46 = vcombine.high %v1250_v17, %v1254_v41  ;;  %v1114_v42 = vld [vmem:[%s9415_s25 + $0x1b10] sm:$0xff]  ;;  %v8834_v60 = vcombine.low %v1122_v23, %v1126_v38  ;;  %v8962_v62 = vcombine.low %v1250_v17, %v1254_v41  ;;  %v307_v38 = vld [vmem:[%s9415_s25 + $0x1d8] sm:$0xff] }
 0x338   : > { %7443 = vmatprep.subr.bf16.mxu1 %v8875_v0  ;;  %v1118_v50 = vld [vmem:[%s9415_s25 + $0x1b30] sm:$0xff]  ;;  %v311_v17 = vld [vmem:[%s9415_s25 + $0x1f8] sm:$0xff] }
 0x339   : > { %7403 = vmatpush1.bf16.msra.mxu0 %v8746_v3  ;;  %v1242_v56 = vld [vmem:[%s9415_s25 + $0x1f10] sm:$0xff]  ;;  %v8827_v0 = vcombine.high %v1114_v42, %v1118_v50  ;;  %v435_v41 = vld [vmem:[%s9415_s25 + $0x5d8] sm:$0xff] }
 0x33a   : > { %7404 = vmatprep.subr.bf16.mxu0 %v8739_v5  ;;  %v1246_v57 = vld [vmem:[%s9415_s25 + $0x1f30] sm:$0xff] }
 0x33b   : > { %7444 = vmatpush1.bf16.msra.mxu1 %v8874_v63  ;;  %v8955_v52 = vcombine.high %v1242_v56, %v1246_v57  ;;  %v1106_v45 = vld [vmem:[%s9415_s25 + $0x1ad0] sm:$0xff]  ;;  %v8826_v63 = vcombine.low %v1114_v42, %v1118_v50  ;;  %v8954_v5 = vcombine.low %v1242_v56, %v1246_v57  ;;  %v8021_v42 = vcombine.high %v307_v38, %v311_v17  ;;  %v299_v57 = vld [vmem:[%s9415_s25 + $0x198] sm:$0xff] }
 0x33c   : > { %7445 = vmatprep.subr.bf16.mxu1 %v8867_v6  ;;  %v1110_v1 = vld [vmem:[%s9415_s25 + $0x1af0] sm:$0xff]  ;;  %v1296_v56 = vsub.s32 5, %v9764_v32 }
 0x33d   : > { %7405 = vmatpush1.bf16.msra.mxu0 %v8738_v11  ;;  %v1234_v2 = vld [vmem:[%s9415_s25 + $0x1ed0] sm:$0xff]  ;;  %v8819_v6 = vcombine.high %v1106_v45, %v1110_v1 }
 0x33e   : > { %7406 = vmatprep.subr.bf16.mxu0 %v8731_v12  ;;  %v1238_v3 = vld [vmem:[%s9415_s25 + $0x1ef0] sm:$0xff] }
 0x33f   : > { %7446 = vmatpush1.bf16.msra.mxu1 %v8866_v10  ;;  %v8947_v7 = vcombine.high %v1234_v2, %v1238_v3  ;;  %v1098_v51 = vld [vmem:[%s9415_s25 + $0x1a90] sm:$0xff]  ;;  %v8818_v10 = vcombine.low %v1106_v45, %v1110_v1  ;;  %v8946_v12 = vcombine.low %v1234_v2, %v1238_v3  ;;  %v8020_v1 = vcombine.low %v307_v38, %v311_v17  ;;  %v275_v17 = vld [vmem:[%s9415_s25 + $0xd8] sm:$0xff] }
 0x340   : > { %7447 = vmatprep.subr.bf16.mxu1 %v8859_v13  ;;  %v1102_v48 = vld [vmem:[%s9415_s25 + $0x1ab0] sm:$0xff] }
 0x341   : > { %7407 = vmatpush1.bf16.msra.mxu0 %v8730_v25  ;;  %v1226_v9 = vld [vmem:[%s9415_s25 + $0x1e90] sm:$0xff]  ;;  %v8811_v13 = vcombine.high %v1098_v51, %v1102_v48 }
 0x342   : > { %7408 = vmatprep.subr.bf16.mxu0 %v8851_v54  ;;  %v1230_v11 = vld [vmem:[%s9415_s25 + $0x1eb0] sm:$0xff] }
 0x343   : > { %7448 = vmatpush1.bf16.msra.mxu1 %v8858_v26  ;;  %v8939_v14 = vcombine.high %v1226_v9, %v1230_v11  ;;  %v1090_v22 = vld [vmem:[%s9415_s25 + $0x1a50] sm:$0xff]  ;;  %v8810_v26 = vcombine.low %v1098_v51, %v1102_v48  ;;  %v8938_v54 = vcombine.low %v1226_v9, %v1230_v11  ;;  %v419_v48 = vld [vmem:[%s9415_s25 + $0x558] sm:$0xff] }
 0x344   : > { %7449 = vmatprep.subr.bf16.mxu1 %v8979_v30  ;;  %v1094_v21 = vld [vmem:[%s9415_s25 + $0x1a70] sm:$0xff]  ;;  %v423_v9 = vld [vmem:[%s9415_s25 + $0x578] sm:$0xff] }
 0x345   : > { %7409 = vmatpush2.bf16.msra.mxu0 %v8850_v35  ;;  %v1218_v53 = vld [vmem:[%s9415_s25 + $0x1e50] sm:$0xff]  ;;  %v8803_v30 = vcombine.high %v1090_v22, %v1094_v21 }
 0x346   : > { %7410 = vmatprep.subr.bf16.mxu0 %v8843_v37  ;;  %v1222_v25 = vld [vmem:[%s9415_s25 + $0x1e70] sm:$0xff] }
 0x347   : > { %7450 = vmatpush2.bf16.msra.mxu1 %v8978_v28  ;;  %v8931_v24 = vcombine.high %v1218_v53, %v1222_v25  ;;  %v1082_v39 = vld [vmem:[%s9415_s25 + $0x1a10] sm:$0xff]  ;;  %v8802_v28 = vcombine.low %v1090_v22, %v1094_v21  ;;  %v8930_v37 = vcombine.low %v1218_v53, %v1222_v25 }
 0x348   : > { %7451 = vmatprep.subr.bf16.mxu1 %v8971_v34  ;;  %v1086_v31 = vld [vmem:[%s9415_s25 + $0x1a30] sm:$0xff] }
 0x349   : > { %7411 = vmatpush2.bf16.msra.mxu0 %v8842_v43  ;;  %v1210_v33 = vld [vmem:[%s9415_s25 + $0x1e10] sm:$0xff]  ;;  %v8795_v34 = vcombine.high %v1082_v39, %v1086_v31  ;;  %v439_v43 = vld [vmem:[%s9415_s25 + $0x5f8] sm:$0xff] }
 0x34a   : > { %7412 = vmatprep.subr.bf16.mxu0 %v8835_v19  ;;  %v1214_v35 = vld [vmem:[%s9415_s25 + $0x1e30] sm:$0xff]  ;;  %v1292_v19 = vsub.s32 4, %v9764_v32  ;;  %v8149_v50 = vcombine.high %v435_v41, %v439_v43  ;;  %v8148_v2 = vcombine.low %v435_v41, %v439_v43  ;;  %v403_v41 = vld [vmem:[%s9415_s25 + $0x4d8] sm:$0xff] }
 0x34b   : > { %7452 = vmatpush2.bf16.msra.mxu1 %v8970_v44  ;;  %v8923_v23 = vcombine.high %v1210_v33, %v1214_v35  ;;  %v8794_v44 = vcombine.low %v1082_v39, %v1086_v31  ;;  %v411_v39 = vld [vmem:[%s9415_s25 + $0x518] sm:$0xff] }
 0x34c   : > { %7453 = vmatprep.subr.bf16.mxu1 %v8963_v46  ;;  %v8922_v46 = vcombine.low %v1210_v33, %v1214_v35  ;;  %v415_v31 = vld [vmem:[%s9415_s25 + $0x538] sm:$0xff] }
 0x34d   : > { %7413 = vmatpush2.bf16.msra.mxu0 %v8834_v60  ;;  %v303_v60 = vld [vmem:[%s9415_s25 + $0x1b8] sm:$0xff]  ;;  %v8125_v38 = vcombine.high %v411_v39, %v415_v31 }
 0x34e   : > { %7414 = vmatprep.subr.bf16.mxu0 %v8827_v0  ;;  %v431_v0 = vld [vmem:[%s9415_s25 + $0x5b8] sm:$0xff]  ;;  %v8013_v3 = vcombine.high %v299_v57, %v303_v60 }
 0x34f   : > { %7454 = vmatpush2.bf16.msra.mxu1 %v8962_v62  ;;  %v427_v62 = vld [vmem:[%s9415_s25 + $0x598] sm:$0xff] }
 0x350   : > { %7455 = vmatprep.subr.bf16.mxu1 %v8955_v52  ;;  %v9072_v52 = vld [vmem:[%s9771_s27] sm:$0xff]  ;;  %v407_v43 = vld [vmem:[%s9415_s25 + $0x4f8] sm:$0xff] }
 0x351   : > { %7415 = vmatpush2.bf16.msra.mxu0 %v8826_v63  ;;  %v1293_v45 = vrot.slane %v9072_v52, %v1292_v19  ;;  %v1297_v63 = vrot.slane %v9072_v52, %v1296_v56  ;;  %v8124_v19 = vcombine.low %v411_v39, %v415_v31  ;;  %v271_v56 = vld [vmem:[%s9415_s25 + $0xb8] sm:$0xff] }
 0x352   : > { %7416 = vmatprep.subr.bf16.mxu0 %v8819_v6  ;;  %v291_v6 = vld [vmem:[%s9415_s25 + $0x158] sm:$0xff] }
 0x353   : > { %7456 = vmatpush2.bf16.msra.mxu1 %v8954_v5  ;;  %v8141_v5 = vcombine.high %v427_v62, %v431_v0 }
 0x354   : > { %7457 = vmatprep.subr.bf16.mxu1 %v8947_v7  ;;  %v295_v7 = vld [vmem:[%s9415_s25 + $0x178] sm:$0xff] }
 0x355   : > { %7417 = vmatpush2.bf16.msra.mxu0 %v8818_v10  ;;  %v8005_v22 = vcombine.high %v291_v6, %v295_v7 }
 0x356   : > { %7418 = vmatprep.subr.bf16.mxu0 %v8811_v13 }
 0x357   : > { %7458 = vmatpush2.bf16.msra.mxu1 %v8946_v12  ;;  %v8012_v12 = vcombine.low %v299_v57, %v303_v60  ;;  %v395_v57 = vld [vmem:[%s9415_s25 + $0x498] sm:$0xff] }
 0x358   : > { %7459 = vmatprep.subr.bf16.mxu1 %v8939_v14  ;;  %v8140_v14 = vcombine.low %v427_v62, %v431_v0  ;;  %v399_v60 = vld [vmem:[%s9415_s25 + $0x4b8] sm:$0xff]  ;;  %v8116_v0 = vcombine.low %v403_v41, %v407_v43 }
 0x359   : > { %7419 = vmatpush2.bf16.msra.mxu0 %v8810_v26  ;;  %v8133_v26 = vcombine.high %v419_v48, %v423_v9 }
 0x35a   : > { %7420 = vmatprep.subr.bf16.mxu0 %v8803_v30  ;;  %v287_v30 = vld [vmem:[%s9415_s25 + $0x138] sm:$0xff] }
 0x35b   : > { %7460 = vmatpush2.bf16.msra.mxu1 %v8938_v54  ;;  %v283_v54 = vld [vmem:[%s9415_s25 + $0x118] sm:$0xff] }
 0x35c   : > { %7461 = vmatprep.subr.bf16.mxu1 %v8931_v24 }
 0x35d   : > { %7421 = vmatpush2.bf16.msra.mxu0 %v8802_v28  ;;  %v8004_v28 = vcombine.low %v291_v6, %v295_v7  ;;  %v8108_v6 = vcombine.low %v395_v57, %v399_v60 }
 0x35e   : > { %7422 = vmatprep.subr.bf16.mxu0 %v8795_v34  ;;  %v8132_v34 = vcombine.low %v419_v48, %v423_v9  ;;  %v251_v48 = vld [vmem:[%s9415_s25 + $0x18] sm:$0xff] }
 0x35f   : > { %7462 = vmatpush2.bf16.msra.mxu1 %v8930_v37  ;;  %v255_v9 = vld [vmem:[%s9415_s25 + $0x38] sm:$0xff] }
 0x360   : > { %7463 = vmatprep.subr.bf16.mxu1 %v8923_v23  ;;  %v7997_v23 = vcombine.high %v283_v54, %v287_v30 }
 0x361   : > { %7423 = vmatpush2.bf16.msra.mxu0 %v8794_v44  ;;  %v7996_v44 = vcombine.low %v283_v54, %v287_v30  ;;  %v503_v54 = vld [vmem:[%s9415_s25 + $0x7f8] sm:$0xff]  ;;  %v7964_v30 = vcombine.low %v251_v48, %v255_v9 }
 0x362   : > { %7474 = vmatprep.subr.bf16.mxu0 %v8021_v42  ;;  %v8117_v42 = vcombine.high %v403_v41, %v407_v43  ;;  %v359_v41 = vld [vmem:[%s9415_s25 + $0x378] sm:$0xff] }
 0x363   : > { %7464 = vmatpush2.bf16.msra.mxu1 %v8922_v46  ;;  %v483_v43 = vld [vmem:[%s9415_s25 + $0x758] sm:$0xff] }
 0x364   : > { %7515 = vmatprep.subr.bf16.mxu1 %v8149_v50  ;;  %v7180_v51 = vpop.f32.mrf.mxu0  ;;  %7425 = vmatmul.mubr.bf16.vlgmr.msra.gmra.mxu0 %v9779_v55  ;;  %v267_v50 = vld [vmem:[%s9415_s25 + $0x98] sm:$0xff] }
 0x365   : > { %v7181_v11 = vadd.f32 %v7180_v51, %v1293_v45  ;;  %7475 = vmatpush1.bf16.msra.mxu0 %v8020_v1  ;;  %7506 = vmatprep.mubr.bf16.mxu0 %v9457_v58  ;;  %v7981_v52 = vcombine.high %v267_v50, %v271_v56  ;;  %v8109_v45 = vcombine.high %v395_v57, %v399_v60  ;;  %v259_v1 = vld [vmem:[%s9415_s25 + $0x58] sm:$0xff] }
 0x366   : > { %v7221_v10 = vpop.f32.mrf.mxu1  ;;  %7466 = vmatmul.mubr.bf16.vlgmr.msra.gmra.mxu1 %v9785_v61  ;;  %v7182_v13 = vpop.f32.mrf.mxu0  ;;  %7476 = vmatprep.subr.bf16.mxu0 %v8013_v3  ;;  %v387_v3 = vld [vmem:[%s9415_s25 + $0x458] sm:$0xff] }
 0x367   : > { %7516 = vmatpush1.bf16.msra.mxu1 %v8148_v2  ;;  %v10400_v21 = vadd.f32 %v7221_v10, %v7181_v11  ;;  %v7183_v53 = vadd.f32 %v7182_v13, %v1297_v63  ;;  %7547 = vmatprep.mubr.bf16.mxu1 %v9461_v59  ;;  %v279_v59 = vld [vmem:[%s9415_s25 + $0xf8] sm:$0xff] }
 0x368   : > { %v7223_v25 = vpop.f32.mrf.mxu1  ;;  %7517 = vmatprep.subr.bf16.mxu1 %v8141_v5  ;;  %v7184_v24 = vpop.f32.mrf.mxu0  ;;  %v7989_v46 = vcombine.high %v275_v17, %v279_v59  ;;  %v7988_v62 = vcombine.low %v275_v17, %v279_v59  ;;  %v263_v2 = vld [vmem:[%s9415_s25 + $0x78] sm:$0xff]  ;;  %v7980_v5 = vcombine.low %v267_v50, %v271_v56 }
 0x369   : > { %v10408_v33 = vadd.f32 %v7223_v25, %v7183_v53  ;;  %7477 = vmatpush1.bf16.msra.mxu0 %v8012_v12  ;;  %v391_v63 = vld [vmem:[%s9415_s25 + $0x478] sm:$0xff]  ;;  %v7973_v7 = vcombine.high %v259_v1, %v263_v2  ;;  %v7972_v12 = vcombine.low %v259_v1, %v263_v2 }
 0x36a   : > { %v7225_v35 = vpop.f32.mrf.mxu1  ;;  %v7185_v37 = vpop.f32.mrf.mxu0  ;;  %7478 = vmatprep.subr.bf16.mxu0 %v8005_v22  ;;  %v8101_v51 = vcombine.high %v387_v3, %v391_v63  ;;  %v379_v11 = vld [vmem:[%s9415_s25 + $0x418] sm:$0xff]  ;;  %v8100_v13 = vcombine.low %v387_v3, %v391_v63 }
 0x36b   : > { %7518 = vmatpush1.bf16.msra.mxu1 %v8140_v14  ;;  %v383_v10 = vld [vmem:[%s9415_s25 + $0x438] sm:$0xff]  ;;  %v7965_v14 = vcombine.high %v251_v48, %v255_v9 }
 0x36c   : > { %v7226_v58 = vpop.f32.mrf.mxu1  ;;  %7519 = vmatprep.subr.bf16.mxu1 %v8133_v26  ;;  %v8093_v22 = vcombine.high %v379_v11, %v383_v10  ;;  %v371_v53 = vld [vmem:[%s9415_s25 + $0x3d8] sm:$0xff]  ;;  %v8092_v24 = vcombine.low %v379_v11, %v383_v10 }
 0x36d   : > { %7479 = vmatpush1.bf16.msra.mxu0 %v8004_v28  ;;  %v375_v25 = vld [vmem:[%s9415_s25 + $0x3f8] sm:$0xff] }
 0x36e   : > { %7480 = vmatprep.subr.bf16.mxu0 %v7997_v23  ;;  %v499_v26 = vld [vmem:[%s9415_s25 + $0x7d8] sm:$0xff]  ;;  %v8085_v39 = vcombine.high %v371_v53, %v375_v25  ;;  %v8084_v23 = vcombine.low %v371_v53, %v375_v25 }
 0x36f   : > { %7520 = vmatpush1.bf16.msra.mxu1 %v8132_v34  ;;  %v8213_v31 = vcombine.high %v499_v26, %v503_v54  ;;  %v363_v35 = vld [vmem:[%s9415_s25 + $0x398] sm:$0xff]  ;;  %v8212_v58 = vcombine.low %v499_v26, %v503_v54 }
 0x370   : > { %7521 = vmatprep.subr.bf16.mxu1 %v8125_v38  ;;  %v367_v28 = vld [vmem:[%s9415_s25 + $0x3b8] sm:$0xff] }
 0x371   : > { %7481 = vmatpush1.bf16.msra.mxu0 %v7996_v44  ;;  %v491_v37 = vld [vmem:[%s9415_s25 + $0x798] sm:$0xff]  ;;  %v8077_v38 = vcombine.high %v363_v35, %v367_v28 }
 0x372   : > { %7482 = vmatprep.subr.bf16.mxu0 %v7989_v46  ;;  %v495_v34 = vld [vmem:[%s9415_s25 + $0x7b8] sm:$0xff] }
 0x373   : > { %7522 = vmatpush1.bf16.msra.mxu1 %v8124_v19  ;;  %v8205_v17 = vcombine.high %v491_v37, %v495_v34  ;;  %v355_v59 = vld [vmem:[%s9415_s25 + $0x358] sm:$0xff]  ;;  %v8076_v19 = vcombine.low %v363_v35, %v367_v28  ;;  %v8204_v46 = vcombine.low %v491_v37, %v495_v34 }
 0x374   : > { %7523 = vmatprep.subr.bf16.mxu1 %v8117_v42  ;;  %v487_v44 = vld [vmem:[%s9415_s25 + $0x778] sm:$0xff]  ;;  %v8069_v42 = vcombine.high %v355_v59, %v359_v41 }
 0x375   : > { %7483 = vmatpush1.bf16.msra.mxu0 %v7988_v62  ;;  %v8197_v50 = vcombine.high %v483_v43, %v487_v44  ;;  %v347_v56 = vld [vmem:[%s9415_s25 + $0x318] sm:$0xff] }
 0x376   : > { %7484 = vmatprep.subr.bf16.mxu0 %v7981_v52  ;;  %v351_v57 = vld [vmem:[%s9415_s25 + $0x338] sm:$0xff]  ;;  %v8196_v52 = vcombine.low %v483_v43, %v487_v44 }
 0x377   : > { %7524 = vmatpush1.bf16.msra.mxu1 %v8116_v0  ;;  %v475_v60 = vld [vmem:[%s9415_s25 + $0x718] sm:$0xff]  ;;  %v8068_v0 = vcombine.low %v355_v59, %v359_v41 }
 0x378   : > { %7525 = vmatprep.subr.bf16.mxu1 %v8109_v45  ;;  %v479_v62 = vld [vmem:[%s9415_s25 + $0x738] sm:$0xff]  ;;  %v8061_v45 = vcombine.high %v347_v56, %v351_v57 }
 0x379   : > { %7485 = vmatpush1.bf16.msra.mxu0 %v7980_v5  ;;  %v8189_v1 = vcombine.high %v475_v60, %v479_v62  ;;  %v339_v2 = vld [vmem:[%s9415_s25 + $0x2d8] sm:$0xff] }
 0x37a   : > { %7486 = vmatprep.subr.bf16.mxu0 %v7973_v7  ;;  %v343_v3 = vld [vmem:[%s9415_s25 + $0x2f8] sm:$0xff]  ;;  %v8188_v7 = vcombine.low %v475_v60, %v479_v62 }
 0x37b   : > { %7526 = vmatpush1.bf16.msra.mxu1 %v8108_v6  ;;  %v467_v63 = vld [vmem:[%s9415_s25 + $0x6d8] sm:$0xff]  ;;  %v8060_v6 = vcombine.low %v347_v56, %v351_v57 }
 0x37c   : > { %7527 = vmatprep.subr.bf16.mxu1 %v8101_v51  ;;  %v471_v5 = vld [vmem:[%s9415_s25 + $0x6f8] sm:$0xff]  ;;  %v8053_v51 = vcombine.high %v339_v2, %v343_v3 }
 0x37d   : > { %7487 = vmatpush1.bf16.msra.mxu0 %v7972_v12  ;;  %v8181_v48 = vcombine.high %v467_v63, %v471_v5  ;;  %v331_v9 = vld [vmem:[%s9415_s25 + $0x298] sm:$0xff] }
 0x37e   : > { %7488 = vmatprep.subr.bf16.mxu0 %v7965_v14  ;;  %v335_v11 = vld [vmem:[%s9415_s25 + $0x2b8] sm:$0xff]  ;;  %v8180_v14 = vcombine.low %v467_v63, %v471_v5 }
 0x37f   : > { %7528 = vmatpush1.bf16.msra.mxu1 %v8100_v13  ;;  %v459_v10 = vld [vmem:[%s9415_s25 + $0x698] sm:$0xff]  ;;  %v8052_v13 = vcombine.low %v339_v2, %v343_v3 }
 0x380   : > { %7529 = vmatprep.subr.bf16.mxu1 %v8093_v22  ;;  %v463_v12 = vld [vmem:[%s9415_s25 + $0x6b8] sm:$0xff]  ;;  %v8045_v22 = vcombine.high %v331_v9, %v335_v11 }
 0x381   : > { %7489 = vmatpush1.bf16.msra.mxu0 %v7964_v30  ;;  %v8173_v53 = vcombine.high %v459_v10, %v463_v12  ;;  %v323_v25 = vld [vmem:[%s9415_s25 + $0x258] sm:$0xff] }
 0x382   : > { %7490 = vmatprep.subr.bf16.mxu0 %v8085_v39  ;;  %v327_v26 = vld [vmem:[%s9415_s25 + $0x278] sm:$0xff]  ;;  %v8172_v39 = vcombine.low %v459_v10, %v463_v12 }
 0x383   : > { %7530 = vmatpush1.bf16.msra.mxu1 %v8092_v24  ;;  %v451_v54 = vld [vmem:[%s9415_s25 + $0x658] sm:$0xff]  ;;  %v8044_v24 = vcombine.low %v331_v9, %v335_v11 }
 0x384   : > { %7531 = vmatprep.subr.bf16.mxu1 %v8213_v31  ;;  %v455_v30 = vld [vmem:[%s9415_s25 + $0x678] sm:$0xff]  ;;  %v8037_v31 = vcombine.high %v323_v25, %v327_v26 }
 0x385   : > { %7491 = vmatpush2.bf16.msra.mxu0 %v8084_v23  ;;  %v8165_v35 = vcombine.high %v451_v54, %v455_v30  ;;  %v315_v28 = vld [vmem:[%s9415_s25 + $0x218] sm:$0xff] }
 0x386   : > { %7492 = vmatprep.subr.bf16.mxu0 %v8077_v38  ;;  %v319_v37 = vld [vmem:[%s9415_s25 + $0x238] sm:$0xff]  ;;  %v8164_v38 = vcombine.low %v451_v54, %v455_v30 }
 0x387   : > { %7532 = vmatpush2.bf16.msra.mxu1 %v8212_v58  ;;  %v443_v34 = vld [vmem:[%s9415_s25 + $0x618] sm:$0xff]  ;;  %v8036_v58 = vcombine.low %v323_v25, %v327_v26 }
 0x388   : > { %7533 = vmatprep.subr.bf16.mxu1 %v8205_v17  ;;  %v447_v23 = vld [vmem:[%s9415_s25 + $0x638] sm:$0xff]  ;;  %v8029_v17 = vcombine.high %v315_v28, %v319_v37 }
 0x389   : > { %7493 = vmatpush2.bf16.msra.mxu0 %v8076_v19  ;;  %v8157_v59 = vcombine.high %v443_v34, %v447_v23  ;;  %v563_v41 = vld [vmem:[%s9415_s25 + $0x9d8] sm:$0xff] }
 0x38a   : > { %7494 = vmatprep.subr.bf16.mxu0 %v8069_v42  ;;  %v567_v43 = vld [vmem:[%s9415_s25 + $0x9f8] sm:$0xff]  ;;  %v8156_v42 = vcombine.low %v443_v34, %v447_v23 }
 0x38b   : > { %7534 = vmatpush2.bf16.msra.mxu1 %v8204_v46  ;;  %v691_v44 = vld [vmem:[%s9415_s25 + $0xdd8] sm:$0xff]  ;;  %v8028_v46 = vcombine.low %v315_v28, %v319_v37 }
 0x38c   : > { %7535 = vmatprep.subr.bf16.mxu1 %v8197_v50  ;;  %v695_v19 = vld [vmem:[%s9415_s25 + $0xdf8] sm:$0xff]  ;;  %v8277_v50 = vcombine.high %v563_v41, %v567_v43 }
 0x38d   : > { %7495 = vmatpush2.bf16.msra.mxu0 %v8068_v0  ;;  %v8405_v56 = vcombine.high %v691_v44, %v695_v19  ;;  %v555_v57 = vld [vmem:[%s9415_s25 + $0x998] sm:$0xff] }
 0x38e   : > { %7496 = vmatprep.subr.bf16.mxu0 %v8061_v45  ;;  %v559_v60 = vld [vmem:[%s9415_s25 + $0x9b8] sm:$0xff]  ;;  %v8404_v45 = vcombine.low %v691_v44, %v695_v19 }
 0x38f   : > { %7536 = vmatpush2.bf16.msra.mxu1 %v8196_v52  ;;  %v683_v62 = vld [vmem:[%s9415_s25 + $0xd98] sm:$0xff]  ;;  %v8276_v52 = vcombine.low %v563_v41, %v567_v43  ;;  %v8268_v9 = vcombine.low %v555_v57, %v559_v60 }
 0x390   : > { %7537 = vmatprep.subr.bf16.mxu1 %v8189_v1  ;;  %v687_v0 = vld [vmem:[%s9415_s25 + $0xdb8] sm:$0xff]  ;;  %v8269_v1 = vcombine.high %v555_v57, %v559_v60 }
 0x391   : > { %7497 = vmatpush2.bf16.msra.mxu0 %v8060_v6  ;;  %v8397_v2 = vcombine.high %v683_v62, %v687_v0  ;;  %v547_v3 = vld [vmem:[%s9415_s25 + $0x958] sm:$0xff]  ;;  %v8396_v10 = vcombine.low %v683_v62, %v687_v0 }
 0x392   : > { %7498 = vmatprep.subr.bf16.mxu0 %v8053_v51  ;;  %v551_v63 = vld [vmem:[%s9415_s25 + $0x978] sm:$0xff] }
 0x393   : > { %7538 = vmatpush2.bf16.msra.mxu1 %v8188_v7  ;;  %v675_v6 = vld [vmem:[%s9415_s25 + $0xd58] sm:$0xff]  ;;  %v8261_v12 = vcombine.high %v547_v3, %v551_v63 }
 0x394   : > { %7539 = vmatprep.subr.bf16.mxu1 %v8181_v48  ;;  %v679_v7 = vld [vmem:[%s9415_s25 + $0xd78] sm:$0xff] }
 0x395   : > { %7499 = vmatpush2.bf16.msra.mxu0 %v8052_v13  ;;  %v667_v25 = vld [vmem:[%s9415_s25 + $0xd18] sm:$0xff] }
 0x396   : > { %7500 = vmatprep.subr.bf16.mxu0 %v8045_v22  ;;  %v539_v22 = vld [vmem:[%s9415_s25 + $0x918] sm:$0xff] }
 0x397   : > { %7540 = vmatpush2.bf16.msra.mxu1 %v8180_v14  ;;  %v671_v26 = vld [vmem:[%s9415_s25 + $0xd38] sm:$0xff] }
 0x398   : > { %7541 = vmatprep.subr.bf16.mxu1 %v8173_v53  ;;  %v543_v53 = vld [vmem:[%s9415_s25 + $0x938] sm:$0xff] }
 0x399   : > { %7501 = vmatpush2.bf16.msra.mxu0 %v8044_v24  ;;  %v531_v28 = vld [vmem:[%s9415_s25 + $0x8d8] sm:$0xff]  ;;  %v8252_v23 = vcombine.low %v539_v22, %v543_v53 }
 0x39a   : > { %7502 = vmatprep.subr.bf16.mxu0 %v8037_v31  ;;  %v8253_v31 = vcombine.high %v539_v22, %v543_v53  ;;  %v659_v37 = vld [vmem:[%s9415_s25 + $0xcd8] sm:$0xff] }
 0x39b   : > { %7542 = vmatpush2.bf16.msra.mxu1 %v8172_v39  ;;  %v8388_v39 = vcombine.low %v675_v6, %v679_v7  ;;  %v663_v34 = vld [vmem:[%s9415_s25 + $0xcf8] sm:$0xff] }
 0x39c   : > { %7543 = vmatprep.subr.bf16.mxu1 %v8165_v35  ;;  %v8381_v35 = vcombine.high %v667_v25, %v671_v26  ;;  %v527_v41 = vld [vmem:[%s9415_s25 + $0x8b8] sm:$0xff] }
 0x39d   : > { %7503 = vmatpush2.bf16.msra.mxu0 %v8036_v58  ;;  %v8380_v58 = vcombine.low %v667_v25, %v671_v26  ;;  %v651_v43 = vld [vmem:[%s9415_s25 + $0xc98] sm:$0xff] }
 0x39e   : > { %7504 = vmatprep.subr.bf16.mxu0 %v8029_v17  ;;  %v8373_v17 = vcombine.high %v659_v37, %v663_v34  ;;  %v655_v44 = vld [vmem:[%s9415_s25 + $0xcb8] sm:$0xff] }
 0x39f   : > { %7544 = vmatpush2.bf16.msra.mxu1 %v8164_v38  ;;  %v519_v57 = vld [vmem:[%s9415_s25 + $0x878] sm:$0xff] }
 0x3a0   : > { %7545 = vmatprep.subr.bf16.mxu1 %v8157_v59  ;;  %v523_v59 = vld [vmem:[%s9415_s25 + $0x898] sm:$0xff] }
 0x3a1   : > { %7505 = vmatpush2.bf16.msra.mxu0 %v8028_v46  ;;  %v8372_v46 = vcombine.low %v659_v37, %v663_v34  ;;  %v643_v60 = vld [vmem:[%s9415_s25 + $0xc58] sm:$0xff]  ;;  %v8236_v0 = vcombine.low %v523_v59, %v527_v41 }
 0x3a2   : > { %7556 = vmatprep.subr.bf16.mxu0 %v8277_v50  ;;  %v8365_v50 = vcombine.high %v651_v43, %v655_v44  ;;  %v647_v62 = vld [vmem:[%s9415_s25 + $0xc78] sm:$0xff] }
 0x3a3   : > { %7546 = vmatpush2.bf16.msra.mxu1 %v8156_v42  ;;  %v8237_v42 = vcombine.high %v523_v59, %v527_v41  ;;  %v619_v53 = vld [vmem:[%s9415_s25 + $0xb98] sm:$0xff] }
 0x3a4   : > { %7597 = vmatprep.subr.bf16.mxu1 %v8405_v56  ;;  %v7262_v5 = vpop.f32.mrf.mxu0  ;;  %7507 = vmatmul.mubr.bf16.vlgmr.msra.gmra.mxu0 %v9507_v16  ;;  %v515_v56 = vld [vmem:[%s9415_s25 + $0x858] sm:$0xff] }
 0x3a5   : > { %v7263_v51 = vadd.f32 %v7262_v5, %v10400_v21  ;;  %7557 = vmatpush1.bf16.msra.mxu0 %v8276_v52  ;;  %v8389_v21 = vcombine.high %v675_v6, %v679_v7  ;;  %7588 = vmatprep.mubr.bf16.mxu0 %v9523_v27  ;;  %v8364_v52 = vcombine.low %v651_v43, %v655_v44  ;;  %v639_v5 = vld [vmem:[%s9415_s25 + $0xc38] sm:$0xff] }
 0x3a6   : > { %v7303_v48 = vpop.f32.mrf.mxu1  ;;  %7548 = vmatmul.mubr.bf16.vlgmr.msra.gmra.mxu1 %v9515_v20  ;;  %v7264_v11 = vpop.f32.mrf.mxu0  ;;  %7558 = vmatprep.subr.bf16.mxu0 %v8269_v1  ;;  %v8357_v1 = vcombine.high %v643_v60, %v647_v62  ;;  %v8228_v6 = vcombine.low %v515_v56, %v519_v57  ;;  %v8356_v7 = vcombine.low %v643_v60, %v647_v62  ;;  %v747_v25 = vld [vmem:[%s9415_s25 + $0xf98] sm:$0xff] }
 0x3a7   : > { %7598 = vmatpush1.bf16.msra.mxu1 %v8404_v45  ;;  %v10473_v13 = vadd.f32 %v7303_v48, %v7263_v51  ;;  %v7265_v16 = vadd.f32 %v7264_v11, %v10408_v33  ;;  %7629 = vmatprep.mubr.bf16.mxu1 %v9530_v29  ;;  %v8260_v33 = vcombine.low %v547_v3, %v551_v63  ;;  %v535_v29 = vld [vmem:[%s9415_s25 + $0x8f8] sm:$0xff] }
 0x3a8   : > { %v7305_v14 = vpop.f32.mrf.mxu1  ;;  %7599 = vmatprep.subr.bf16.mxu1 %v8397_v2  ;;  %v7266_v20 = vpop.f32.mrf.mxu0  ;;  %v8245_v38 = vcombine.high %v531_v28, %v535_v29  ;;  %v8244_v19 = vcombine.low %v531_v28, %v535_v29  ;;  %v8229_v45 = vcombine.high %v515_v56, %v519_v57  ;;  %v507_v2 = vld [vmem:[%s9415_s25 + $0x818] sm:$0xff] }
 0x3a9   : > { %v10482_v54 = vadd.f32 %v7305_v14, %v7265_v16  ;;  %7559 = vmatpush1.bf16.msra.mxu0 %v8268_v9  ;;  %v511_v3 = vld [vmem:[%s9415_s25 + $0x838] sm:$0xff] }
 0x3aa   : > { %v7307_v30 = vpop.f32.mrf.mxu1  ;;  %v7267_v24 = vpop.f32.mrf.mxu0  ;;  %7560 = vmatprep.subr.bf16.mxu0 %v8261_v12  ;;  %v635_v63 = vld [vmem:[%s9415_s25 + $0xc18] sm:$0xff]  ;;  %v8221_v51 = vcombine.high %v507_v2, %v511_v3  ;;  %v8220_v16 = vcombine.low %v507_v2, %v511_v3 }
 0x3ab   : > { %7600 = vmatpush1.bf16.msra.mxu1 %v8396_v10  ;;  %v8349_v48 = vcombine.high %v635_v63, %v639_v5  ;;  %v627_v9 = vld [vmem:[%s9415_s25 + $0xbd8] sm:$0xff]  ;;  %v8348_v14 = vcombine.low %v635_v63, %v639_v5 }
 0x3ac   : > { %v7308_v27 = vpop.f32.mrf.mxu1  ;;  %7601 = vmatprep.subr.bf16.mxu1 %v8389_v21  ;;  %v631_v11 = vld [vmem:[%s9415_s25 + $0xbf8] sm:$0xff] }
 0x3ad   : > { %7561 = vmatpush1.bf16.msra.mxu0 %v8260_v33  ;;  %v755_v10 = vld [vmem:[%s9415_s25 + $0xfd8] sm:$0xff]  ;;  %v8341_v21 = vcombine.high %v627_v9, %v631_v11  ;;  %v8340_v30 = vcombine.low %v627_v9, %v631_v11 }
 0x3ae   : > { %7562 = vmatprep.subr.bf16.mxu0 %v8253_v31  ;;  %v759_v12 = vld [vmem:[%s9415_s25 + $0xff8] sm:$0xff] }
 0x3af   : > { %7602 = vmatpush1.bf16.msra.mxu1 %v8388_v39  ;;  %v8469_v22 = vcombine.high %v755_v10, %v759_v12  ;;  %v623_v20 = vld [vmem:[%s9415_s25 + $0xbb8] sm:$0xff]  ;;  %v8468_v33 = vcombine.low %v755_v10, %v759_v12 }
 0x3b0   : > { %7603 = vmatprep.subr.bf16.mxu1 %v8381_v35  ;;  %v751_v26 = vld [vmem:[%s9415_s25 + $0xfb8] sm:$0xff]  ;;  %v8333_v24 = vcombine.high %v619_v53, %v623_v20  ;;  %v8332_v29 = vcombine.low %v619_v53, %v623_v20 }
 0x3b1   : > { %7563 = vmatpush1.bf16.msra.mxu0 %v8252_v23  ;;  %v8461_v39 = vcombine.high %v747_v25, %v751_v26  ;;  %v611_v31 = vld [vmem:[%s9415_s25 + $0xb58] sm:$0xff]  ;;  %v8460_v37 = vcombine.low %v747_v25, %v751_v26 }
 0x3b2   : > { %7564 = vmatprep.subr.bf16.mxu0 %v8245_v38  ;;  %v615_v27 = vld [vmem:[%s9415_s25 + $0xb78] sm:$0xff] }
 0x3b3   : > { %7604 = vmatpush1.bf16.msra.mxu1 %v8380_v58  ;;  %v739_v35 = vld [vmem:[%s9415_s25 + $0xf58] sm:$0xff]  ;;  %v8325_v34 = vcombine.high %v611_v31, %v615_v27  ;;  %v8324_v41 = vcombine.low %v611_v31, %v615_v27 }
 0x3b4   : > { %7605 = vmatprep.subr.bf16.mxu1 %v8373_v17  ;;  %v743_v28 = vld [vmem:[%s9415_s25 + $0xf78] sm:$0xff] }
 0x3b5   : > { %7565 = vmatpush1.bf16.msra.mxu0 %v8244_v19  ;;  %v8453_v23 = vcombine.high %v739_v35, %v743_v28  ;;  %v603_v58 = vld [vmem:[%s9415_s25 + $0xb18] sm:$0xff]  ;;  %v8452_v43 = vcombine.low %v739_v35, %v743_v28 }
 0x3b6   : > { %7566 = vmatprep.subr.bf16.mxu0 %v8237_v42  ;;  %v607_v38 = vld [vmem:[%s9415_s25 + $0xb38] sm:$0xff] }
 0x3b7   : > { %7606 = vmatpush1.bf16.msra.mxu1 %v8372_v46  ;;  %v731_v17 = vld [vmem:[%s9415_s25 + $0xf18] sm:$0xff]  ;;  %v8317_v44 = vcombine.high %v603_v58, %v607_v38  ;;  %v8316_v57 = vcombine.low %v603_v58, %v607_v38 }
 0x3b8   : > { %7607 = vmatprep.subr.bf16.mxu1 %v8365_v50  ;;  %v735_v59 = vld [vmem:[%s9415_s25 + $0xf38] sm:$0xff] }
 0x3b9   : > { %7567 = vmatpush1.bf16.msra.mxu0 %v8236_v0  ;;  %v8445_v19 = vcombine.high %v731_v17, %v735_v59  ;;  %v595_v46 = vld [vmem:[%s9415_s25 + $0xad8] sm:$0xff]  ;;  %v8444_v60 = vcombine.low %v731_v17, %v735_v59 }
 0x3ba   : > { %7568 = vmatprep.subr.bf16.mxu0 %v8229_v45  ;;  %v599_v42 = vld [vmem:[%s9415_s25 + $0xaf8] sm:$0xff] }
 0x3bb   : > { %7608 = vmatpush1.bf16.msra.mxu1 %v8364_v52  ;;  %v723_v50 = vld [vmem:[%s9415_s25 + $0xed8] sm:$0xff]  ;;  %v8309_v62 = vcombine.high %v595_v46, %v599_v42  ;;  %v8308_v3 = vcombine.low %v595_v46, %v599_v42 }
 0x3bc   : > { %7609 = vmatprep.subr.bf16.mxu1 %v8357_v1  ;;  %v727_v56 = vld [vmem:[%s9415_s25 + $0xef8] sm:$0xff] }
 0x3bd   : > { %7569 = vmatpush1.bf16.msra.mxu0 %v8228_v6  ;;  %v8437_v0 = vcombine.high %v723_v50, %v727_v56  ;;  %v587_v52 = vld [vmem:[%s9415_s25 + $0xa98] sm:$0xff]  ;;  %v8436_v63 = vcombine.low %v723_v50, %v727_v56 }
 0x3be   : > { %7570 = vmatprep.subr.bf16.mxu0 %v8221_v51  ;;  %v591_v45 = vld [vmem:[%s9415_s25 + $0xab8] sm:$0xff] }
 0x3bf   : > { %7610 = vmatpush1.bf16.msra.mxu1 %v8356_v7  ;;  %v715_v1 = vld [vmem:[%s9415_s25 + $0xe98] sm:$0xff]  ;;  %v8301_v5 = vcombine.high %v587_v52, %v591_v45  ;;  %v8300_v11 = vcombine.low %v587_v52, %v591_v45 }
 0x3c0   : > { %7611 = vmatprep.subr.bf16.mxu1 %v8349_v48  ;;  %v719_v2 = vld [vmem:[%s9415_s25 + $0xeb8] sm:$0xff] }
 0x3c1   : > { %7571 = vmatpush1.bf16.msra.mxu0 %v8220_v16  ;;  %v8429_v6 = vcombine.high %v715_v1, %v719_v2  ;;  %v579_v7 = vld [vmem:[%s9415_s25 + $0xa58] sm:$0xff]  ;;  %v8428_v10 = vcombine.low %v715_v1, %v719_v2 }
 0x3c2   : > { %7572 = vmatprep.subr.bf16.mxu0 %v8341_v21  ;;  %v583_v51 = vld [vmem:[%s9415_s25 + $0xa78] sm:$0xff] }
 0x3c3   : > { %7612 = vmatpush1.bf16.msra.mxu1 %v8348_v14  ;;  %v707_v48 = vld [vmem:[%s9415_s25 + $0xe58] sm:$0xff]  ;;  %v8293_v12 = vcombine.high %v579_v7, %v583_v51  ;;  %v8292_v20 = vcombine.low %v579_v7, %v583_v51 }
 0x3c4   : > { %7613 = vmatprep.subr.bf16.mxu1 %v8469_v22  ;;  %v711_v9 = vld [vmem:[%s9415_s25 + $0xe78] sm:$0xff] }
 0x3c5   : > { %7573 = vmatpush2.bf16.msra.mxu0 %v8340_v30  ;;  %v8421_v16 = vcombine.high %v707_v48, %v711_v9  ;;  %v571_v14 = vld [vmem:[%s9415_s25 + $0xa18] sm:$0xff]  ;;  %v8420_v25 = vcombine.low %v707_v48, %v711_v9 }
 0x3c6   : > { %7574 = vmatprep.subr.bf16.mxu0 %v8333_v24  ;;  %v575_v21 = vld [vmem:[%s9415_s25 + $0xa38] sm:$0xff] }
 0x3c7   : > { %7614 = vmatpush2.bf16.msra.mxu1 %v8468_v33  ;;  %v699_v22 = vld [vmem:[%s9415_s25 + $0xe18] sm:$0xff]  ;;  %v8285_v26 = vcombine.high %v571_v14, %v575_v21  ;;  %v8284_v27 = vcombine.low %v571_v14, %v575_v21 }
 0x3c8   : > { %7615 = vmatprep.subr.bf16.mxu1 %v8461_v39  ;;  %v703_v53 = vld [vmem:[%s9415_s25 + $0xe38] sm:$0xff] }
 0x3c9   : > { %7575 = vmatpush2.bf16.msra.mxu0 %v8332_v29  ;;  %v8413_v30 = vcombine.high %v699_v22, %v703_v53  ;;  %v819_v33 = vld [vmem:[%s9415_s25 + $0x11d8] sm:$0xff]  ;;  %v8412_v35 = vcombine.low %v699_v22, %v703_v53 }
 0x3ca   : > { %7576 = vmatprep.subr.bf16.mxu0 %v8325_v34  ;;  %v823_v24 = vld [vmem:[%s9415_s25 + $0x11f8] sm:$0xff] }
 0x3cb   : > { %7616 = vmatpush2.bf16.msra.mxu1 %v8460_v37  ;;  %v947_v39 = vld [vmem:[%s9415_s25 + $0x15d8] sm:$0xff]  ;;  %v8533_v28 = vcombine.high %v819_v33, %v823_v24  ;;  %v8532_v38 = vcombine.low %v819_v33, %v823_v24 }
 0x3cc   : > { %7617 = vmatprep.subr.bf16.mxu1 %v8453_v23  ;;  %v951_v31 = vld [vmem:[%s9415_s25 + $0x15f8] sm:$0xff] }
 0x3cd   : > { %7577 = vmatpush2.bf16.msra.mxu0 %v8324_v41  ;;  %v8661_v29 = vcombine.high %v947_v39, %v951_v31  ;;  %v811_v37 = vld [vmem:[%s9415_s25 + $0x1198] sm:$0xff]  ;;  %v8660_v17 = vcombine.low %v947_v39, %v951_v31 }
 0x3ce   : > { %7578 = vmatprep.subr.bf16.mxu0 %v8317_v44  ;;  %v815_v34 = vld [vmem:[%s9415_s25 + $0x11b8] sm:$0xff] }
 0x3cf   : > { %7618 = vmatpush2.bf16.msra.mxu1 %v8452_v43  ;;  %v939_v23 = vld [vmem:[%s9415_s25 + $0x1598] sm:$0xff]  ;;  %v8525_v59 = vcombine.high %v811_v37, %v815_v34  ;;  %v8524_v56 = vcombine.low %v811_v37, %v815_v34 }
 0x3d0   : > { %7619 = vmatprep.subr.bf16.mxu1 %v8445_v19  ;;  %v943_v58 = vld [vmem:[%s9415_s25 + $0x15b8] sm:$0xff] }
 0x3d1   : > { %7579 = vmatpush2.bf16.msra.mxu0 %v8316_v57  ;;  %v8653_v41 = vcombine.high %v939_v23, %v943_v58  ;;  %v803_v43 = vld [vmem:[%s9415_s25 + $0x1158] sm:$0xff] }
 0x3d2   : > { %7580 = vmatprep.subr.bf16.mxu0 %v8309_v62  ;;  %v807_v44 = vld [vmem:[%s9415_s25 + $0x1178] sm:$0xff] }
 0x3d3   : > { %7620 = vmatpush2.bf16.msra.mxu1 %v8444_v60  ;;  %v931_v46 = vld [vmem:[%s9415_s25 + $0x1558] sm:$0xff]  ;;  %v8652_v60 = vcombine.low %v939_v23, %v943_v58  ;;  %v8517_v62 = vcombine.high %v803_v43, %v807_v44 }
 0x3d4   : > { %7621 = vmatprep.subr.bf16.mxu1 %v8437_v0  ;;  %v935_v42 = vld [vmem:[%s9415_s25 + $0x1578] sm:$0xff] }
 0x3d5   : > { %7581 = vmatpush2.bf16.msra.mxu0 %v8308_v3  ;;  %v795_v52 = vld [vmem:[%s9415_s25 + $0x1118] sm:$0xff] }
 0x3d6   : > { %7582 = vmatprep.subr.bf16.mxu0 %v8301_v5  ;;  %v799_v45 = vld [vmem:[%s9415_s25 + $0x1138] sm:$0xff] }
 0x3d7   : > { %7622 = vmatpush2.bf16.msra.mxu1 %v8436_v63  ;;  %v927_v2 = vld [vmem:[%s9415_s25 + $0x1538] sm:$0xff]  ;;  %v8516_v63 = vcombine.low %v803_v43, %v807_v44  ;;  %v8509_v7 = vcombine.high %v795_v52, %v799_v45 }
 0x3d8   : > { %7623 = vmatprep.subr.bf16.mxu1 %v8429_v6  ;;  %v8644_v6 = vcombine.low %v931_v46, %v935_v42  ;;  %v787_v48 = vld [vmem:[%s9415_s25 + $0x10d8] sm:$0xff] }
 0x3d9   : > { %7583 = vmatpush2.bf16.msra.mxu0 %v8300_v11  ;;  %v791_v9 = vld [vmem:[%s9415_s25 + $0x10f8] sm:$0xff] }
 0x3da   : > { %7584 = vmatprep.subr.bf16.mxu0 %v8293_v12  ;;  %v915_v11 = vld [vmem:[%s9415_s25 + $0x14d8] sm:$0xff] }
 0x3db   : > { %7624 = vmatpush2.bf16.msra.mxu1 %v8428_v10  ;;  %v919_v10 = vld [vmem:[%s9415_s25 + $0x14f8] sm:$0xff] }
 0x3dc   : > { %7625 = vmatprep.subr.bf16.mxu1 %v8421_v16  ;;  %v8501_v16 = vcombine.high %v787_v48, %v791_v9  ;;  %v8629_v14 = vcombine.high %v915_v11, %v919_v10  ;;  %v779_v21 = vld [vmem:[%s9415_s25 + $0x1098] sm:$0xff] }
 0x3dd   : > { %7585 = vmatpush2.bf16.msra.mxu0 %v8292_v20  ;;  %v783_v22 = vld [vmem:[%s9415_s25 + $0x10b8] sm:$0xff] }
 0x3de   : > { %7586 = vmatprep.subr.bf16.mxu0 %v8285_v26  ;;  %v907_v53 = vld [vmem:[%s9415_s25 + $0x1498] sm:$0xff]  ;;  %v8628_v26 = vcombine.low %v915_v11, %v919_v10 }
 0x3df   : > { %7626 = vmatpush2.bf16.msra.mxu1 %v8420_v25  ;;  %v911_v20 = vld [vmem:[%s9415_s25 + $0x14b8] sm:$0xff]  ;;  %v8500_v25 = vcombine.low %v787_v48, %v791_v9 }
 0x3e0   : > { %7627 = vmatprep.subr.bf16.mxu1 %v8413_v30  ;;  %v8493_v30 = vcombine.high %v779_v21, %v783_v22  ;;  %v8621_v33 = vcombine.high %v907_v53, %v911_v20  ;;  %v771_v24 = vld [vmem:[%s9415_s25 + $0x1058] sm:$0xff] }
 0x3e1   : > { %7587 = vmatpush2.bf16.msra.mxu0 %v8284_v27  ;;  %v775_v39 = vld [vmem:[%s9415_s25 + $0x1078] sm:$0xff] }
 0x3e2   : > { %7638 = vmatprep.subr.bf16.mxu0 %v8533_v28  ;;  %v899_v31 = vld [vmem:[%s9415_s25 + $0x1458] sm:$0xff]  ;;  %v8620_v28 = vcombine.low %v907_v53, %v911_v20 }
 0x3e3   : > { %7628 = vmatpush2.bf16.msra.mxu1 %v8412_v35  ;;  %v903_v27 = vld [vmem:[%s9415_s25 + $0x1478] sm:$0xff]  ;;  %v8492_v35 = vcombine.low %v779_v21, %v783_v22 }
 0x3e4   : > { %7679 = vmatprep.subr.bf16.mxu1 %v8661_v29  ;;  %v10542_v19 = vpop.f32.mrf.mxu0  ;;  %7589 = vmatmul.mubr.bf16.vlgmr.msra.gmra.mxu0 %v9595_v36  ;;  %v8645_v36 = vcombine.high %v931_v46, %v935_v42  ;;  %v8485_v29 = vcombine.high %v771_v24, %v775_v39  ;;  %v8613_v37 = vcombine.high %v899_v31, %v903_v27  ;;  %v763_v34 = vld [vmem:[%s9415_s25 + $0x1018] sm:$0xff] }
 0x3e5   : > { %7639 = vmatpush1.bf16.msra.mxu0 %v8532_v38  ;;  %7670 = vmatprep.mubr.bf16.mxu0 %v9611_v47  ;;  %v767_v23 = vld [vmem:[%s9415_s25 + $0x1038] sm:$0xff] }
 0x3e6   : > { %v10547_v50 = vpop.f32.mrf.mxu1  ;;  %7630 = vmatmul.mubr.bf16.vlgmr.msra.gmra.mxu1 %v9603_v40  ;;  %v10550_v57 = vpop.f32.mrf.mxu0  ;;  %7640 = vmatprep.subr.bf16.mxu0 %v8525_v59  ;;  %v923_v40 = vld [vmem:[%s9415_s25 + $0x1518] sm:$0xff]  ;;  %v8612_v59 = vcombine.low %v899_v31, %v903_v27 }
 0x3e7   : > { %7680 = vmatpush1.bf16.msra.mxu1 %v8660_v17  ;;  %7711 = vmatprep.mubr.bf16.mxu1 %v9618_v49  ;;  %v8637_v47 = vcombine.high %v923_v40, %v927_v2  ;;  %v8508_v49 = vcombine.low %v795_v52, %v799_v45  ;;  %v8636_v12 = vcombine.low %v923_v40, %v927_v2  ;;  %v891_v58 = vld [vmem:[%s9415_s25 + $0x1418] sm:$0xff] }
 0x3e8   : > { %v10552_v0 = vpop.f32.mrf.mxu1  ;;  %7681 = vmatprep.subr.bf16.mxu1 %v8653_v41  ;;  %v7348_v1 = vpop.f32.mrf.mxu0  ;;  %v895_v38 = vld [vmem:[%s9415_s25 + $0x1438] sm:$0xff]  ;;  %v8484_v17 = vcombine.low %v771_v24, %v775_v39  ;;  %v8477_v41 = vcombine.high %v763_v34, %v767_v23 }
 0x3e9   : > { %7641 = vmatpush1.bf16.msra.mxu0 %v8524_v56  ;;  %v8605_v43 = vcombine.high %v891_v58, %v895_v38  ;;  %v883_v44 = vld [vmem:[%s9415_s25 + $0x13d8] sm:$0xff] }
 0x3ea   : > { %v7389_v3 = vpop.f32.mrf.mxu1  ;;  %v7349_v5 = vpop.f32.mrf.mxu0  ;;  %7642 = vmatprep.subr.bf16.mxu0 %v8517_v62  ;;  %v887_v46 = vld [vmem:[%s9415_s25 + $0x13f8] sm:$0xff]  ;;  %v8604_v62 = vcombine.low %v891_v58, %v895_v38 }
 0x3eb   : > { %7682 = vmatpush1.bf16.msra.mxu1 %v8652_v60  ;;  %v1011_v42 = vld [vmem:[%s9415_s25 + $0x17d8] sm:$0xff]  ;;  %v8476_v60 = vcombine.low %v763_v34, %v767_v23  ;;  %v8596_v3 = vcombine.low %v883_v44, %v887_v46 }
 0x3ec   : > { %v7390_v51 = vpop.f32.mrf.mxu1  ;;  %7683 = vmatprep.subr.bf16.mxu1 %v8645_v36  ;;  %v1015_v56 = vld [vmem:[%s9415_s25 + $0x17f8] sm:$0xff]  ;;  %v8597_v36 = vcombine.high %v883_v44, %v887_v46 }
 0x3ed   : > { %7643 = vmatpush1.bf16.msra.mxu0 %v8516_v63  ;;  %v8725_v52 = vcombine.high %v1011_v42, %v1015_v56  ;;  %v875_v45 = vld [vmem:[%s9415_s25 + $0x1398] sm:$0xff]  ;;  %v8724_v63 = vcombine.low %v1011_v42, %v1015_v56 }
 0x3ee   : > { %7644 = vmatprep.subr.bf16.mxu0 %v8509_v7  ;;  %v879_v1 = vld [vmem:[%s9415_s25 + $0x13b8] sm:$0xff] }
 0x3ef   : > { %7684 = vmatpush1.bf16.msra.mxu1 %v8644_v6  ;;  %v1003_v40 = vld [vmem:[%s9415_s25 + $0x1798] sm:$0xff]  ;;  %v8589_v5 = vcombine.high %v875_v45, %v879_v1  ;;  %v8588_v9 = vcombine.low %v875_v45, %v879_v1 }
 0x3f0   : > { %7685 = vmatprep.subr.bf16.mxu1 %v8637_v47  ;;  %v1007_v2 = vld [vmem:[%s9415_s25 + $0x17b8] sm:$0xff] }
 0x3f1   : > { %7645 = vmatpush1.bf16.msra.mxu0 %v8508_v49  ;;  %v8717_v6 = vcombine.high %v1003_v40, %v1007_v2  ;;  %v867_v7 = vld [vmem:[%s9415_s25 + $0x1358] sm:$0xff]  ;;  %v8716_v11 = vcombine.low %v1003_v40, %v1007_v2 }
 0x3f2   : > { %7646 = vmatprep.subr.bf16.mxu0 %v8501_v16  ;;  %v871_v51 = vld [vmem:[%s9415_s25 + $0x1378] sm:$0xff] }
 0x3f3   : > { %7686 = vmatpush1.bf16.msra.mxu1 %v8636_v12  ;;  %v995_v47 = vld [vmem:[%s9415_s25 + $0x1758] sm:$0xff]  ;;  %v8581_v10 = vcombine.high %v867_v7, %v871_v51  ;;  %v8580_v22 = vcombine.low %v867_v7, %v871_v51 }
 0x3f4   : > { %7687 = vmatprep.subr.bf16.mxu1 %v8629_v14  ;;  %v999_v48 = vld [vmem:[%s9415_s25 + $0x1778] sm:$0xff] }
 0x3f5   : > { %7647 = vmatpush1.bf16.msra.mxu0 %v8500_v25  ;;  %v8709_v49 = vcombine.high %v995_v47, %v999_v48  ;;  %v859_v12 = vld [vmem:[%s9415_s25 + $0x1318] sm:$0xff]  ;;  %v8708_v53 = vcombine.low %v995_v47, %v999_v48 }
 0x3f6   : > { %7648 = vmatprep.subr.bf16.mxu0 %v8493_v30  ;;  %v863_v16 = vld [vmem:[%s9415_s25 + $0x1338] sm:$0xff] }
 0x3f7   : > { %7688 = vmatpush1.bf16.msra.mxu1 %v8628_v26  ;;  %v987_v14 = vld [vmem:[%s9415_s25 + $0x1718] sm:$0xff]  ;;  %v8573_v20 = vcombine.high %v859_v12, %v863_v16  ;;  %v8572_v39 = vcombine.low %v859_v12, %v863_v16 }
 0x3f8   : > { %7689 = vmatprep.subr.bf16.mxu1 %v8621_v33  ;;  %v991_v21 = vld [vmem:[%s9415_s25 + $0x1738] sm:$0xff] }
 0x3f9   : > { %7649 = vmatpush1.bf16.msra.mxu0 %v8492_v35  ;;  %v8701_v25 = vcombine.high %v987_v14, %v991_v21  ;;  %v851_v26 = vld [vmem:[%s9415_s25 + $0x12d8] sm:$0xff]  ;;  %v8700_v31 = vcombine.low %v987_v14, %v991_v21  ;;  %v7347_v14 = vadd.f32 %v10550_v57, %v10482_v54 }
 0x3fa   : > { %7650 = vmatprep.subr.bf16.mxu0 %v8485_v29  ;;  %v855_v30 = vld [vmem:[%s9415_s25 + $0x12f8] sm:$0xff] }
 0x3fb   : > { %7690 = vmatpush1.bf16.msra.mxu1 %v8620_v28  ;;  %v979_v33 = vld [vmem:[%s9415_s25 + $0x16d8] sm:$0xff]  ;;  %v8565_v27 = vcombine.high %v851_v26, %v855_v30  ;;  %v8564_v23 = vcombine.low %v851_v26, %v855_v30 }
 0x3fc   : > { %7691 = vmatprep.subr.bf16.mxu1 %v8613_v37  ;;  %v983_v24 = vld [vmem:[%s9415_s25 + $0x16f8] sm:$0xff] }
 0x3fd   : > { %7651 = vmatpush1.bf16.msra.mxu0 %v8484_v17  ;;  %v8693_v35 = vcombine.high %v979_v33, %v983_v24  ;;  %v843_v28 = vld [vmem:[%s9415_s25 + $0x1298] sm:$0xff]  ;;  %v8692_v58 = vcombine.low %v979_v33, %v983_v24  ;;  %v7388_v24 = vadd.f32 %v10552_v0, %v7347_v14 }
 0x3fe   : > { %7652 = vmatprep.subr.bf16.mxu0 %v8477_v41  ;;  %v847_v29 = vld [vmem:[%s9415_s25 + $0x12b8] sm:$0xff] }
 0x3ff   : > { %7692 = vmatpush1.bf16.msra.mxu1 %v8612_v59  ;;  %v971_v37 = vld [vmem:[%s9415_s25 + $0x1698] sm:$0xff]  ;;  %v8557_v38 = vcombine.high %v843_v28, %v847_v29  ;;  %v8556_v46 = vcombine.low %v843_v28, %v847_v29 }
 0x400   : > { %7693 = vmatprep.subr.bf16.mxu1 %v8605_v43  ;;  %v975_v34 = vld [vmem:[%s9415_s25 + $0x16b8] sm:$0xff] }
 0x401   : > { %7653 = vmatpush1.bf16.msra.mxu0 %v8476_v60  ;;  %v8685_v17 = vcombine.high %v971_v37, %v975_v34  ;;  %v835_v59 = vld [vmem:[%s9415_s25 + $0x1258] sm:$0xff]  ;;  %v8684_v42 = vcombine.low %v971_v37, %v975_v34 }
 0x402   : > { %7654 = vmatprep.subr.bf16.mxu0 %v8597_v36  ;;  %v839_v41 = vld [vmem:[%s9415_s25 + $0x1278] sm:$0xff] }
 0x403   : > { %7694 = vmatpush1.bf16.msra.mxu1 %v8604_v62  ;;  %v963_v43 = vld [vmem:[%s9415_s25 + $0x1658] sm:$0xff]  ;;  %v8549_v56 = vcombine.high %v835_v59, %v839_v41  ;;  %v8548_v1 = vcombine.low %v835_v59, %v839_v41 }
 0x404   : > { %7695 = vmatprep.subr.bf16.mxu1 %v8725_v52  ;;  %v967_v44 = vld [vmem:[%s9415_s25 + $0x1678] sm:$0xff] }
 0x405   : > { %7655 = vmatpush2.bf16.msra.mxu0 %v8596_v3  ;;  %v8677_v60 = vcombine.high %v963_v43, %v967_v44  ;;  %v827_v62 = vld [vmem:[%s9415_s25 + $0x1218] sm:$0xff]  ;;  %v8676_v40 = vcombine.low %v963_v43, %v967_v44 }
 0x406   : > { %7656 = vmatprep.subr.bf16.mxu0 %v8589_v5  ;;  %v831_v36 = vld [vmem:[%s9415_s25 + $0x1238] sm:$0xff] }
 0x407   : > { %7696 = vmatpush2.bf16.msra.mxu1 %v8724_v63  ;;  %v955_v52 = vld [vmem:[%s9415_s25 + $0x1618] sm:$0xff]  ;;  %v8541_v2 = vcombine.high %v827_v62, %v831_v36  ;;  %v8540_v51 = vcombine.low %v827_v62, %v831_v36 }
 0x408   : > { %7697 = vmatprep.subr.bf16.mxu1 %v8717_v6  ;;  %v959_v45 = vld [vmem:[%s9415_s25 + $0x1638] sm:$0xff] }
 0x409   : > { %7657 = vmatpush2.bf16.msra.mxu0 %v8588_v9  ;;  %v8669_v3 = vcombine.high %v955_v52, %v959_v45  ;;  %v1075_v63 = vld [vmem:[%s9415_s25 + $0x19d8] sm:$0xff]  ;;  %v8668_v47 = vcombine.low %v955_v52, %v959_v45  ;;  %v7345_v9 = vadd.f32 %v10542_v19, %v10473_v13 }
 0x40a   : > { %7658 = vmatprep.subr.bf16.mxu0 %v8581_v10  ;;  %v1079_v5 = vld [vmem:[%s9415_s25 + $0x19f8] sm:$0xff] }
 0x40b   : > { %7698 = vmatpush2.bf16.msra.mxu1 %v8716_v11  ;;  %v1203_v6 = vld [vmem:[%s9415_s25 + $0x1dd8] sm:$0xff]  ;;  %v8789_v48 = vcombine.high %v1075_v63, %v1079_v5  ;;  %v8788_v21 = vcombine.low %v1075_v63, %v1079_v5  ;;  %v7386_v13 = vadd.f32 %v10547_v50, %v7345_v9 }
 0x40c   : > { %7699 = vmatprep.subr.bf16.mxu1 %v8709_v49  ;;  %v1207_v7 = vld [vmem:[%s9415_s25 + $0x1df8] sm:$0xff] }
 0x40d   : > { %7659 = vmatpush2.bf16.msra.mxu0 %v8580_v22  ;;  %v8917_v11 = vcombine.high %v1203_v6, %v1207_v7  ;;  %v1067_v10 = vld [vmem:[%s9415_s25 + $0x1998] sm:$0xff]  ;;  %v8916_v22 = vcombine.low %v1203_v6, %v1207_v7 }
 0x40e   : > { %7660 = vmatprep.subr.bf16.mxu0 %v8573_v20  ;;  %v1071_v49 = vld [vmem:[%s9415_s25 + $0x19b8] sm:$0xff] }
 0x40f   : > { %7700 = vmatpush2.bf16.msra.mxu1 %v8708_v53  ;;  %v1195_v12 = vld [vmem:[%s9415_s25 + $0x1d98] sm:$0xff]  ;;  %v8781_v53 = vcombine.high %v1067_v10, %v1071_v49  ;;  %v8780_v50 = vcombine.low %v1067_v10, %v1071_v49 }
 0x410   : > { %7701 = vmatprep.subr.bf16.mxu1 %v8701_v25  ;;  %v1199_v16 = vld [vmem:[%s9415_s25 + $0x1db8] sm:$0xff] }
 0x411   : > { %7661 = vmatpush2.bf16.msra.mxu0 %v8572_v39  ;;  %v8909_v19 = vcombine.high %v1195_v12, %v1199_v16  ;;  %v1059_v20 = vld [vmem:[%s9415_s25 + $0x1958] sm:$0xff] }
 0x412   : > { %7662 = vmatprep.subr.bf16.mxu0 %v8565_v27  ;;  %v1063_v25 = vld [vmem:[%s9415_s25 + $0x1978] sm:$0xff] }
 0x413   : > { %7702 = vmatpush2.bf16.msra.mxu1 %v8700_v31  ;;  %v1187_v30 = vld [vmem:[%s9415_s25 + $0x1d58] sm:$0xff]  ;;  %v8908_v31 = vcombine.low %v1195_v12, %v1199_v16 }
 0x414   : > { %7703 = vmatprep.subr.bf16.mxu1 %v8693_v35  ;;  %v1191_v33 = vld [vmem:[%s9415_s25 + $0x1d78] sm:$0xff] }
 0x415   : > { %7663 = vmatpush2.bf16.msra.mxu0 %v8564_v23  ;;  %v8901_v0 = vcombine.high %v1187_v30, %v1191_v33  ;;  %v1051_v29 = vld [vmem:[%s9415_s25 + $0x1918] sm:$0xff]  ;;  %v8900_v41 = vcombine.low %v1187_v30, %v1191_v33 }
 0x416   : > { %7664 = vmatprep.subr.bf16.mxu0 %v8557_v38  ;;  %v1055_v37 = vld [vmem:[%s9415_s25 + $0x1938] sm:$0xff] }
 0x417   : > { %7704 = vmatpush2.bf16.msra.mxu1 %v8692_v58  ;;  %v1179_v34 = vld [vmem:[%s9415_s25 + $0x1d18] sm:$0xff]  ;;  %v8765_v43 = vcombine.high %v1051_v29, %v1055_v37 }
 0x418   : > { %7705 = vmatprep.subr.bf16.mxu1 %v8685_v17  ;;  %v1183_v23 = vld [vmem:[%s9415_s25 + $0x1d38] sm:$0xff]  ;;  %v8772_v17 = vcombine.low %v1059_v20, %v1063_v25 }
 0x419   : > { %7665 = vmatpush2.bf16.msra.mxu0 %v8556_v46  ;;  %v1043_v44 = vld [vmem:[%s9415_s25 + $0x18d8] sm:$0xff]  ;;  %v8892_v62 = vcombine.low %v1179_v34, %v1183_v23 }
 0x41a   : > { %7666 = vmatprep.subr.bf16.mxu0 %v8549_v56  ;;  %v1047_v46 = vld [vmem:[%s9415_s25 + $0x18f8] sm:$0xff] }
 0x41b   : > { %7706 = vmatpush2.bf16.msra.mxu1 %v8684_v42  ;;  %v1171_v42 = vld [vmem:[%s9415_s25 + $0x1cd8] sm:$0xff]  ;;  %v8757_v36 = vcombine.high %v1043_v44, %v1047_v46 }
 0x41c   : > { %7707 = vmatprep.subr.bf16.mxu1 %v8677_v60  ;;  %v1175_v56 = vld [vmem:[%s9415_s25 + $0x1cf8] sm:$0xff]  ;;  %v8764_v60 = vcombine.low %v1051_v29, %v1055_v37 }
 0x41d   : > { %7667 = vmatpush2.bf16.msra.mxu0 %v8548_v1  ;;  %v8885_v52 = vcombine.high %v1171_v42, %v1175_v56  ;;  %v1035_v45 = vld [vmem:[%s9415_s25 + $0x1898] sm:$0xff]  ;;  %v8884_v63 = vcombine.low %v1171_v42, %v1175_v56 }
 0x41e   : > { %7668 = vmatprep.subr.bf16.mxu0 %v8541_v2  ;;  %v1039_v1 = vld [vmem:[%s9415_s25 + $0x18b8] sm:$0xff] }
 0x41f   : > { %7708 = vmatpush2.bf16.msra.mxu1 %v8676_v40  ;;  %v1163_v40 = vld [vmem:[%s9415_s25 + $0x1c98] sm:$0xff]  ;;  %v8749_v5 = vcombine.high %v1035_v45, %v1039_v1  ;;  %v8748_v9 = vcombine.low %v1035_v45, %v1039_v1 }
 0x420   : > { %7709 = vmatprep.subr.bf16.mxu1 %v8669_v3  ;;  %v1167_v2 = vld [vmem:[%s9415_s25 + $0x1cb8] sm:$0xff]  ;;  %v8756_v3 = vcombine.low %v1043_v44, %v1047_v46 }
 0x421   : > { %7669 = vmatpush2.bf16.msra.mxu0 %v8540_v51  ;;  %v8877_v6 = vcombine.high %v1163_v40, %v1167_v2  ;;  %v1027_v7 = vld [vmem:[%s9415_s25 + $0x1858] sm:$0xff] }
 0x422   : > { %7720 = vmatprep.subr.bf16.mxu0 %v8789_v48  ;;  %v1031_v51 = vld [vmem:[%s9415_s25 + $0x1878] sm:$0xff] }
 0x423   : > { %7710 = vmatpush2.bf16.msra.mxu1 %v8668_v47  ;;  %v1155_v47 = vld [vmem:[%s9415_s25 + $0x1c58] sm:$0xff]  ;;  %v8741_v10 = vcombine.high %v1027_v7, %v1031_v51 }
 0x424   : > { %7761 = vmatprep.subr.bf16.mxu1 %v8917_v11  ;;  %v7426_v26 = vpop.f32.mrf.mxu0  ;;  %7671 = vmatmul.mubr.bf16.vlgmr.msra.gmra.mxu0 %v9683_v4  ;;  %v8773_v4 = vcombine.high %v1059_v20, %v1063_v25  ;;  %v1159_v48 = vld [vmem:[%s9415_s25 + $0x1c78] sm:$0xff]  ;;  %v8876_v11 = vcombine.low %v1163_v40, %v1167_v2 }
 0x425   : > { %v7427_v54 = vadd.f32 %v7426_v26, %v7386_v13  ;;  %7721 = vmatpush1.bf16.msra.mxu0 %v8788_v21  ;;  %7752 = vmatprep.mubr.bf16.mxu0 %v9699_v15  ;;  %v8869_v49 = vcombine.high %v1155_v47, %v1159_v48  ;;  %v1019_v12 = vld [vmem:[%s9415_s25 + $0x1818] sm:$0xff] }
 0x426   : > { %v7467_v57 = vpop.f32.mrf.mxu1  ;;  %7712 = vmatmul.mubr.bf16.vlgmr.msra.gmra.mxu1 %v9691_v8  ;;  %v7428_v39 = vpop.f32.mrf.mxu0  ;;  %7722 = vmatprep.subr.bf16.mxu0 %v8781_v53  ;;  %v1023_v16 = vld [vmem:[%s9415_s25 + $0x1838] sm:$0xff]  ;;  %v8868_v53 = vcombine.low %v1155_v47, %v1159_v48 }
 0x427   : > { %7762 = vmatpush1.bf16.msra.mxu1 %v8916_v22  ;;  %v7468_v27 = vadd.f32 %v7467_v57, %v7427_v54  ;;  %v7429_v35 = vadd.f32 %v7428_v39, %v7388_v24  ;;  %7793 = vmatprep.mubr.bf16.mxu1 %v9706_v18  ;;  %v8893_v18 = vcombine.high %v1179_v34, %v1183_v23  ;;  %v1147_v14 = vld [vmem:[%s9415_s25 + $0x1c18] sm:$0xff] }
 0x428   : > { %v7469_v28 = vpop.f32.mrf.mxu1  ;;  %7763 = vmatprep.subr.bf16.mxu1 %v8909_v19  ;;  %v7430_v8 = vpop.f32.mrf.mxu0  ;;  %v1151_v21 = vld [vmem:[%s9415_s25 + $0x1c38] sm:$0xff]  ;;  %v8740_v22 = vcombine.low %v1027_v7, %v1031_v51  ;;  %v8733_v13 = vcombine.high %v1019_v12, %v1023_v16  ;;  %v8732_v33 = vcombine.low %v1019_v12, %v1023_v16 }
 0x429   : > { %7806 = vst [vmem:[%s10030_s10 + $0x20] sm:$0xff] %v7468_v27  ;;  %v7470_v58 = vadd.f32 %v7469_v28, %v7429_v35  ;;  %7723 = vmatpush1.bf16.msra.mxu0 %v8780_v50  ;;  %v8861_v19 = vcombine.high %v1147_v14, %v1151_v21  ;;  %v1139_v20 = vld [vmem:[%s9415_s25 + $0x1bd8] sm:$0xff]  ;;  %v8860_v24 = vcombine.low %v1147_v14, %v1151_v21 }
 0x42a   : > { %v7471_v38 = vpop.f32.mrf.mxu1  ;;  %v7431_v59 = vpop.f32.mrf.mxu0  ;;  %7724 = vmatprep.subr.bf16.mxu0 %v8773_v4  ;;  %v1143_v25 = vld [vmem:[%s9415_s25 + $0x1bf8] sm:$0xff] }
 0x42b   : > { %7764 = vmatpush1.bf16.msra.mxu1 %v8908_v31  ;;  %7807 = vst [vmem:[%s10030_s10 + $0x28] sm:$0xff] %v7470_v58  ;;  %v1267_v26 = vld [vmem:[%s9415_s25 + $0x1fd8] sm:$0xff]  ;;  %v8853_v54 = vcombine.high %v1139_v20, %v1143_v25  ;;  %v8852_v27 = vcombine.low %v1139_v20, %v1143_v25 }
 0x42c   : > { %v7472_v15 = vpop.f32.mrf.mxu1  ;;  %7765 = vmatprep.subr.bf16.mxu1 %v8901_v0  ;;  %v1271_v30 = vld [vmem:[%s9415_s25 + $0x1ff8] sm:$0xff] }
 0x42d   : > { %7725 = vmatpush1.bf16.msra.mxu0 %v8772_v17  ;;  %v8981_v57 = vcombine.high %v1267_v26, %v1271_v30  ;;  %v1131_v50 = vld [vmem:[%s9415_s25 + $0x1b98] sm:$0xff]  ;;  %v8980_v35 = vcombine.low %v1267_v26, %v1271_v30 }
 0x42e   : > { %7726 = vmatprep.subr.bf16.mxu0 %v8765_v43  ;;  %v1135_v39 = vld [vmem:[%s9415_s25 + $0x1bb8] sm:$0xff] }
 0x42f   : > { %7766 = vmatpush1.bf16.msra.mxu1 %v8900_v41  ;;  %v1259_v31 = vld [vmem:[%s9415_s25 + $0x1f98] sm:$0xff]  ;;  %v8845_v28 = vcombine.high %v1131_v50, %v1135_v39  ;;  %v8844_v23 = vcombine.low %v1131_v50, %v1135_v39 }
 0x430   : > { %7767 = vmatprep.subr.bf16.mxu1 %v8893_v18  ;;  %v1263_v4 = vld [vmem:[%s9415_s25 + $0x1fb8] sm:$0xff] }
 0x431   : > { %7727 = vmatpush1.bf16.msra.mxu0 %v8764_v60  ;;  %v8973_v0 = vcombine.high %v1259_v31, %v1263_v4  ;;  %v1123_v29 = vld [vmem:[%s9415_s25 + $0x1b58] sm:$0xff]  ;;  %v8972_v58 = vcombine.low %v1259_v31, %v1263_v4 }
 0x432   : > { %7728 = vmatprep.subr.bf16.mxu0 %v8757_v36  ;;  %v1127_v37 = vld [vmem:[%s9415_s25 + $0x1b78] sm:$0xff] }
 0x433   : > { %7768 = vmatpush1.bf16.msra.mxu1 %v8892_v62  ;;  %v1251_v8 = vld [vmem:[%s9415_s25 + $0x1f58] sm:$0xff]  ;;  %v8837_v38 = vcombine.high %v1123_v29, %v1127_v37  ;;  %v8836_v18 = vcombine.low %v1123_v29, %v1127_v37 }
 0x434   : > { %7769 = vmatprep.subr.bf16.mxu1 %v8885_v52  ;;  %v1255_v34 = vld [vmem:[%s9415_s25 + $0x1f78] sm:$0xff] }
 0x435   : > { %7729 = vmatpush1.bf16.msra.mxu0 %v8756_v3  ;;  %v8965_v17 = vcombine.high %v1251_v8, %v1255_v34  ;;  %v1115_v59 = vld [vmem:[%s9415_s25 + $0x1b18] sm:$0xff]  ;;  %v8964_v44 = vcombine.low %v1251_v8, %v1255_v34 }
 0x436   : > { %7730 = vmatprep.subr.bf16.mxu0 %v8749_v5  ;;  %v1119_v41 = vld [vmem:[%s9415_s25 + $0x1b38] sm:$0xff] }
 0x437   : > { %7770 = vmatpush1.bf16.msra.mxu1 %v8884_v63  ;;  %v1243_v43 = vld [vmem:[%s9415_s25 + $0x1f18] sm:$0xff]  ;;  %v8829_v46 = vcombine.high %v1115_v59, %v1119_v41  ;;  %v8828_v52 = vcombine.low %v1115_v59, %v1119_v41 }
 0x438   : > { %7771 = vmatprep.subr.bf16.mxu1 %v8877_v6  ;;  %v1247_v15 = vld [vmem:[%s9415_s25 + $0x1f38] sm:$0xff] }
 0x439   : > { %7731 = vmatpush1.bf16.msra.mxu0 %v8748_v9  ;;  %v8957_v42 = vcombine.high %v1243_v43, %v1247_v15  ;;  %v1107_v56 = vld [vmem:[%s9415_s25 + $0x1ad8] sm:$0xff]  ;;  %v8956_v45 = vcombine.low %v1243_v43, %v1247_v15 }
 0x43a   : > { %7732 = vmatprep.subr.bf16.mxu0 %v8741_v10  ;;  %v1111_v60 = vld [vmem:[%s9415_s25 + $0x1af8] sm:$0xff] }
 0x43b   : > { %7772 = vmatpush1.bf16.msra.mxu1 %v8876_v11  ;;  %v1235_v62 = vld [vmem:[%s9415_s25 + $0x1ed8] sm:$0xff]  ;;  %v8821_v1 = vcombine.high %v1107_v56, %v1111_v60  ;;  %v8820_v6 = vcombine.low %v1107_v56, %v1111_v60 }
 0x43c   : > { %7773 = vmatprep.subr.bf16.mxu1 %v8869_v49  ;;  %v1239_v36 = vld [vmem:[%s9415_s25 + $0x1ef8] sm:$0xff] }
 0x43d   : > { %7733 = vmatpush1.bf16.msra.mxu0 %v8740_v22  ;;  %v8949_v40 = vcombine.high %v1235_v62, %v1239_v36  ;;  %v1099_v2 = vld [vmem:[%s9415_s25 + $0x1a98] sm:$0xff]  ;;  %v8948_v7 = vcombine.low %v1235_v62, %v1239_v36 }
 0x43e   : > { %7734 = vmatprep.subr.bf16.mxu0 %v8733_v13  ;;  %v1103_v3 = vld [vmem:[%s9415_s25 + $0x1ab8] sm:$0xff] }
 0x43f   : > { %7774 = vmatpush1.bf16.msra.mxu1 %v8868_v53  ;;  %v1227_v63 = vld [vmem:[%s9415_s25 + $0x1e98] sm:$0xff]  ;;  %v8813_v51 = vcombine.high %v1099_v2, %v1103_v3  ;;  %v8812_v49 = vcombine.low %v1099_v2, %v1103_v3 }
 0x440   : > { %7775 = vmatprep.subr.bf16.mxu1 %v8861_v19  ;;  %v1231_v5 = vld [vmem:[%s9415_s25 + $0x1eb8] sm:$0xff] }
 0x441   : > { %7735 = vmatpush1.bf16.msra.mxu0 %v8732_v33  ;;  %v8941_v47 = vcombine.high %v1227_v63, %v1231_v5  ;;  %v1091_v48 = vld [vmem:[%s9415_s25 + $0x1a58] sm:$0xff]  ;;  %v8940_v12 = vcombine.low %v1227_v63, %v1231_v5  ;;  %v1300_v33 = vsub.s32 6, %v9764_v32 }
 0x442   : > { %7736 = vmatprep.subr.bf16.mxu0 %v8853_v54  ;;  %v1095_v9 = vld [vmem:[%s9415_s25 + $0x1a78] sm:$0xff]  ;;  %v1304_v54 = vsub.s32 7, %v9764_v32 }
 0x443   : > { %7776 = vmatpush1.bf16.msra.mxu1 %v8860_v24  ;;  %v1219_v11 = vld [vmem:[%s9415_s25 + $0x1e58] sm:$0xff]  ;;  %v8805_v16 = vcombine.high %v1091_v48, %v1095_v9  ;;  %v8804_v19 = vcombine.low %v1091_v48, %v1095_v9 }
 0x444   : > { %7777 = vmatprep.subr.bf16.mxu1 %v8981_v57  ;;  %v1223_v10 = vld [vmem:[%s9415_s25 + $0x1e78] sm:$0xff]  ;;  %v9073_v57 = vld [vmem:[%s9771_s27] sm:$0xff] }
 0x445   : > { %7737 = vmatpush2.bf16.msra.mxu0 %v8852_v27  ;;  %v8933_v14 = vcombine.high %v1219_v11, %v1223_v10  ;;  %v1083_v21 = vld [vmem:[%s9415_s25 + $0x1a18] sm:$0xff]  ;;  %v8932_v20 = vcombine.low %v1219_v11, %v1223_v10  ;;  %v1301_v50 = vrot.slane %v9073_v57, %v1300_v33  ;;  %v1305_v39 = vrot.slane %v9073_v57, %v1304_v54 }
 0x446   : > { %7738 = vmatprep.subr.bf16.mxu0 %v8845_v28  ;;  %v1087_v22 = vld [vmem:[%s9415_s25 + $0x1a38] sm:$0xff] }
 0x447   : > { %7778 = vmatpush2.bf16.msra.mxu1 %v8980_v35  ;;  %v1211_v53 = vld [vmem:[%s9415_s25 + $0x1e18] sm:$0xff]  ;;  %v8797_v25 = vcombine.high %v1083_v21, %v1087_v22  ;;  %v8796_v30 = vcombine.low %v1083_v21, %v1087_v22 }
 0x448   : > { %7779 = vmatprep.subr.bf16.mxu1 %v8973_v0  ;;  %v1215_v13 = vld [vmem:[%s9415_s25 + $0x1e38] sm:$0xff] }
 0x449   : > { %7739 = vmatpush2.bf16.msra.mxu0 %v8844_v23  ;;  %v8925_v26 = vcombine.high %v1211_v53, %v1215_v13  ;;  %v8924_v24 = vcombine.low %v1211_v53, %v1215_v13 }
 0x44a   : > { %7740 = vmatprep.subr.bf16.mxu0 %v8837_v38 }
 0x44b   : > { %7780 = vmatpush2.bf16.msra.mxu1 %v8972_v58 }
 0x44c   : > { %7781 = vmatprep.subr.bf16.mxu1 %v8965_v17 }
 0x44d   : > { %7741 = vmatpush2.bf16.msra.mxu0 %v8836_v18 }
 0x44e   : > { %7742 = vmatprep.subr.bf16.mxu0 %v8829_v46 }
 0x44f   : > { %7782 = vmatpush2.bf16.msra.mxu1 %v8964_v44 }
 0x450   : > { %7783 = vmatprep.subr.bf16.mxu1 %v8957_v42 }
 0x451   : > { %7743 = vmatpush2.bf16.msra.mxu0 %v8828_v52 }
 0x452   : > { %7744 = vmatprep.subr.bf16.mxu0 %v8821_v1 }
 0x453   : > { %7784 = vmatpush2.bf16.msra.mxu1 %v8956_v45 }
 0x454   : > { %7785 = vmatprep.subr.bf16.mxu1 %v8949_v40 }
 0x455   : > { %7745 = vmatpush2.bf16.msra.mxu0 %v8820_v6 }
 0x456   : > { %7746 = vmatprep.subr.bf16.mxu0 %v8813_v51 }
 0x457   : > { %7786 = vmatpush2.bf16.msra.mxu1 %v8948_v7 }
 0x458   : > { %7787 = vmatprep.subr.bf16.mxu1 %v8941_v47 }
 0x459   : > { %7747 = vmatpush2.bf16.msra.mxu0 %v8812_v49 }
 0x45a   : > { %7748 = vmatprep.subr.bf16.mxu0 %v8805_v16 }
 0x45b   : > { %7788 = vmatpush2.bf16.msra.mxu1 %v8940_v12 }
 0x45c   : > { %7789 = vmatprep.subr.bf16.mxu1 %v8933_v14 }
 0x45d   : > { %7749 = vmatpush2.bf16.msra.mxu0 %v8804_v19 }
 0x45e   : > { %7750 = vmatprep.subr.bf16.mxu0 %v8797_v25 }
 0x45f   : > { %7790 = vmatpush2.bf16.msra.mxu1 %v8932_v20 }
 0x460   : > { %7791 = vmatprep.subr.bf16.mxu1 %v8925_v26 }
 0x461   : > { %7751 = vmatpush2.bf16.msra.mxu0 %v8796_v30 }
 0x463   : > { %7792 = vmatpush2.bf16.msra.mxu1 %v8924_v24 }
 0x464   : > { %v7508_v31 = vpop.f32.mrf.mxu0  ;;  %7753 = vmatmul.mubr.bf16.vlgmr.msra.gmra.mxu0 %v9779_v55 }
 0x465   : > { %v7509_v4 = vadd.f32 %v7508_v31, %v1301_v50 }
 0x466   : > { %v7549_v27 = vpop.f32.mrf.mxu1  ;;  %7794 = vmatmul.mubr.bf16.vlgmr.msra.gmra.mxu1 %v9785_v61  ;;  %v7510_v35 = vpop.f32.mrf.mxu0 }
 0x467   : > { %v7550_v28 = vadd.f32 %v7549_v27, %v7509_v4  ;;  %v7511_v0 = vadd.f32 %v7510_v35, %v1305_v39 }
 0x468   : > { %v7551_v29 = vpop.f32.mrf.mxu1  ;;  %v7512_v37 = vpop.f32.mrf.mxu0 }
 0x469   : > { %v7552_v8 = vadd.f32 %v7551_v29, %v7511_v0 }
 0x46a   : > { %v7553_v34 = vpop.f32.mrf.mxu1  ;;  %v7513_v32 = vpop.f32.mrf.mxu0 }
 0x46c   : > { %v7554_v23 = vpop.f32.mrf.mxu1 }
 0x4a4   : > { %v7590_v58 = vpop.f32.mrf.mxu0 }
 0x4a5   : > { %v7591_v38 = vadd.f32 %v7590_v58, %v7550_v28 }
 0x4a6   : > { %v7631_v17 = vpop.f32.mrf.mxu1  ;;  %v7592_v59 = vpop.f32.mrf.mxu0 }
 0x4a7   : > { %v7632_v41 = vadd.f32 %v7631_v17, %v7591_v38  ;;  %v7593_v43 = vadd.f32 %v7592_v59, %v7552_v8 }
 0x4a8   : > { %v7633_v55 = vpop.f32.mrf.mxu1  ;;  %v7594_v15 = vpop.f32.mrf.mxu0 }
 0x4a9   : > { %v7634_v18 = vadd.f32 %v7633_v55, %v7593_v43 }
 0x4aa   : > { %v7635_v44 = vpop.f32.mrf.mxu1  ;;  %v7595_v61 = vpop.f32.mrf.mxu0 }
 0x4ac   : > { %v7636_v46 = vpop.f32.mrf.mxu1 }
 0x4e4   : > { %v7672_v42 = vpop.f32.mrf.mxu0 }
 0x4e5   : > { %v7673_v40 = vadd.f32 %v7672_v42, %v7632_v41 }
 0x4e6   : > { %v7713_v56 = vpop.f32.mrf.mxu1  ;;  %v7674_v60 = vpop.f32.mrf.mxu0 }
 0x4e7   : > { %v7675_v2 = vadd.f32 %v7674_v60, %v7634_v18  ;;  %v7714_v3 = vadd.f32 %v7713_v56, %v7673_v40 }
 0x4e8   : > { %v7715_v62 = vpop.f32.mrf.mxu1  ;;  %v7676_v36 = vpop.f32.mrf.mxu0 }
 0x4e9   : > { %v7716_v5 = vadd.f32 %v7715_v62, %v7675_v2 }
 0x4ea   : > { %v7717_v52 = vpop.f32.mrf.mxu1  ;;  %v7677_v45 = vpop.f32.mrf.mxu0 }
 0x4ec   : > { %v7718_v1 = vpop.f32.mrf.mxu1 }
 0x524   : > { %v7754_v63 = vpop.f32.mrf.mxu0 }
 0x525   : > { %v7755_v6 = vadd.f32 %v7754_v63, %v7714_v3 }
 0x526   : > { %v7795_v7 = vpop.f32.mrf.mxu1  ;;  %v7756_v51 = vpop.f32.mrf.mxu0 }
 0x527   : > { %v7796_v47 = vadd.f32 %v7795_v7, %v7755_v6  ;;  %v7757_v48 = vadd.f32 %v7756_v51, %v7716_v5 }
 0x528   : > { %v7797_v9 = vpop.f32.mrf.mxu1  ;;  %v7758_v11 = vpop.f32.mrf.mxu0 }
 0x529   : > { %7808 = vst [vmem:[%s10030_s10 + $0x30] sm:$0xff] %v7796_v47  ;;  %v7798_v10 = vadd.f32 %v7797_v9, %v7757_v48 }
 0x52a   : > { %v7799_v49 = vpop.f32.mrf.mxu1  ;;  %v7759_v12 = vpop.f32.mrf.mxu0 }
 0x52b   : > { %7809 = vst [vmem:[%s10030_s10 + $0x38] sm:$0xff] %v7798_v10 }
 0x52c   : > { %v7800_v16 = vpop.f32.mrf.mxu1 }
 0x52d   : > { %9169 = shalt.err (!%p9166_p1)
}
 0x52e   : > { %s9170_s21 = scalar_lea.hbm %s10695_s9, 1024  ;;  %s9174_s23 = scalar_lea.hbm %s10742_s3, 2048 }
 0x52f   : > { %p9171_p7 = scmp.ne.s32.totalorder %s10695_s9, %s9170_s21  ;;  %p9175_p3 = scmp.lt.s32.totalorder %s10695_s9, %s10742_s3 }
 0x530   : > { %p9176_p4 = scmp.lt.s32.totalorder %s9174_s23, %s9170_s21 }
 0x531   : > { %p9172_p11 = pnand %p9171_p7, %p10756_p5 }
 0x532   : > { %p9177_p6 = por %p9176_p4, %p9175_p3 }
 0x533   : > { %p9173_p8 = pneg %p9172_p11 }
 0x535   : > { %p9178_p9 = pnand %p9177_p6, %p9173_p8 }
 0x537   : > { %9181 = shalt.err (!%p9178_p9)
}
 0x538   : > { %8998 = dma.vmem_to_hbm [thread:$0]  (%p10756_p5), %s10697_s5, 1024, %s10695_s9, %s7811_s24  }
 0x539 PF: > { %s7837_s27 = sand.u32 1, %s9212_s12   ;;  %p10757_p12 = scmp.ne.s32.totalorder %s10750_s28, 0 }
 0x53a   : > { %p10758_p0 = scmp.ge.s32.totalorder %s9224_s15, 2  ;;  %s7838_s4 = scalar_lea.sflag [#allocation4], %s7837_s27 }
 0x53c   : > { %p9012_p10 = pnand %p10758_p0, %p10757_p12 }
 0x53e   : > { %p9013_p2 = pneg %p9012_p10 }
 0x540   : > { %9207 = dma.done.wait (%p9013_p2), %s7838_s4, 1024  }
 0x541   : > { %9209 = vsyncadd (%p9013_p2), %s7838_s4, 4294966272  ;;  %p17_p13 = scmp.ge.s32.totalorder %s9274_s16, 4   ;;  %s10759_s12 = smov %s9216_s13 }
 0x542   : > { %s10760_s13 = smov %s9220_s14  ;;  %s10761_s14 = smov %s9285_s19 }
 0x543   : > { %s10762_s15 = smov %s9274_s16  ;;  %19 = sbr.rel (!%p17_p13) target bundleno = 6 (0x6), region = 93 }
 0x548   :  { %7843 = vsyncpa [#allocation3], 1 }
 0x549   :  { %7845 = vsyncpa [#allocation3 + $0x1], 1 }
 0x54a   :  { %7846 = vsyncpa [#allocation6], 1 }
 0x54b   :  { %7848 = vsyncpa [#allocation6 + $0x1], 1 }
 0x54c   :  { %7849 = vsyncpa [#allocation4], 1 }
 0x54d   :  { %7851 = vsyncpa [#allocation4 + $0x1], 1 }

</bundles_post_ra>
